<compile_context>
chip_gen: v7x
topology: tpu7x:2x2x1
jax: 0.10.0
libtpu: 0.0.40
codegen_flags: <defaults>
</compile_context>

<pallas_src>
import functools

import jax
import jax.numpy as jnp
from jax.experimental import pallas as pl
from jax.experimental.pallas import tpu as pltpu


_LANE = 128


def _round_up(x, m):
    return (x + m - 1) // m * m


@functools.lru_cache(maxsize=1)
def _vmem_limit_bytes():
    """Generation-aware scoped VMEM limit (v7x only has 64 MiB per TC)."""
    cap = 128 * 1024 * 1024
    try:
        info = pltpu.get_tpu_info()
        cap = int(getattr(info, "vmem_capacity_bytes", cap) or cap)
    except Exception:  # query unsupported -> conservative default
        pass
    # 64 MiB on v5e/v6e (128 MiB physical); ~48 MiB on v7x (64 MiB physical),
    # leaving headroom for compiler-internal scratch / spills.
    return min(64 * 1024 * 1024, (cap * 3) // 4)


def _compiler_params(n_grid_axes=1):
    return pltpu.CompilerParams(
        dimension_semantics=("parallel",) * n_grid_axes,
        vmem_limit_bytes=_vmem_limit_bytes(),
    )


# ----------------------------- Pallas kernels ------------------------------ #

def _matmul_bn_kernel(x_ref, w_ref, s_ref, b_ref, o_ref, *, relu):
    """out = [relu](x @ w * scale + bias)  -- 1x1 conv as matmul + folded BN."""
    y = jnp.dot(x_ref[...], w_ref[...], preferred_element_type=jnp.float32)
    y = y * s_ref[...] + b_ref[...]
    if relu:
        y = jnp.maximum(y, 0.0)
    o_ref[...] = y.astype(o_ref.dtype)


def _matmul_bn_res_relu_kernel(x_ref, w_ref, s_ref, b_ref, res_ref, o_ref):
    """out = relu(x @ w * scale + bias + residual)  -- identity shortcut case."""
    y = jnp.dot(x_ref[...], w_ref[...], preferred_element_type=jnp.float32)
    y = y * s_ref[...] + b_ref[...] + res_ref[...].astype(jnp.float32)
    o_ref[...] = jnp.maximum(y, 0.0).astype(o_ref.dtype)


def _matmul_bn_ds_relu_kernel(x_ref, w_ref, s_ref, b_ref,
                              xs_ref, wd_ref, sd_ref, bd_ref, o_ref):
    """Final stage with the downsample branch fused in-kernel:
       out = relu(x @ w3 * s3 + b3 + (x_sub @ wd * sd + bd))."""
    y = jnp.dot(x_ref[...], w_ref[...], preferred_element_type=jnp.float32)
    y = y * s_ref[...] + b_ref[...]
    idn = jnp.dot(xs_ref[...], wd_ref[...], preferred_element_type=jnp.float32)
    idn = idn * sd_ref[...] + bd_ref[...]
    o_ref[...] = jnp.maximum(y + idn, 0.0).astype(o_ref.dtype)


def _conv3x3_bn_relu_kernel(ph_ref, w_ref, s_ref, b_ref, o_ref,
                            *, stride, Ho, Wo, Wph):
    """3x3 conv (pad=1, stride) + folded BN + ReLU for one image.

    ph_ref holds the phase-decomposed input, one flattened (Hst*Wph, C) frame
    per phase with Wph a multiple of 8.  Each tap (dy, dx) is then a single
    contiguous static slice of length Ho*Wph starting at qy*Wph + qx (the
    handful of wrapped/garbage elements only ever land in the unused columns
    ox >= Wo), so there is no per-tap slice+reshape relayout -- just 9
    accumulating MXU matmuls in f32.
    """
    C = w_ref.shape[-1]
    L = Ho * Wph
    acc = jnp.zeros((L, C), jnp.float32)
    for dy in range(3):
        for dx in range(3):
            p = (dy % stride) * stride + (dx % stride)
            qy, qx = dy // stride, dx // stride
            off = qy * Wph + qx
            patch = ph_ref[0, p, off:off + L, :]
            acc = acc + jnp.dot(patch, w_ref[dy * 3 + dx],
                                preferred_element_type=jnp.float32)
    y = acc * s_ref[...] + b_ref[...]
    y = jnp.maximum(y, 0.0).reshape(Ho, Wph, C)
    o_ref[0] = y[:, :Wo, :].astype(o_ref.dtype)   # drop the alignment columns once


# ------------------------------ call wrappers ------------------------------ #

def matmul_bn(x2d, w, scale, bias, *, relu, out_dtype=jnp.bfloat16, tm_target=1024):
    """(M,K) @ (K,N) + folded BN (+ReLU).  No row padding: ragged final block."""
    M, K = x2d.shape
    Kw, Nc = w.shape
    assert K == Kw
    tm = min(tm_target, M)            # full-dim block if M <= target
    grid_m = pl.cdiv(M, tm)
    flops = 2 * M * K * Nc
    bytes_accessed = (M * K * x2d.dtype.itemsize + K * Nc * w.dtype.itemsize
                      + M * Nc * jnp.dtype(out_dtype).itemsize + 2 * Nc * 4)
    return pl.pallas_call(
        functools.partial(_matmul_bn_kernel, relu=relu),
        out_shape=jax.ShapeDtypeStruct((M, Nc), out_dtype),
        grid_spec=pltpu.PrefetchScalarGridSpec(
            num_scalar_prefetch=0,
            grid=(grid_m,),
            in_specs=[
                pl.BlockSpec((tm, K), lambda i: (i, 0)),
                pl.BlockSpec((K, Nc), lambda i: (0, 0)),
                pl.BlockSpec((1, Nc), lambda i: (0, 0)),
                pl.BlockSpec((1, Nc), lambda i: (0, 0)),
            ],
            out_specs=pl.BlockSpec((tm, Nc), lambda i: (i, 0)),
        ),
        compiler_params=_compiler_params(1),
        cost_estimate=pl.CostEstimate(flops=flops, transcendentals=0,
                                      bytes_accessed=bytes_accessed),
    )(x2d, w, scale, bias)


def conv3_residual_relu(h2d, w3, s3, b3, *, residual=None, downsample=None,
                        out_dtype=jnp.bfloat16, tm_target=1024):
    """relu(h2d @ w3 * s3 + b3 + identity); identity is either a precomputed
    residual tensor or the downsample 1x1-conv branch computed in-kernel.
    bf16 writeback by default (halves store traffic on the final stage)."""
    M, K = h2d.shape
    Nc = w3.shape[1]
    tm = min(tm_target, M)
    grid_m = pl.cdiv(M, tm)
    flops = 2 * M * K * Nc
    bytes_accessed = (M * K * 2 + K * Nc * 2
                      + M * Nc * jnp.dtype(out_dtype).itemsize + 2 * Nc * 4)

    if downsample is not None:
        xs, wd, sd, bd = downsample
        Kd = xs.shape[1]
        kernel = _matmul_bn_ds_relu_kernel
        extra_args = (xs, wd, sd, bd)
        extra_specs = [
            pl.BlockSpec((tm, Kd), lambda i: (i, 0)),
            pl.BlockSpec((Kd, Nc), lambda i: (0, 0)),
            pl.BlockSpec((1, Nc), lambda i: (0, 0)),
            pl.BlockSpec((1, Nc), lambda i: (0, 0)),
        ]
        flops += 2 * M * Kd * Nc
        bytes_accessed += M * Kd * 2 + Kd * Nc * 2
    else:
        kernel = _matmul_bn_res_relu_kernel
        extra_args = (residual,)
        extra_specs = [pl.BlockSpec((tm, Nc), lambda i: (i, 0))]
        bytes_accessed += M * Nc * 2

    return pl.pallas_call(
        kernel,
        out_shape=jax.ShapeDtypeStruct((M, Nc), out_dtype),
        grid_spec=pltpu.PrefetchScalarGridSpec(
            num_scalar_prefetch=0,
            grid=(grid_m,),
            in_specs=[
                pl.BlockSpec((tm, K), lambda i: (i, 0)),
                pl.BlockSpec((K, Nc), lambda i: (0, 0)),
                pl.BlockSpec((1, Nc), lambda i: (0, 0)),
                pl.BlockSpec((1, Nc), lambda i: (0, 0)),
            ] + extra_specs,
            out_specs=pl.BlockSpec((tm, Nc), lambda i: (i, 0)),
        ),
        compiler_params=_compiler_params(1),
        cost_estimate=pl.CostEstimate(flops=flops, transcendentals=0,
                                      bytes_accessed=bytes_accessed),
    )(h2d, w3, s3, b3, *extra_args)


def conv3x3_bn_relu(h_nhwc, w9, scale, bias, *, stride):
    """3x3 conv (pad=1, stride) + folded BN + ReLU via phase decomposition.

    The per-phase frame width Wph is rounded to a multiple of 8 so in-kernel
    flattened views are layout-free; one extra safety row keeps tap slices in
    bounds.  stride==1 uses a single phase (one jnp.pad only, no stack)."""
    N, H, W, C = h_nhwc.shape
    s = stride
    Ho = (H - 1) // s + 1
    Wo = (W - 1) // s + 1
    qmax = 2 // s                                 # extra rows/cols a tap reaches
    Hph = Ho + qmax
    Wph = _round_up(max(Wo + qmax, 8), 8)         # sublane-aligned frame width
    Hst = Hph + 1                                 # safety row: slices never go OOB
    P = s * s

    if s == 1:
        # single phase: just the pad=1 halo plus alignment padding; no stack.
        ph = jnp.pad(h_nhwc, ((0, 0), (1, Hst - H - 1), (1, Wph - W - 1), (0, 0)))
        ph = ph.reshape(N, 1, Hst * Wph, C)
    else:
        # TODO(synk): write conv1's output directly into this phase layout via its
        #             out_specs index_map to avoid this extra HBM pass over h1.
        xp = jnp.pad(h_nhwc,
                     ((0, 0), (1, s * Hst - H - 1), (1, s * Wph - W - 1), (0, 0)))
        ph = jnp.stack([xp[:, py::s, px::s, :][:, :Hst, :Wph, :]
                        for py in range(s) for px in range(s)], axis=1)
        ph = ph.reshape(N, P, Hst * Wph, C)

    flops = 2 * N * Ho * Wph * C * C * 9
    bytes_accessed = ph.size * 2 + w9.size * 2 + N * Ho * Wo * C * 2 + 2 * C * 4
    out = pl.pallas_call(
        functools.partial(_conv3x3_bn_relu_kernel, stride=s, Ho=Ho, Wo=Wo, Wph=Wph),
        out_shape=jax.ShapeDtypeStruct((N, Ho, Wo, C), jnp.bfloat16),
        grid_spec=pltpu.PrefetchScalarGridSpec(
            num_scalar_prefetch=0,
            grid=(N,),
            in_specs=[
                pl.BlockSpec((1, P, Hst * Wph, C), lambda n: (n, 0, 0, 0)),
                pl.BlockSpec((9, C, C), lambda n: (0, 0, 0)),
                pl.BlockSpec((1, C), lambda n: (0, 0)),
                pl.BlockSpec((1, C), lambda n: (0, 0)),
            ],
            out_specs=pl.BlockSpec((1, Ho, Wo, C), lambda n: (n, 0, 0, 0)),
        ),
        compiler_params=_compiler_params(1),
        cost_estimate=pl.CostEstimate(flops=flops, transcendentals=0,
                                      bytes_accessed=bytes_accessed),
    )(ph, w9, scale, bias)
    return out, Ho, Wo


# ------------------------------ JAX-side glue ------------------------------ #

def fold_bn(gamma, beta, mean, var, c_pad, eps=1e-5):
    scale = gamma / jnp.sqrt(var + eps)
    bias = beta - mean * scale
    scale = jnp.pad(scale, (0, c_pad - scale.shape[0]))[None, :]
    bias = jnp.pad(bias, (0, c_pad - bias.shape[0]))[None, :]
    return scale.astype(jnp.float32), bias.astype(jnp.float32)


def _pad_matrix(w, rows, cols):
    return jnp.pad(w, ((0, rows - w.shape[0]), (0, cols - w.shape[1])))


def init_bottleneck_params(key, in_channels, out_channels, stride=1, width=1):
    expansion = 4
    cmid = out_channels * width
    cout = out_channels * expansion
    keys = jax.random.split(key, 8)

    def conv_w(k, co, ci, kh, kw):
        fan_in = ci * kh * kw
        return jax.random.normal(k, (co, ci, kh, kw), jnp.float32) * (2.0 / fan_in) ** 0.5

    def bn_p(k, c):
        k1, k2, k3, k4 = jax.random.split(k, 4)
        gamma = 1.0 + 0.1 * jax.random.normal(k1, (c,), jnp.float32)
        beta = 0.1 * jax.random.normal(k2, (c,), jnp.float32)
        mean = 0.1 * jax.random.normal(k3, (c,), jnp.float32)
        var = jnp.abs(jax.random.normal(k4, (c,), jnp.float32)) + 0.5
        return gamma, beta, mean, var

    params = dict(
        stride=stride,
        w1=conv_w(keys[0], cmid, in_channels, 1, 1), bn1=bn_p(keys[1], cmid),
        w2=conv_w(keys[2], cmid, cmid, 3, 3),        bn2=bn_p(keys[3], cmid),
        w3=conv_w(keys[4], cout, cmid, 1, 1),        bn3=bn_p(keys[5], cout),
        wd=None, bnd=None,
    )
    if stride != 1 or in_channels != cout:
        params["wd"] = conv_w(keys[6], cout, in_channels, 1, 1)
        params["bnd"] = bn_p(keys[7], cout)
    return params


def bottleneck_forward(params, x_nchw):
    """Matches BottleNeck.forward (inference-mode BN). I/O is NCHW like PyTorch."""
    stride = params["stride"]
    # TODO(synk): the boundary transposes could be dropped if the caller used NHWC.
    x = jnp.transpose(x_nchw, (0, 2, 3, 1))                  # NCHW -> NHWC
    N, H, W, Cin = x.shape
    Cin_p = _round_up(Cin, _LANE)
    x_bf = jnp.pad(x, ((0, 0), (0, 0), (0, 0), (0, Cin_p - Cin))).astype(jnp.bfloat16)

    # ---- conv1 (1x1) + bn1 + relu1 ---------------------------------------- #
    w1 = params["w1"][:, :, 0, 0].T                           # (Cin, Cmid)
    Cmid = w1.shape[1]
    Cmid_p = _round_up(Cmid, _LANE)
    w1p = _pad_matrix(w1, Cin_p, Cmid_p).astype(jnp.bfloat16)
    s1, b1 = fold_bn(*params["bn1"], Cmid_p)
    h1 = matmul_bn(x_bf.reshape(N * H * W, Cin_p), w1p, s1, b1, relu=True)
    h1 = h1.reshape(N, H, W, Cmid_p)

    # ---- conv2 (3x3, stride, pad 1) + bn2 + relu2 -------------------------- #
    w2 = jnp.transpose(params["w2"], (2, 3, 1, 0))            # OIHW -> HWIO
    w2p = jnp.pad(w2, ((0, 0), (0, 0), (0, Cmid_p - Cmid), (0, Cmid_p - Cmid)))
    w2p = w2p.reshape(9, Cmid_p, Cmid_p).astype(jnp.bfloat16)
    s2, b2 = fold_bn(*params["bn2"], Cmid_p)
    h2_4d, Ho, Wo = conv3x3_bn_relu(h1, w2p, s2, b2, stride=stride)
    h2 = h2_4d.reshape(N * Ho * Wo, Cmid_p)                   # free (contiguous) reshape

    # ---- conv3 (1x1) + bn3 + residual add + relu3 (single fused kernel) ---- #
    w3 = params["w3"][:, :, 0, 0].T                           # (Cmid, Cout)
    Cout = w3.shape[1]
    Cout_p = _round_up(Cout, _LANE)
    w3p = _pad_matrix(w3, Cmid_p, Cout_p).astype(jnp.bfloat16)
    s3, b3 = fold_bn(*params["bn3"], Cout_p)

    M2 = N * Ho * Wo
    if params["wd"] is not None:
        # TODO(synk): express the stride-s subsample via the final kernel's BlockSpec
        #             index_map (grid over (n, oy)) instead of this XLA strided gather.
        x_sub = x_bf[:, ::stride, ::stride, :].reshape(M2, Cin_p)
        wd = params["wd"][:, :, 0, 0].T                       # (Cin, Cout)
        wdp = _pad_matrix(wd, Cin_p, Cout_p).astype(jnp.bfloat16)
        sd, bd = fold_bn(*params["bnd"], Cout_p)
        out2d = conv3_residual_relu(h2, w3p, s3, b3,
                                    downsample=(x_sub, wdp, sd, bd))
    else:
        # stride == 1 and Cin == Cout here, so padded shapes line up.
        out2d = conv3_residual_relu(h2, w3p, s3, b3,
                                    residual=x_bf.reshape(M2, Cin_p))

    out = out2d.reshape(N, Ho, Wo, Cout_p)[..., :Cout].astype(jnp.float32)
    return jnp.transpose(out, (0, 3, 1, 2))                   # NHWC -> NCHW


# ------------------------- pure-JAX reference check ------------------------ #

def bottleneck_reference(params, x_nchw, eps=1e-5):
    stride = params["stride"]

    def conv(h, w, s, pad):
        return jax.lax.conv_general_dilated(
            h, w, window_strides=(s, s), padding=pad,
            dimension_numbers=("NCHW", "OIHW", "NCHW"))

    def bn(h, p):
        g, b, m, v = p
        inv = g / jnp.sqrt(v + eps)
        return h * inv[None, :, None, None] + (b - m * inv)[None, :, None, None]

    x = x_nchw.astype(jnp.float32)
    out = jax.nn.relu(bn(conv(x, params["w1"], 1, "VALID"), params["bn1"]))
    out = jax.nn.relu(bn(conv(out, params["w2"], stride, [(1, 1), (1, 1)]), params["bn2"]))
    out = bn(conv(out, params["w3"], 1, "VALID"), params["bn3"])
    if params["wd"] is not None:
        identity = bn(conv(x, params["wd"], stride, "VALID"), params["bnd"])
    else:
        identity = x
    return jax.nn.relu(out + identity)


# ---------------------------------- main ----------------------------------- #

if __name__ == "__main__":
    key = jax.random.PRNGKey(0)
    N, H, W = 2, 16, 16

    cases = [
        dict(in_channels=8, out_channels=4, stride=2),    # downsample branch active
        dict(in_channels=16, out_channels=4, stride=1),   # identity shortcut
    ]
    for idx, cfg in enumerate(cases):
        kx, kp = jax.random.split(jax.random.fold_in(key, idx))
        x = jax.random.normal(kx, (N, cfg["in_channels"], H, W), jnp.float32)  # NCHW
        params = init_bottleneck_params(kp, cfg["in_channels"], cfg["out_channels"],
                                        stride=cfg["stride"])

        fwd = jax.jit(lambda xx, p=params: bottleneck_forward(p, xx))
        y = jax.block_until_ready(fwd(x))

        Ho = (H - 1) // cfg["stride"] + 1
        expected = (N, cfg["out_channels"] * 4, Ho, Ho)
        assert y.shape == expected, (y.shape, expected)
        assert bool(jnp.all(y >= 0.0))                         # final ReLU

        ref = bottleneck_reference(params, x)
        err = float(jnp.max(jnp.abs(y.astype(jnp.float32) - ref)))
        tol = 0.05 * (float(jnp.max(jnp.abs(ref))) + 1.0)      # tightened bf16 tolerance
        assert err <= tol, (cfg, err, tol)

    print("KERNEL_OK")
</pallas_src>

<mosaic_0001>
module attributes {stable_mosaic.version = 11 : i64} {
  func.func @_matmul_bn_kernel(%arg0: i32, %arg1: memref<512x128xbf16, #tpu.memory_space<vmem>>, %arg2: memref<128x128xbf16, #tpu.memory_space<vmem>>, %arg3: memref<1x128xf32, #tpu.memory_space<vmem>>, %arg4: memref<1x128xf32, #tpu.memory_space<vmem>>, %arg5: memref<512x128xbf16, #tpu.memory_space<vmem>>) attributes {dimension_semantics = [#tpu.dimension_semantics<parallel>], iteration_bounds = array<i64: 1>, scalar_prefetch = 0 : i64, scratch_operands = 0 : i64, tpu.core_type = #tpu.core_type<tc>, window_params = [{transform_indices = @transform_0, window_bounds = array<i64: 512, 128>}, {pipeline_mode = #tpu.pipeline_mode<synchronous>, transform_indices = @transform_1, window_bounds = array<i64: 128, 128>}, {pipeline_mode = #tpu.pipeline_mode<synchronous>, transform_indices = @transform_2, window_bounds = array<i64: 1, 128>}, {pipeline_mode = #tpu.pipeline_mode<synchronous>, transform_indices = @transform_3, window_bounds = array<i64: 1, 128>}, {transform_indices = @transform_4, window_bounds = array<i64: 512, 128>}]} {
    %c0 = arith.constant 0 : index
    %c0_0 = arith.constant 0 : index
    %0 = vector.load %arg1[%c0, %c0_0] : memref<512x128xbf16, #tpu.memory_space<vmem>>, vector<512x128xbf16>
    %c0_1 = arith.constant 0 : index
    %c0_2 = arith.constant 0 : index
    %1 = vector.load %arg2[%c0_1, %c0_2] : memref<128x128xbf16, #tpu.memory_space<vmem>>, vector<128x128xbf16>
    %cst = arith.constant dense<0.000000e+00> : vector<512x128xf32>
    %2 = tpu.matmul %0, %1, %cst {dimension_numbers = #tpu.dot_dimension_numbers<[1], [0], [0], [1], [0, 0, 1, 1], [], []>} : vector<512x128xbf16>, vector<128x128xbf16>, vector<512x128xf32> -> vector<512x128xf32>
    %c0_3 = arith.constant 0 : index
    %c0_4 = arith.constant 0 : index
    %3 = vector.load %arg3[%c0_3, %c0_4] : memref<1x128xf32, #tpu.memory_space<vmem>>, vector<1x128xf32>
    %4 = vector.broadcast %3 : vector<1x128xf32> to vector<512x128xf32>
    %5 = arith.mulf %2, %4 : vector<512x128xf32>
    %c0_5 = arith.constant 0 : index
    %c0_6 = arith.constant 0 : index
    %6 = vector.load %arg4[%c0_5, %c0_6] : memref<1x128xf32, #tpu.memory_space<vmem>>, vector<1x128xf32>
    %7 = vector.broadcast %6 : vector<1x128xf32> to vector<512x128xf32>
    %8 = arith.addf %5, %7 : vector<512x128xf32>
    %cst_7 = arith.constant 0.000000e+00 : f32
    %9 = vector.broadcast %cst_7 : f32 to vector<512x128xf32>
    %10 = arith.maximumf %8, %9 : vector<512x128xf32>
    %11 = arith.truncf %10 : vector<512x128xf32> to vector<512x128xbf16>
    %c0_8 = arith.constant 0 : index
    %c0_9 = arith.constant 0 : index
    %12 = vector.load %arg5[%c0_8, %c0_9] : memref<512x128xbf16, #tpu.memory_space<vmem>>, vector<512x128xbf16>
    tpu.vector_store %arg5[%c0_8, %c0_9], %11 {strides = array<i32>} : memref<512x128xbf16, #tpu.memory_space<vmem>>, vector<512x128xbf16>,
    return
  }
  func.func @transform_0(%arg0: i32) -> (i32, i32) {
    %c0_i32 = arith.constant 0 : i32
    %c0_i32_0 = arith.constant 0 : i32
    return %arg0, %c0_i32 : i32, i32
  }
  func.func @transform_1(%arg0: i32) -> (i32, i32) {
    %c0_i32 = arith.constant 0 : i32
    %c0_i32_0 = arith.constant 0 : i32
    %c0_i32_1 = arith.constant 0 : i32
    return %c0_i32, %c0_i32_0 : i32, i32
  }
  func.func @transform_2(%arg0: i32) -> (i32, i32) {
    %c0_i32 = arith.constant 0 : i32
    %c0_i32_0 = arith.constant 0 : i32
    %c0_i32_1 = arith.constant 0 : i32
    return %c0_i32, %c0_i32_0 : i32, i32
  }
  func.func @transform_3(%arg0: i32) -> (i32, i32) {
    %c0_i32 = arith.constant 0 : i32
    %c0_i32_0 = arith.constant 0 : i32
    %c0_i32_1 = arith.constant 0 : i32
    return %c0_i32, %c0_i32_0 : i32, i32
  }
  func.func @transform_4(%arg0: i32) -> (i32, i32) {
    %c0_i32 = arith.constant 0 : i32
    %c0_i32_0 = arith.constant 0 : i32
    return %arg0, %c0_i32 : i32, i32
  }
}

module attributes {stable_mosaic.version = 11 : i64} {
  func.func @_conv3x3_bn_relu_kernel(%arg0: i32, %arg1: memref<1x4x160x128xbf16, #tpu.memory_space<vmem>>, %arg2: memref<9x128x128xbf16, #tpu.memory_space<vmem>>, %arg3: memref<1x128xf32, #tpu.memory_space<vmem>>, %arg4: memref<1x128xf32, #tpu.memory_space<vmem>>, %arg5: memref<1x8x8x128xbf16, #tpu.memory_space<vmem>>) attributes {dimension_semantics = [#tpu.dimension_semantics<parallel>], iteration_bounds = array<i64: 2>, scalar_prefetch = 0 : i64, scratch_operands = 0 : i64, tpu.core_type = #tpu.core_type<tc>, window_params = [{transform_indices = @transform_0, window_bounds = array<i64: 1, 4, 160, 128>}, {pipeline_mode = #tpu.pipeline_mode<synchronous>, transform_indices = @transform_1, window_bounds = array<i64: 9, 128, 128>}, {pipeline_mode = #tpu.pipeline_mode<synchronous>, transform_indices = @transform_2, window_bounds = array<i64: 1, 128>}, {pipeline_mode = #tpu.pipeline_mode<synchronous>, transform_indices = @transform_3, window_bounds = array<i64: 1, 128>}, {transform_indices = @transform_4, window_bounds = array<i64: 1, 8, 8, 128>}]} {
    %cst = arith.constant 0.000000e+00 : f32
    %0 = vector.broadcast %cst : f32 to vector<128x128xf32>
    %c0 = arith.constant 0 : index
    %c0_0 = arith.constant 0 : index
    %c0_1 = arith.constant 0 : index
    %c0_2 = arith.constant 0 : index
    %1 = vector.load %arg1[%c0, %c0_0, %c0_1, %c0_2] : memref<1x4x160x128xbf16, #tpu.memory_space<vmem>>, vector<1x1x128x128xbf16>
    %2 = vector.shape_cast %1 : vector<1x1x128x128xbf16> to vector<128x128xbf16>
    %c0_3 = arith.constant 0 : index
    %c0_4 = arith.constant 0 : index
    %c0_5 = arith.constant 0 : index
    %3 = vector.load %arg2[%c0_3, %c0_4, %c0_5] : memref<9x128x128xbf16, #tpu.memory_space<vmem>>, vector<1x128x128xbf16>
    %4 = vector.shape_cast %3 : vector<1x128x128xbf16> to vector<128x128xbf16>
    %cst_6 = arith.constant dense<0.000000e+00> : vector<128x128xf32>
    %5 = tpu.matmul %2, %4, %cst_6 {dimension_numbers = #tpu.dot_dimension_numbers<[1], [0], [0], [1], [0, 0, 1, 1], [], []>} : vector<128x128xbf16>, vector<128x128xbf16>, vector<128x128xf32> -> vector<128x128xf32>
    %6 = arith.addf %0, %5 : vector<128x128xf32>
    %c0_7 = arith.constant 0 : index
    %c1 = arith.constant 1 : index
    %c0_8 = arith.constant 0 : index
    %c0_9 = arith.constant 0 : index
    %7 = vector.load %arg1[%c0_7, %c1, %c0_8, %c0_9] : memref<1x4x160x128xbf16, #tpu.memory_space<vmem>>, vector<1x1x128x128xbf16>
    %8 = vector.shape_cast %7 : vector<1x1x128x128xbf16> to vector<128x128xbf16>
    %c1_10 = arith.constant 1 : index
    %c0_11 = arith.constant 0 : index
    %c0_12 = arith.constant 0 : index
    %9 = vector.load %arg2[%c1_10, %c0_11, %c0_12] : memref<9x128x128xbf16, #tpu.memory_space<vmem>>, vector<1x128x128xbf16>
    %10 = vector.shape_cast %9 : vector<1x128x128xbf16> to vector<128x128xbf16>
    %cst_13 = arith.constant dense<0.000000e+00> : vector<128x128xf32>
    %11 = tpu.matmul %8, %10, %cst_13 {dimension_numbers = #tpu.dot_dimension_numbers<[1], [0], [0], [1], [0, 0, 1, 1], [], []>} : vector<128x128xbf16>, vector<128x128xbf16>, vector<128x128xf32> -> vector<128x128xf32>
    %12 = arith.addf %6, %11 : vector<128x128xf32>
    %c0_14 = arith.constant 0 : index
    %c0_15 = arith.constant 0 : index
    %c1_16 = arith.constant 1 : index
    %c0_17 = arith.constant 0 : index
    %13 = vector.load %arg1[%c0_14, %c0_15, %c1_16, %c0_17] : memref<1x4x160x128xbf16, #tpu.memory_space<vmem>>, vector<1x1x128x128xbf16>
    %14 = vector.shape_cast %13 : vector<1x1x128x128xbf16> to vector<128x128xbf16>
    %c2 = arith.constant 2 : index
    %c0_18 = arith.constant 0 : index
    %c0_19 = arith.constant 0 : index
    %15 = vector.load %arg2[%c2, %c0_18, %c0_19] : memref<9x128x128xbf16, #tpu.memory_space<vmem>>, vector<1x128x128xbf16>
    %16 = vector.shape_cast %15 : vector<1x128x128xbf16> to vector<128x128xbf16>
    %cst_20 = arith.constant dense<0.000000e+00> : vector<128x128xf32>
    %17 = tpu.matmul %14, %16, %cst_20 {dimension_numbers = #tpu.dot_dimension_numbers<[1], [0], [0], [1], [0, 0, 1, 1], [], []>} : vector<128x128xbf16>, vector<128x128xbf16>, vector<128x128xf32> -> vector<128x128xf32>
    %18 = arith.addf %12, %17 : vector<128x128xf32>
    %c0_21 = arith.constant 0 : index
    %c2_22 = arith.constant 2 : index
    %c0_23 = arith.constant 0 : index
    %c0_24 = arith.constant 0 : index
    %19 = vector.load %arg1[%c0_21, %c2_22, %c0_23, %c0_24] : memref<1x4x160x128xbf16, #tpu.memory_space<vmem>>, vector<1x1x128x128xbf16>
    %20 = vector.shape_cast %19 : vector<1x1x128x128xbf16> to vector<128x128xbf16>
    %c3 = arith.constant 3 : index
    %c0_25 = arith.constant 0 : index
    %c0_26 = arith.constant 0 : index
    %21 = vector.load %arg2[%c3, %c0_25, %c0_26] : memref<9x128x128xbf16, #tpu.memory_space<vmem>>, vector<1x128x128xbf16>
    %22 = vector.shape_cast %21 : vector<1x128x128xbf16> to vector<128x128xbf16>
    %cst_27 = arith.constant dense<0.000000e+00> : vector<128x128xf32>
    %23 = tpu.matmul %20, %22, %cst_27 {dimension_numbers = #tpu.dot_dimension_numbers<[1], [0], [0], [1], [0, 0, 1, 1], [], []>} : vector<128x128xbf16>, vector<128x128xbf16>, vector<128x128xf32> -> vector<128x128xf32>
    %24 = arith.addf %18, %23 : vector<128x128xf32>
    %c0_28 = arith.constant 0 : index
    %c3_29 = arith.constant 3 : index
    %c0_30 = arith.constant 0 : index
    %c0_31 = arith.constant 0 : index
    %25 = vector.load %arg1[%c0_28, %c3_29, %c0_30, %c0_31] : memref<1x4x160x128xbf16, #tpu.memory_space<vmem>>, vector<1x1x128x128xbf16>
    %26 = vector.shape_cast %25 : vector<1x1x128x128xbf16> to vector<128x128xbf16>
    %c4 = arith.constant 4 : index
    %c0_32 = arith.constant 0 : index
    %c0_33 = arith.constant 0 : index
    %27 = vector.load %arg2[%c4, %c0_32, %c0_33] : memref<9x128x128xbf16, #tpu.memory_space<vmem>>, vector<1x128x128xbf16>
    %28 = vector.shape_cast %27 : vector<1x128x128xbf16> to vector<128x128xbf16>
    %cst_34 = arith.constant dense<0.000000e+00> : vector<128x128xf32>
    %29 = tpu.matmul %26, %28, %cst_34 {dimension_numbers = #tpu.dot_dimension_numbers<[1], [0], [0], [1], [0, 0, 1, 1], [], []>} : vector<128x128xbf16>, vector<128x128xbf16>, vector<128x128xf32> -> vector<128x128xf32>
    %30 = arith.addf %24, %29 : vector<128x128xf32>
    %c0_35 = arith.constant 0 : index
    %c2_36 = arith.constant 2 : index
    %c1_37 = arith.constant 1 : index
    %c0_38 = arith.constant 0 : index
    %31 = vector.load %arg1[%c0_35, %c2_36, %c1_37, %c0_38] : memref<1x4x160x128xbf16, #tpu.memory_space<vmem>>, vector<1x1x128x128xbf16>
    %32 = vector.shape_cast %31 : vector<1x1x128x128xbf16> to vector<128x128xbf16>
    %c5 = arith.constant 5 : index
    %c0_39 = arith.constant 0 : index
    %c0_40 = arith.constant 0 : index
    %33 = vector.load %arg2[%c5, %c0_39, %c0_40] : memref<9x128x128xbf16, #tpu.memory_space<vmem>>, vector<1x128x128xbf16>
    %34 = vector.shape_cast %33 : vector<1x128x128xbf16> to vector<128x128xbf16>
    %cst_41 = arith.constant dense<0.000000e+00> : vector<128x128xf32>
    %35 = tpu.matmul %32, %34, %cst_41 {dimension_numbers = #tpu.dot_dimension_numbers<[1], [0], [0], [1], [0, 0, 1, 1], [], []>} : vector<128x128xbf16>, vector<128x128xbf16>, vector<128x128xf32> -> vector<128x128xf32>
    %36 = arith.addf %30, %35 : vector<128x128xf32>
    %c0_42 = arith.constant 0 : index
    %c0_43 = arith.constant 0 : index
    %c16 = arith.constant 16 : index
    %c0_44 = arith.constant 0 : index
    %37 = vector.load %arg1[%c0_42, %c0_43, %c16, %c0_44] : memref<1x4x160x128xbf16, #tpu.memory_space<vmem>>, vector<1x1x128x128xbf16>
    %38 = vector.shape_cast %37 : vector<1x1x128x128xbf16> to vector<128x128xbf16>
    %c6 = arith.constant 6 : index
    %c0_45 = arith.constant 0 : index
    %c0_46 = arith.constant 0 : index
    %39 = vector.load %arg2[%c6, %c0_45, %c0_46] : memref<9x128x128xbf16, #tpu.memory_space<vmem>>, vector<1x128x128xbf16>
    %40 = vector.shape_cast %39 : vector<1x128x128xbf16> to vector<128x128xbf16>
    %cst_47 = arith.constant dense<0.000000e+00> : vector<128x128xf32>
    %41 = tpu.matmul %38, %40, %cst_47 {dimension_numbers = #tpu.dot_dimension_numbers<[1], [0], [0], [1], [0, 0, 1, 1], [], []>} : vector<128x128xbf16>, vector<128x128xbf16>, vector<128x128xf32> -> vector<128x128xf32>
    %42 = arith.addf %36, %41 : vector<128x128xf32>
    %c0_48 = arith.constant 0 : index
    %c1_49 = arith.constant 1 : index
    %c16_50 = arith.constant 16 : index
    %c0_51 = arith.constant 0 : index
    %43 = vector.load %arg1[%c0_48, %c1_49, %c16_50, %c0_51] : memref<1x4x160x128xbf16, #tpu.memory_space<vmem>>, vector<1x1x128x128xbf16>
    %44 = vector.shape_cast %43 : vector<1x1x128x128xbf16> to vector<128x128xbf16>
    %c7 = arith.constant 7 : index
    %c0_52 = arith.constant 0 : index
    %c0_53 = arith.constant 0 : index
    %45 = vector.load %arg2[%c7, %c0_52, %c0_53] : memref<9x128x128xbf16, #tpu.memory_space<vmem>>, vector<1x128x128xbf16>
    %46 = vector.shape_cast %45 : vector<1x128x128xbf16> to vector<128x128xbf16>
    %cst_54 = arith.constant dense<0.000000e+00> : vector<128x128xf32>
    %47 = tpu.matmul %44, %46, %cst_54 {dimension_numbers = #tpu.dot_dimension_numbers<[1], [0], [0], [1], [0, 0, 1, 1], [], []>} : vector<128x128xbf16>, vector<128x128xbf16>, vector<128x128xf32> -> vector<128x128xf32>
    %48 = arith.addf %42, %47 : vector<128x128xf32>
    %c0_55 = arith.constant 0 : index
    %c0_56 = arith.constant 0 : index
    %c17 = arith.constant 17 : index
    %c0_57 = arith.constant 0 : index
    %49 = vector.load %arg1[%c0_55, %c0_56, %c17, %c0_57] : memref<1x4x160x128xbf16, #tpu.memory_space<vmem>>, vector<1x1x128x128xbf16>
    %50 = vector.shape_cast %49 : vector<1x1x128x128xbf16> to vector<128x128xbf16>
    %c8 = arith.constant 8 : index
    %c0_58 = arith.constant 0 : index
    %c0_59 = arith.constant 0 : index
    %51 = vector.load %arg2[%c8, %c0_58, %c0_59] : memref<9x128x128xbf16, #tpu.memory_space<vmem>>, vector<1x128x128xbf16>
    %52 = vector.shape_cast %51 : vector<1x128x128xbf16> to vector<128x128xbf16>
    %cst_60 = arith.constant dense<0.000000e+00> : vector<128x128xf32>
    %53 = tpu.matmul %50, %52, %cst_60 {dimension_numbers = #tpu.dot_dimension_numbers<[1], [0], [0], [1], [0, 0, 1, 1], [], []>} : vector<128x128xbf16>, vector<128x128xbf16>, vector<128x128xf32> -> vector<128x128xf32>
    %54 = arith.addf %48, %53 : vector<128x128xf32>
    %c0_61 = arith.constant 0 : index
    %c0_62 = arith.constant 0 : index
    %55 = vector.load %arg3[%c0_61, %c0_62] : memref<1x128xf32, #tpu.memory_space<vmem>>, vector<1x128xf32>
    %56 = vector.broadcast %55 : vector<1x128xf32> to vector<128x128xf32>
    %57 = arith.mulf %54, %56 : vector<128x128xf32>
    %c0_63 = arith.constant 0 : index
    %c0_64 = arith.constant 0 : index
    %58 = vector.load %arg4[%c0_63, %c0_64] : memref<1x128xf32, #tpu.memory_space<vmem>>, vector<1x128xf32>
    %59 = vector.broadcast %58 : vector<1x128xf32> to vector<128x128xf32>
    %60 = arith.addf %57, %59 : vector<128x128xf32>
    %cst_65 = arith.constant 0.000000e+00 : f32
    %61 = vector.broadcast %cst_65 : f32 to vector<128x128xf32>
    %62 = arith.maximumf %60, %61 : vector<128x128xf32>
    %63 = vector.shape_cast %62 : vector<128x128xf32> to vector<8x16x128xf32>
    %64 = vector.extract_strided_slice %63 {offsets = [0, 0, 0], sizes = [8, 8, 128], strides = [1, 1, 1]} : vector<8x16x128xf32> to vector<8x8x128xf32>
    %65 = arith.truncf %64 : vector<8x8x128xf32> to vector<8x8x128xbf16>
    %c0_66 = arith.constant 0 : index
    %c0_67 = arith.constant 0 : index
    %c0_68 = arith.constant 0 : index
    %c0_69 = arith.constant 0 : index
    %66 = vector.load %arg5[%c0_66, %c0_67, %c0_68, %c0_69] : memref<1x8x8x128xbf16, #tpu.memory_space<vmem>>, vector<1x8x8x128xbf16>
    %67 = vector.shape_cast %66 : vector<1x8x8x128xbf16> to vector<8x8x128xbf16>
    %68 = vector.shape_cast %65 : vector<8x8x128xbf16> to vector<1x8x8x128xbf16>
    tpu.vector_store %arg5[%c0_66, %c0_67, %c0_68, %c0_69], %68 {strides = array<i32>} : memref<1x8x8x128xbf16, #tpu.memory_space<vmem>>, vector<1x8x8x128xbf16>,
    return
  }
  func.func @transform_0(%arg0: i32) -> (i32, i32, i32, i32) {
    %c0_i32 = arith.constant 0 : i32
    %c0_i32_0 = arith.constant 0 : i32
    %c0_i32_1 = arith.constant 0 : i32
    %c0_i32_2 = arith.constant 0 : i32
    return %arg0, %c0_i32, %c0_i32_0, %c0_i32_1 : i32, i32, i32, i32
  }
  func.func @transform_1(%arg0: i32) -> (i32, i32, i32) {
    %c0_i32 = arith.constant 0 : i32
    %c0_i32_0 = arith.constant 0 : i32
    %c0_i32_1 = arith.constant 0 : i32
    %c0_i32_2 = arith.constant 0 : i32
    return %c0_i32, %c0_i32_0, %c0_i32_1 : i32, i32, i32
  }
  func.func @transform_2(%arg0: i32) -> (i32, i32) {
    %c0_i32 = arith.constant 0 : i32
    %c0_i32_0 = arith.constant 0 : i32
    %c0_i32_1 = arith.constant 0 : i32
    return %c0_i32, %c0_i32_0 : i32, i32
  }
  func.func @transform_3(%arg0: i32) -> (i32, i32) {
    %c0_i32 = arith.constant 0 : i32
    %c0_i32_0 = arith.constant 0 : i32
    %c0_i32_1 = arith.constant 0 : i32
    return %c0_i32, %c0_i32_0 : i32, i32
  }
  func.func @transform_4(%arg0: i32) -> (i32, i32, i32, i32) {
    %c0_i32 = arith.constant 0 : i32
    %c0_i32_0 = arith.constant 0 : i32
    %c0_i32_1 = arith.constant 0 : i32
    %c0_i32_2 = arith.constant 0 : i32
    return %arg0, %c0_i32, %c0_i32_0, %c0_i32_1 : i32, i32, i32, i32
  }
}

module attributes {stable_mosaic.version = 11 : i64} {
  func.func @_matmul_bn_ds_relu_kernel(%arg0: i32, %arg1: memref<128x128xbf16, #tpu.memory_space<vmem>>, %arg2: memref<128x128xbf16, #tpu.memory_space<vmem>>, %arg3: memref<1x128xf32, #tpu.memory_space<vmem>>, %arg4: memref<1x128xf32, #tpu.memory_space<vmem>>, %arg5: memref<128x128xbf16, #tpu.memory_space<vmem>>, %arg6: memref<128x128xbf16, #tpu.memory_space<vmem>>, %arg7: memref<1x128xf32, #tpu.memory_space<vmem>>, %arg8: memref<1x128xf32, #tpu.memory_space<vmem>>, %arg9: memref<128x128xbf16, #tpu.memory_space<vmem>>) attributes {dimension_semantics = [#tpu.dimension_semantics<parallel>], iteration_bounds = array<i64: 1>, scalar_prefetch = 0 : i64, scratch_operands = 0 : i64, tpu.core_type = #tpu.core_type<tc>, window_params = [{transform_indices = @transform_0, window_bounds = array<i64: 128, 128>}, {pipeline_mode = #tpu.pipeline_mode<synchronous>, transform_indices = @transform_1, window_bounds = array<i64: 128, 128>}, {pipeline_mode = #tpu.pipeline_mode<synchronous>, transform_indices = @transform_2, window_bounds = array<i64: 1, 128>}, {pipeline_mode = #tpu.pipeline_mode<synchronous>, transform_indices = @transform_3, window_bounds = array<i64: 1, 128>}, {transform_indices = @transform_4, window_bounds = array<i64: 128, 128>}, {pipeline_mode = #tpu.pipeline_mode<synchronous>, transform_indices = @transform_5, window_bounds = array<i64: 128, 128>}, {pipeline_mode = #tpu.pipeline_mode<synchronous>, transform_indices = @transform_6, window_bounds = array<i64: 1, 128>}, {pipeline_mode = #tpu.pipeline_mode<synchronous>, transform_indices = @transform_7, window_bounds = array<i64: 1, 128>}, {transform_indices = @transform_8, window_bounds = array<i64: 128, 128>}]} {
    %c0 = arith.constant 0 : index
    %c0_0 = arith.constant 0 : index
    %0 = vector.load %arg1[%c0, %c0_0] : memref<128x128xbf16, #tpu.memory_space<vmem>>, vector<128x128xbf16>
    %c0_1 = arith.constant 0 : index
    %c0_2 = arith.constant 0 : index
    %1 = vector.load %arg2[%c0_1, %c0_2] : memref<128x128xbf16, #tpu.memory_space<vmem>>, vector<128x128xbf16>
    %cst = arith.constant dense<0.000000e+00> : vector<128x128xf32>
    %2 = tpu.matmul %0, %1, %cst {dimension_numbers = #tpu.dot_dimension_numbers<[1], [0], [0], [1], [0, 0, 1, 1], [], []>} : vector<128x128xbf16>, vector<128x128xbf16>, vector<128x128xf32> -> vector<128x128xf32>
    %c0_3 = arith.constant 0 : index
    %c0_4 = arith.constant 0 : index
    %3 = vector.load %arg3[%c0_3, %c0_4] : memref<1x128xf32, #tpu.memory_space<vmem>>, vector<1x128xf32>
    %4 = vector.broadcast %3 : vector<1x128xf32> to vector<128x128xf32>
    %5 = arith.mulf %2, %4 : vector<128x128xf32>
    %c0_5 = arith.constant 0 : index
    %c0_6 = arith.constant 0 : index
    %6 = vector.load %arg4[%c0_5, %c0_6] : memref<1x128xf32, #tpu.memory_space<vmem>>, vector<1x128xf32>
    %7 = vector.broadcast %6 : vector<1x128xf32> to vector<128x128xf32>
    %8 = arith.addf %5, %7 : vector<128x128xf32>
    %c0_7 = arith.constant 0 : index
    %c0_8 = arith.constant 0 : index
    %9 = vector.load %arg5[%c0_7, %c0_8] : memref<128x128xbf16, #tpu.memory_space<vmem>>, vector<128x128xbf16>
    %c0_9 = arith.constant 0 : index
    %c0_10 = arith.constant 0 : index
    %10 = vector.load %arg6[%c0_9, %c0_10] : memref<128x128xbf16, #tpu.memory_space<vmem>>, vector<128x128xbf16>
    %cst_11 = arith.constant dense<0.000000e+00> : vector<128x128xf32>
    %11 = tpu.matmul %9, %10, %cst_11 {dimension_numbers = #tpu.dot_dimension_numbers<[1], [0], [0], [1], [0, 0, 1, 1], [], []>} : vector<128x128xbf16>, vector<128x128xbf16>, vector<128x128xf32> -> vector<128x128xf32>
    %c0_12 = arith.constant 0 : index
    %c0_13 = arith.constant 0 : index
    %12 = vector.load %arg7[%c0_12, %c0_13] : memref<1x128xf32, #tpu.memory_space<vmem>>, vector<1x128xf32>
    %13 = vector.broadcast %12 : vector<1x128xf32> to vector<128x128xf32>
    %14 = arith.mulf %11, %13 : vector<128x128xf32>
    %c0_14 = arith.constant 0 : index
    %c0_15 = arith.constant 0 : index
    %15 = vector.load %arg8[%c0_14, %c0_15] : memref<1x128xf32, #tpu.memory_space<vmem>>, vector<1x128xf32>
    %16 = vector.broadcast %15 : vector<1x128xf32> to vector<128x128xf32>
    %17 = arith.addf %14, %16 : vector<128x128xf32>
    %18 = arith.addf %8, %17 : vector<128x128xf32>
    %cst_16 = arith.constant 0.000000e+00 : f32
    %19 = vector.broadcast %cst_16 : f32 to vector<128x128xf32>
    %20 = arith.maximumf %18, %19 : vector<128x128xf32>
    %21 = arith.truncf %20 : vector<128x128xf32> to vector<128x128xbf16>
    %c0_17 = arith.constant 0 : index
    %c0_18 = arith.constant 0 : index
    %22 = vector.load %arg9[%c0_17, %c0_18] : memref<128x128xbf16, #tpu.memory_space<vmem>>, vector<128x128xbf16>
    tpu.vector_store %arg9[%c0_17, %c0_18], %21 {strides = array<i32>} : memref<128x128xbf16, #tpu.memory_space<vmem>>, vector<128x128xbf16>,
    return
  }
  func.func @transform_0(%arg0: i32) -> (i32, i32) {
    %c0_i32 = arith.constant 0 : i32
    %c0_i32_0 = arith.constant 0 : i32
    return %arg0, %c0_i32 : i32, i32
  }
  func.func @transform_1(%arg0: i32) -> (i32, i32) {
    %c0_i32 = arith.constant 0 : i32
    %c0_i32_0 = arith.constant 0 : i32
    %c0_i32_1 = arith.constant 0 : i32
    return %c0_i32, %c0_i32_0 : i32, i32
  }
  func.func @transform_2(%arg0: i32) -> (i32, i32) {
    %c0_i32 = arith.constant 0 : i32
    %c0_i32_0 = arith.constant 0 : i32
    %c0_i32_1 = arith.constant 0 : i32
    return %c0_i32, %c0_i32_0 : i32, i32
  }
  func.func @transform_3(%arg0: i32) -> (i32, i32) {
    %c0_i32 = arith.constant 0 : i32
    %c0_i32_0 = arith.constant 0 : i32
    %c0_i32_1 = arith.constant 0 : i32
    return %c0_i32, %c0_i32_0 : i32, i32
  }
  func.func @transform_4(%arg0: i32) -> (i32, i32) {
    %c0_i32 = arith.constant 0 : i32
    %c0_i32_0 = arith.constant 0 : i32
    return %arg0, %c0_i32 : i32, i32
  }
  func.func @transform_5(%arg0: i32) -> (i32, i32) {
    %c0_i32 = arith.constant 0 : i32
    %c0_i32_0 = arith.constant 0 : i32
    %c0_i32_1 = arith.constant 0 : i32
    return %c0_i32, %c0_i32_0 : i32, i32
  }
  func.func @transform_6(%arg0: i32) -> (i32, i32) {
    %c0_i32 = arith.constant 0 : i32
    %c0_i32_0 = arith.constant 0 : i32
    %c0_i32_1 = arith.constant 0 : i32
    return %c0_i32, %c0_i32_0 : i32, i32
  }
  func.func @transform_7(%arg0: i32) -> (i32, i32) {
    %c0_i32 = arith.constant 0 : i32
    %c0_i32_0 = arith.constant 0 : i32
    %c0_i32_1 = arith.constant 0 : i32
    return %c0_i32, %c0_i32_0 : i32, i32
  }
  func.func @transform_8(%arg0: i32) -> (i32, i32) {
    %c0_i32 = arith.constant 0 : i32
    %c0_i32_0 = arith.constant 0 : i32
    return %arg0, %c0_i32 : i32, i32
  }
}

</mosaic_0001>

<bundles_post_ra>
// kernel: _lambda_.3
= control target key start
LH: loop header
LB: loop body
LE: loop exit
PB: predicated region body
PF: predicated region fallthrough
CT: control target
= control target key end

     0   :  { %9 = vsyncpa [#allocation3], 0  ;;  %s2126_s0 = inlined_call_operand.hbm [shape: bf16[512,128], index: 0, kind: input, shape index: {}]   ;;  %s2127_s1 = inlined_call_operand.hbm [shape: bf16[128,128], index: 1, kind: input, shape index: {}]   ;;  %s2128_s2 = inlined_call_operand.hbm [shape: f32[1,128], index: 2, kind: input, shape index: {}]   ;;  %s2129_s3 = inlined_call_operand.hbm [shape: f32[1,128], index: 3, kind: input, shape index: {}]   ;;  %s2130_s4 = inlined_call_operand.hbm [shape: bf16[512,128], index: 4, kind: output, shape index: {}]  }
   0x1   :  { %10 = vsyncpa [#allocation6], 0 }
   0x2   :  { %11 = vsyncpa [#allocation9], 0 }
   0x3   :  { %12 = vsyncpa [#allocation4], 0  ;;  %s1886_s15 = smov [#allocation5]   ;;  %s1887_s17 = smov [#allocation2]  }
   0x4   :  { %s30_s16 = sshll.u32 %s1886_s15, 4  ;;  %s18_s18 = sshll.u32 %s1887_s17, 4  ;;  %s31_s16 = int_to_ptr.vmem [resolvable:$true] %s30_s16  ;;  %s1918_s18 = int_to_ptr.vmem [resolvable:$true] %s18_s18 }
   0x5   :  { %s1768_s21 = scalar_lea.hbm %s2127_s1, 1024 }
   0x6   :  { %p1769_p0 = scmp.ne.s32.totalorder %s2127_s1, %s1768_s21  ;;  %p1772_p1 = scmp.lt.u32.totalorder %s1768_s21, %s2127_s1 }
   0x8   :  { %p1774_p2 = pnand %p1772_p1, %p1769_p0 }
   0xa   :  { %1777 = shalt.err (!%p1774_p2)
}
   0xb   :  { %s1778_s26 = scalar_lea.vmem %s31_s16, 1024  ;;  %p1783_p4 = scmp.lt.s32.totalorder %s31_s16, %s31_s16 }
   0xc   :  { %p1779_p3 = scmp.ne.s32.totalorder %s31_s16, %s1778_s26  ;;  %p1784_p5 = scmp.lt.s32.totalorder %s1778_s26, %s1778_s26 }
   0xe   :  { %p1785_p6 = por %p1784_p5, %p1783_p4 }
  0x10   :  { %p1786_p7 = pnand %p1785_p6, %p1779_p3 }
  0x12   :  { %1789 = shalt.err (!%p1786_p7)
}
  0x13   :  { %s1888_s27 = smov 64   ;;  %s1889_s28 = smov 4  }
  0x14   :  { %36 = dma.hbm_to_vmem [thread:$0]  %s2127_s1, 1024, %s31_s16, [#allocation6], %s1888_s27, %s1888_s27, %s1889_s28  }
  0x15   :  { %s1790_s7 = scalar_lea.hbm %s2126_s0, 4096 }
  0x16   :  { %p1791_p8 = scmp.ne.s32.totalorder %s2126_s0, %s1790_s7  ;;  %p1794_p9 = scmp.lt.u32.totalorder %s1790_s7, %s2126_s0 }
  0x18   :  { %p1796_p10 = pnand %p1794_p9, %p1791_p8 }
  0x1a   :  { %1799 = shalt.err (!%p1796_p10)
}
  0x1b   :  { %s1800_s12 = scalar_lea.vmem %s1918_s18, 4096  ;;  %p1805_p12 = scmp.lt.s32.totalorder %s1918_s18, %s1918_s18 }
  0x1c   :  { %p1801_p11 = scmp.ne.s32.totalorder %s1918_s18, %s1800_s12  ;;  %p1806_p13 = scmp.lt.s32.totalorder %s1800_s12, %s1800_s12 }
  0x1e   :  { %p1807_p0 = por %p1806_p13, %p1805_p12 }
  0x20   :  { %p1808_p1 = pnand %p1807_p0, %p1801_p11 }
  0x22   :  { %1811 = shalt.err (!%p1808_p1)
}
  0x23   :  { %24 = dma.hbm_to_vmem [thread:$0]  %s2126_s0, 4096, %s1918_s18, [#allocation3], %s1888_s27, %s1888_s27, %s1889_s28  }
  0x24   :  { %s1890_s14 = smov [#allocation7]   ;;  %s1891_s16 = smov [#allocation8]  }
  0x25   :  { %s43_s15 = sshll.u32 %s1890_s14, 4  ;;  %s53_s17 = sshll.u32 %s1891_s16, 4  ;;  %s44_s15 = int_to_ptr.vmem [resolvable:$true] %s43_s15  ;;  %s54_s17 = int_to_ptr.vmem [resolvable:$true] %s53_s17 }
  0x26   :  { %s1812_s21 = scalar_lea.hbm %s2128_s2, 16 }
  0x27   :  { %p1813_p2 = scmp.ne.s32.totalorder %s2128_s2, %s1812_s21  ;;  %p1816_p3 = scmp.lt.u32.totalorder %s1812_s21, %s2128_s2 }
  0x29   :  { %p1818_p4 = pnand %p1816_p3, %p1813_p2 }
  0x2b   :  { %1821 = shalt.err (!%p1818_p4)
}
  0x2c   :  { %s1822_s0 = scalar_lea.vmem %s44_s15, 16  ;;  %s1826_s18 = scalar_lea.vmem %s44_s15, 32 }
  0x2d   :  { %p1823_p5 = scmp.ne.s32.totalorder %s44_s15, %s1822_s0  ;;  %p1827_p6 = scmp.lt.s32.totalorder %s44_s15, %s44_s15 }
  0x2e   :  { %p1828_p7 = scmp.lt.s32.totalorder %s1826_s18, %s1822_s0 }
  0x30   :  { %p1829_p8 = por %p1828_p7, %p1827_p6 }
  0x32   :  { %p1830_p9 = pnand %p1829_p8, %p1823_p5 }
  0x34   :  { %1833 = shalt.err (!%p1830_p9)
}
  0x35   :  { %46 = dma.hbm_to_vmem [thread:$0]  %s2128_s2, 16, %s44_s15, [#allocation6]  }
  0x36   :  { %s1834_s6 = scalar_lea.hbm %s2129_s3, 16 }
  0x37   :  { %p1835_p10 = scmp.ne.s32.totalorder %s2129_s3, %s1834_s6  ;;  %p1838_p11 = scmp.lt.u32.totalorder %s1834_s6, %s2129_s3 }
  0x39   :  { %p1840_p12 = pnand %p1838_p11, %p1835_p10 }
  0x3b   :  { %1843 = shalt.err (!%p1840_p12)
}
  0x3c   :  { %s1844_s11 = scalar_lea.vmem %s54_s17, 16  ;;  %s1848_s12 = scalar_lea.vmem %s54_s17, 32 }
  0x3d   :  { %p1845_p13 = scmp.ne.s32.totalorder %s54_s17, %s1844_s11  ;;  %p1849_p0 = scmp.lt.s32.totalorder %s54_s17, %s54_s17 }
  0x3e   :  { %p1850_p1 = scmp.lt.s32.totalorder %s1848_s12, %s1844_s11 }
  0x40   :  { %p1851_p2 = por %p1850_p1, %p1849_p0 }
  0x42   :  { %p1852_p3 = pnand %p1851_p2, %p1845_p13 }
  0x44   :  { %1855 = shalt.err (!%p1852_p3)
}
  0x45   :  { %56 = dma.hbm_to_vmem [thread:$0]  %s2129_s3, 16, %s54_s17, [#allocation9]  }
  0x46   :  { %1878 = dma.done.wait [#allocation3], 4096  }
  0x47   :  { %1879 = vsyncadd [#allocation3], 4294963200 }
  0x48   :  { %1880 = dma.done.wait [#allocation6], 1040  }
  0x49   :  { %1881 = vsyncadd [#allocation6], 4294966256 }
  0x4a   :  { %1882 = dma.done.wait [#allocation9], 16  }
  0x4b   :  { %1883 = vsyncadd [#allocation9], 4294967280  ;;  %v1728_v0 = vld [vmem:[#allocation5] sm:$0xff]   ;;  %v1729_v1 = vld [vmem:[#allocation5 + $0x8] sm:$0xff]   ;;  %s1892_s3 = smov [#allocation10]  }
  0x4c   :  { %1625 = vmatprep.subr.bf16.mxu0 %v1728_v0  ;;  %1705 = vmatprep.subr.bf16.mxu1 %v1728_v0  ;;  %v1730_v2 = vld [vmem:[#allocation5 + $0x10] sm:$0xff]   ;;  %v1731_v3 = vld [vmem:[#allocation5 + $0x18] sm:$0xff]   ;;  %v1736_v4 = vld [vmem:[#allocation2] sm:$0xff]   ;;  %s1210_s13 = sshll.u32 %s1892_s3, 4  ;;  %s1211_s13 = int_to_ptr.vmem [resolvable:$true] %s1210_s13 }
  0x4d   :  { %1626 = vmatpush3.bf16.msra.mxu0 %v1728_v0  ;;  %1713 = vmatpush3.bf16.msra.mxu1 %v1728_v0  ;;  %v1737_v5 = vld [vmem:[#allocation2 + $0x80] sm:$0xff]   ;;  %v1733_v7 = vld [vmem:[#allocation5 + $0x28] sm:$0xff]   ;;  %v1734_v8 = vld [vmem:[#allocation5 + $0x30] sm:$0xff]   ;;  %s1856_s14 = scalar_lea.vmem %s1211_s13, 4096  ;;  %p1861_p5 = scmp.lt.s32.totalorder %s1211_s13, %s1211_s13 }
  0x4e   :  { %1627 = vmatprep.subr.bf16.mxu0 %v1729_v1  ;;  %1706 = vmatprep.subr.bf16.mxu1 %v1729_v1  ;;  %v1732_v6 = vld [vmem:[#allocation5 + $0x20] sm:$0xff]   ;;  %v1735_v9 = vld [vmem:[#allocation5 + $0x38] sm:$0xff]   ;;  %v1738_v10 = vld [vmem:[#allocation2 + $0x8] sm:$0xff]   ;;  %p1857_p4 = scmp.ne.s32.totalorder %s1211_s13, %s1856_s14  ;;  %p1862_p6 = scmp.lt.s32.totalorder %s1856_s14, %s1856_s14 }
  0x4f   :  { %1641 = vmatprep.mubr.bf16.mxu0 %v1736_v4  ;;  %1673 = vmatprep.mubr.bf16.mxu1 %v1737_v5  ;;  %v1739_v11 = vld [vmem:[#allocation2 + $0x88] sm:$0xff]   ;;  %v1740_v12 = vld [vmem:[#allocation2 + $0x10] sm:$0xff]   ;;  %v1742_v14 = vld [vmem:[#allocation2 + $0x18] sm:$0xff]  }
  0x50   :  { %v1741_v13 = vld [vmem:[#allocation2 + $0x90] sm:$0xff]   ;;  %v1743_v15 = vld [vmem:[#allocation2 + $0x98] sm:$0xff]   ;;  %v1744_v16 = vld [vmem:[#allocation2 + $0x20] sm:$0xff]   ;;  %p1863_p7 = por %p1862_p6, %p1861_p5 }
  0x51   :  { %1628 = vmatpush3.bf16.msra.mxu0 %v1729_v1  ;;  %1714 = vmatpush3.bf16.msra.mxu1 %v1729_v1  ;;  %v1745_v17 = vld [vmem:[#allocation2 + $0xa0] sm:$0xff]   ;;  %v1746_v18 = vld [vmem:[#allocation2 + $0x28] sm:$0xff]   ;;  %v1748_v20 = vld [vmem:[#allocation2 + $0x30] sm:$0xff]  }
  0x52   :  { %1629 = vmatprep.subr.bf16.mxu0 %v1730_v2  ;;  %1707 = vmatprep.subr.bf16.mxu1 %v1730_v2  ;;  %v1747_v19 = vld [vmem:[#allocation2 + $0xa8] sm:$0xff]   ;;  %v1749_v21 = vld [vmem:[#allocation2 + $0xb0] sm:$0xff]   ;;  %v1750_v22 = vld [vmem:[#allocation2 + $0x38] sm:$0xff]   ;;  %p1864_p8 = pnand %p1863_p7, %p1857_p4 }
  0x53   :  { %v1751_v23 = vld [vmem:[#allocation2 + $0xb8] sm:$0xff]   ;;  %v1752_v24 = vld [vmem:[#allocation2 + $0x40] sm:$0xff]   ;;  %v1754_v26 = vld [vmem:[#allocation2 + $0x48] sm:$0xff]  }
  0x54   :  { %v1753_v25 = vld [vmem:[#allocation2 + $0xc0] sm:$0xff]   ;;  %v1755_v27 = vld [vmem:[#allocation2 + $0xc8] sm:$0xff]   ;;  %v1756_v28 = vld [vmem:[#allocation2 + $0x50] sm:$0xff]  }
  0x55   :  { %1630 = vmatpush3.bf16.msra.mxu0 %v1730_v2  ;;  %1715 = vmatpush3.bf16.msra.mxu1 %v1730_v2  ;;  %v1757_v29 = vld [vmem:[#allocation2 + $0xd0] sm:$0xff]   ;;  %v1758_v30 = vld [vmem:[#allocation2 + $0x58] sm:$0xff]   ;;  %v1760_v32 = vld [vmem:[#allocation2 + $0x60] sm:$0xff]  }
  0x56   :  { %1631 = vmatprep.subr.bf16.mxu0 %v1731_v3  ;;  %1708 = vmatprep.subr.bf16.mxu1 %v1731_v3  ;;  %v1759_v31 = vld [vmem:[#allocation2 + $0xd8] sm:$0xff]   ;;  %v1761_v33 = vld [vmem:[#allocation2 + $0xe0] sm:$0xff]   ;;  %v1762_v34 = vld [vmem:[#allocation2 + $0x68] sm:$0xff]  }
  0x57   :  { %v1763_v35 = vld [vmem:[#allocation2 + $0xe8] sm:$0xff]   ;;  %v1764_v36 = vld [vmem:[#allocation2 + $0x70] sm:$0xff]   ;;  %v1766_v38 = vld [vmem:[#allocation2 + $0x78] sm:$0xff]  }
  0x58   :  { %v1765_v37 = vld [vmem:[#allocation2 + $0xf0] sm:$0xff]   ;;  %v1767_v39 = vld [vmem:[#allocation2 + $0xf8] sm:$0xff]   ;;  %v1979_v40 = vld [vmem:[#allocation7] ss:$0 sm:$0xff] }
  0x59   :  { %1632 = vmatpush3.bf16.msra.mxu0 %v1731_v3  ;;  %1716 = vmatpush3.bf16.msra.mxu1 %v1731_v3  ;;  %v1981_v42 = vld [vmem:[#allocation8] ss:$0 sm:$0xff] }
  0x5a   :  { %1633 = vmatprep.subr.bf16.mxu0 %v1732_v6  ;;  %1709 = vmatprep.subr.bf16.mxu1 %v1732_v6 }
  0x5d   :  { %1634 = vmatpush3.bf16.msra.mxu0 %v1732_v6  ;;  %1717 = vmatpush3.bf16.msra.mxu1 %v1732_v6 }
  0x5e   :  { %1635 = vmatprep.subr.bf16.mxu0 %v1733_v7  ;;  %1710 = vmatprep.subr.bf16.mxu1 %v1733_v7 }
  0x61   :  { %1636 = vmatpush3.bf16.msra.mxu0 %v1733_v7  ;;  %1718 = vmatpush3.bf16.msra.mxu1 %v1733_v7 }
  0x62   :  { %1637 = vmatprep.subr.bf16.mxu0 %v1734_v8  ;;  %1711 = vmatprep.subr.bf16.mxu1 %v1734_v8 }
  0x65   :  { %1638 = vmatpush3.bf16.msra.mxu0 %v1734_v8  ;;  %1719 = vmatpush3.bf16.msra.mxu1 %v1734_v8 }
  0x66   :  { %1639 = vmatprep.subr.bf16.mxu0 %v1735_v9  ;;  %1712 = vmatprep.subr.bf16.mxu1 %v1735_v9 }
  0x69   :  { %1640 = vmatpush3.bf16.msra.mxu0 %v1735_v9  ;;  %1720 = vmatpush3.bf16.msra.mxu1 %v1735_v9 }
  0x6c   :  { %1642 = vmatmul.mubr.bf16.vlgmr.msra.gmra.mrb[0].mxu0 %v1738_v10  ;;  %1674 = vmatmul.mubr.bf16.vlgmr.msra.gmra.mrb[0].mxu1 %v1739_v11 }
  0x6d   :  { %1645 = vmatprep.mubr.bf16.mxu0 %v1740_v12  ;;  %1677 = vmatprep.mubr.bf16.mxu1 %v1741_v13 }
  0x74   :  { %1646 = vmatmul.mubr.bf16.gmra.mrb[4].mxu0 %v1742_v14  ;;  %1678 = vmatmul.mubr.bf16.gmra.mrb[4].mxu1 %v1743_v15 }
  0x75   :  { %1649 = vmatprep.mubr.bf16.mxu0 %v1744_v16  ;;  %1681 = vmatprep.mubr.bf16.mxu1 %v1745_v17 }
  0x7c   :  { %1650 = vmatmul.mubr.bf16.gmra.mrb[8].mxu0 %v1746_v18  ;;  %1682 = vmatmul.mubr.bf16.gmra.mrb[8].mxu1 %v1747_v19 }
  0x7d   :  { %1653 = vmatprep.mubr.bf16.mxu0 %v1748_v20  ;;  %1685 = vmatprep.mubr.bf16.mxu1 %v1749_v21 }
  0x84   :  { %1654 = vmatmul.mubr.bf16.gmra.mrb[12].mxu0 %v1750_v22  ;;  %1686 = vmatmul.mubr.bf16.gmra.mrb[12].mxu1 %v1751_v23 }
  0x85   :  { %1657 = vmatprep.mubr.bf16.mxu0 %v1752_v24  ;;  %1689 = vmatprep.mubr.bf16.mxu1 %v1753_v25 }
  0x8c   :  { %1658 = vmatmul.mubr.bf16.gmra.mrb[16].mxu0 %v1754_v26  ;;  %1690 = vmatmul.mubr.bf16.gmra.mrb[16].mxu1 %v1755_v27 }
  0x8d   :  { %1661 = vmatprep.mubr.bf16.mxu0 %v1756_v28  ;;  %1693 = vmatprep.mubr.bf16.mxu1 %v1757_v29 }
  0x94   :  { %1662 = vmatmul.mubr.bf16.gmra.mrb[20].mxu0 %v1758_v30  ;;  %1694 = vmatmul.mubr.bf16.gmra.mrb[20].mxu1 %v1759_v31 }
  0x95   :  { %1665 = vmatprep.mubr.bf16.mxu0 %v1760_v32  ;;  %1697 = vmatprep.mubr.bf16.mxu1 %v1761_v33 }
  0x9c   :  { %1666 = vmatmul.mubr.bf16.gmra.mrb[24].mxu0 %v1762_v34  ;;  %1698 = vmatmul.mubr.bf16.gmra.mrb[24].mxu1 %v1763_v35 }
  0x9d   :  { %1669 = vmatprep.mubr.bf16.mxu0 %v1764_v36  ;;  %1701 = vmatprep.mubr.bf16.mxu1 %v1765_v37 }
  0xa4   :  { %1670 = vmatmul.mubr.bf16.gmra.mrb[28].mxu0 %v1766_v38  ;;  %1702 = vmatmul.mubr.bf16.gmra.mrb[28].mxu1 %v1767_v39 }
 0x13f   :  { %v1643_v41 = vpop.f32.mrb[0].mxu0  ;;  %v1675_v43 = vpop.f32.mrb[0].mxu1 }
 0x140   :  { %v688_v44 = vmul.f32 %v1643_v41, %v1979_v40  ;;  %v720_v45 = vmul.f32 %v1675_v43, %v1979_v40  ;;  %v424_v46 = vpop.f32.mrb[1].mxu0  ;;  %v552_v47 = vpop.f32.mrb[1].mxu1 }
 0x141   :  { %v686_v48 = vmul.f32 %v1979_v40, %v424_v46  ;;  %v718_v49 = vmul.f32 %v1979_v40, %v552_v47  ;;  %v1644_v50 = vpop.f32.mrb[2].mxu0  ;;  %v1676_v51 = vpop.f32.mrb[2].mxu1 }
 0x142   :  { %v759_v52 = vadd.f32 %v1981_v42, %v688_v44  ;;  %v791_v53 = vadd.f32 %v1981_v42, %v720_v45  ;;  %v689_v54 = vmul.f32 %v1644_v50, %v1979_v40  ;;  %v721_v55 = vmul.f32 %v1676_v51, %v1979_v40  ;;  %v427_v56 = vpop.f32.mrb[3].mxu0  ;;  %v555_v57 = vpop.f32.mrb[3].mxu1 }
 0x143   :  { %v757_v58 = vadd.f32 %v1981_v42, %v686_v48  ;;  %v789_v59 = vadd.f32 %v1981_v42, %v718_v49  ;;  %v687_v60 = vmul.f32 %v1979_v40, %v427_v56  ;;  %v719_v61 = vmul.f32 %v1979_v40, %v555_v57 }
 0x144   :  { %v760_v62 = vadd.f32 %v1981_v42, %v689_v54  ;;  %v792_v63 = vadd.f32 %v1981_v42, %v721_v55  ;;  %v823_v2 = vmax.f32 %v759_v52, 0.0  ;;  %v855_v3 = vmax.f32 %v791_v53, 0.0 }
 0x145   :  { %v758_v0 = vadd.f32 %v1981_v42, %v687_v60  ;;  %v790_v1 = vadd.f32 %v1981_v42, %v719_v61  ;;  %v821_v6 = vmax.f32 %v757_v58, 0.0  ;;  %v853_v7 = vmax.f32 %v789_v59, 0.0 }
 0x146   :  { %v824_v4 = vmax.f32 %v760_v62, 0.0  ;;  %v856_v5 = vmax.f32 %v792_v63, 0.0 }
 0x147   :  { %v822_v8 = vmax.f32 %v758_v0, 0.0  ;;  %v854_v9 = vmax.f32 %v790_v1, 0.0  ;;  %v1647_v10 = vpop.f32.mrb[4].mxu0  ;;  %v1679_v11 = vpop.f32.mrb[4].mxu1 }
 0x148   :  { %v1402_v12 = vpack.c.bf16 %v824_v4, %v823_v2  ;;  %v1482_v13 = vpack.c.bf16 %v856_v5, %v855_v3  ;;  %v692_v14 = vmul.f32 %v1647_v10, %v1979_v40  ;;  %v724_v15 = vmul.f32 %v1679_v11, %v1979_v40  ;;  %v440_v16 = vpop.f32.mrb[5].mxu0  ;;  %v568_v17 = vpop.f32.mrb[5].mxu1 }
 0x149   :  { %v1397_v18 = vpack.c.bf16 %v822_v8, %v821_v6  ;;  %v1477_v19 = vpack.c.bf16 %v854_v9, %v853_v7  ;;  %v690_v20 = vmul.f32 %v1979_v40, %v440_v16  ;;  %v722_v21 = vmul.f32 %v1979_v40, %v568_v17  ;;  %v1648_v22 = vpop.f32.mrb[6].mxu0  ;;  %v1680_v23 = vpop.f32.mrb[6].mxu1 }
 0x14a   :  { %1554 = vst [vmem:[#allocation10 + $0x8] sm:$0xff] %v1402_v12   ;;  %1570 = vst [vmem:[#allocation10 + $0x88] sm:$0xff] %v1482_v13   ;;  %v763_v24 = vadd.f32 %v1981_v42, %v692_v14  ;;  %v795_v25 = vadd.f32 %v1981_v42, %v724_v15  ;;  %v693_v26 = vmul.f32 %v1648_v22, %v1979_v40  ;;  %v443_v28 = vpop.f32.mrb[7].mxu0  ;;  %v571_v29 = vpop.f32.mrb[7].mxu1 }
 0x14b   :  { %v725_v27 = vmul.f32 %v1680_v23, %v1979_v40  ;;  %1398 = vst [vmem:[#allocation10] sm:$0xff] %v1397_v18   ;;  %1569 = vst [vmem:[#allocation10 + $0x80] sm:$0xff] %v1477_v19   ;;  %v761_v30 = vadd.f32 %v1981_v42, %v690_v20  ;;  %v793_v31 = vadd.f32 %v1981_v42, %v722_v21 }
 0x14c   :  { %v691_v32 = vmul.f32 %v1979_v40, %v443_v28  ;;  %v723_v33 = vmul.f32 %v1979_v40, %v571_v29  ;;  %v764_v34 = vadd.f32 %v1981_v42, %v693_v26  ;;  %v827_v38 = vmax.f32 %v763_v24, 0.0 }
 0x14d   :  { %v796_v35 = vadd.f32 %v1981_v42, %v725_v27  ;;  %v859_v39 = vmax.f32 %v795_v25, 0.0  ;;  %v825_v44 = vmax.f32 %v761_v30, 0.0  ;;  %v857_v45 = vmax.f32 %v793_v31, 0.0 }
 0x14e   :  { %v762_v36 = vadd.f32 %v1981_v42, %v691_v32  ;;  %v794_v37 = vadd.f32 %v1981_v42, %v723_v33  ;;  %v828_v41 = vmax.f32 %v764_v34, 0.0 }
 0x14f   :  { %v860_v43 = vmax.f32 %v796_v35, 0.0  ;;  %v1651_v48 = vpop.f32.mrb[8].mxu0  ;;  %v1683_v49 = vpop.f32.mrb[8].mxu1 }
 0x150   :  { %v826_v46 = vmax.f32 %v762_v36, 0.0  ;;  %v858_v47 = vmax.f32 %v794_v37, 0.0  ;;  %v1412_v50 = vpack.c.bf16 %v828_v41, %v827_v38  ;;  %v696_v52 = vmul.f32 %v1651_v48, %v1979_v40  ;;  %v456_v54 = vpop.f32.mrb[9].mxu0  ;;  %v584_v55 = vpop.f32.mrb[9].mxu1 }
 0x151   :  { %v1492_v51 = vpack.c.bf16 %v860_v43, %v859_v39  ;;  %v728_v53 = vmul.f32 %v1683_v49, %v1979_v40  ;;  %v694_v58 = vmul.f32 %v1979_v40, %v456_v54  ;;  %v726_v59 = vmul.f32 %v1979_v40, %v584_v55  ;;  %v1652_v60 = vpop.f32.mrb[10].mxu0  ;;  %v1684_v61 = vpop.f32.mrb[10].mxu1 }
 0x152   :  { %v1407_v56 = vpack.c.bf16 %v826_v46, %v825_v44  ;;  %v1487_v57 = vpack.c.bf16 %v858_v47, %v857_v45  ;;  %1556 = vst [vmem:[#allocation10 + $0x18] sm:$0xff] %v1412_v50   ;;  %v767_v62 = vadd.f32 %v1981_v42, %v696_v52  ;;  %v697_v0 = vmul.f32 %v1652_v60, %v1979_v40  ;;  %v459_v2 = vpop.f32.mrb[11].mxu0  ;;  %v587_v3 = vpop.f32.mrb[11].mxu1 }
 0x153   :  { %1572 = vst [vmem:[#allocation10 + $0x98] sm:$0xff] %v1492_v51   ;;  %v799_v63 = vadd.f32 %v1981_v42, %v728_v53  ;;  %v729_v1 = vmul.f32 %v1684_v61, %v1979_v40  ;;  %v765_v4 = vadd.f32 %v1981_v42, %v694_v58  ;;  %v797_v5 = vadd.f32 %v1981_v42, %v726_v59 }
 0x154   :  { %1555 = vst [vmem:[#allocation10 + $0x10] sm:$0xff] %v1407_v56   ;;  %1571 = vst [vmem:[#allocation10 + $0x90] sm:$0xff] %v1487_v57   ;;  %v695_v6 = vmul.f32 %v1979_v40, %v459_v2  ;;  %v727_v7 = vmul.f32 %v1979_v40, %v587_v3  ;;  %v768_v8 = vadd.f32 %v1981_v42, %v697_v0  ;;  %v831_v12 = vmax.f32 %v767_v62, 0.0 }
 0x155   :  { %v800_v9 = vadd.f32 %v1981_v42, %v729_v1  ;;  %v863_v13 = vmax.f32 %v799_v63, 0.0  ;;  %v829_v16 = vmax.f32 %v765_v4, 0.0  ;;  %v861_v17 = vmax.f32 %v797_v5, 0.0 }
 0x156   :  { %v766_v10 = vadd.f32 %v1981_v42, %v695_v6  ;;  %v798_v11 = vadd.f32 %v1981_v42, %v727_v7  ;;  %v832_v14 = vmax.f32 %v768_v8, 0.0 }
 0x157   :  { %v864_v15 = vmax.f32 %v800_v9, 0.0  ;;  %v1655_v20 = vpop.f32.mrb[12].mxu0  ;;  %v1687_v21 = vpop.f32.mrb[12].mxu1 }
 0x158   :  { %v830_v18 = vmax.f32 %v766_v10, 0.0  ;;  %v862_v19 = vmax.f32 %v798_v11, 0.0  ;;  %v1422_v22 = vpack.c.bf16 %v832_v14, %v831_v12  ;;  %v700_v24 = vmul.f32 %v1655_v20, %v1979_v40  ;;  %v472_v26 = vpop.f32.mrb[13].mxu0  ;;  %v600_v27 = vpop.f32.mrb[13].mxu1 }
 0x159   :  { %v1502_v23 = vpack.c.bf16 %v864_v15, %v863_v13  ;;  %v732_v25 = vmul.f32 %v1687_v21, %v1979_v40  ;;  %v698_v30 = vmul.f32 %v1979_v40, %v472_v26  ;;  %v730_v31 = vmul.f32 %v1979_v40, %v600_v27  ;;  %v1656_v32 = vpop.f32.mrb[14].mxu0  ;;  %v1688_v33 = vpop.f32.mrb[14].mxu1 }
 0x15a   :  { %v1417_v28 = vpack.c.bf16 %v830_v18, %v829_v16  ;;  %v1497_v29 = vpack.c.bf16 %v862_v19, %v861_v17  ;;  %1558 = vst [vmem:[#allocation10 + $0x28] sm:$0xff] %v1422_v22   ;;  %v771_v34 = vadd.f32 %v1981_v42, %v700_v24  ;;  %v701_v36 = vmul.f32 %v1656_v32, %v1979_v40  ;;  %v475_v38 = vpop.f32.mrb[15].mxu0  ;;  %v603_v39 = vpop.f32.mrb[15].mxu1 }
 0x15b   :  { %1574 = vst [vmem:[#allocation10 + $0xa8] sm:$0xff] %v1502_v23   ;;  %v803_v35 = vadd.f32 %v1981_v42, %v732_v25  ;;  %v733_v37 = vmul.f32 %v1688_v33, %v1979_v40  ;;  %v769_v41 = vadd.f32 %v1981_v42, %v698_v30  ;;  %v801_v43 = vadd.f32 %v1981_v42, %v730_v31 }
 0x15c   :  { %1557 = vst [vmem:[#allocation10 + $0x20] sm:$0xff] %v1417_v28   ;;  %1573 = vst [vmem:[#allocation10 + $0xa0] sm:$0xff] %v1497_v29   ;;  %v699_v44 = vmul.f32 %v1979_v40, %v475_v38  ;;  %v731_v45 = vmul.f32 %v1979_v40, %v603_v39  ;;  %v772_v46 = vadd.f32 %v1981_v42, %v701_v36  ;;  %v835_v50 = vmax.f32 %v771_v34, 0.0 }
 0x15d   :  { %v804_v47 = vadd.f32 %v1981_v42, %v733_v37  ;;  %v867_v51 = vmax.f32 %v803_v35, 0.0  ;;  %v833_v54 = vmax.f32 %v769_v41, 0.0  ;;  %v865_v55 = vmax.f32 %v801_v43, 0.0 }
 0x15e   :  { %v770_v48 = vadd.f32 %v1981_v42, %v699_v44  ;;  %v802_v49 = vadd.f32 %v1981_v42, %v731_v45  ;;  %v836_v52 = vmax.f32 %v772_v46, 0.0 }
 0x15f   :  { %v868_v53 = vmax.f32 %v804_v47, 0.0  ;;  %v1659_v58 = vpop.f32.mrb[16].mxu0  ;;  %v1691_v59 = vpop.f32.mrb[16].mxu1 }
 0x160   :  { %v834_v56 = vmax.f32 %v770_v48, 0.0  ;;  %v866_v57 = vmax.f32 %v802_v49, 0.0  ;;  %v1432_v60 = vpack.c.bf16 %v836_v52, %v835_v50  ;;  %v704_v62 = vmul.f32 %v1659_v58, %v1979_v40  ;;  %v488_v0 = vpop.f32.mrb[17].mxu0  ;;  %v616_v1 = vpop.f32.mrb[17].mxu1 }
 0x161   :  { %v1512_v61 = vpack.c.bf16 %v868_v53, %v867_v51  ;;  %v736_v63 = vmul.f32 %v1691_v59, %v1979_v40  ;;  %v702_v4 = vmul.f32 %v1979_v40, %v488_v0  ;;  %v734_v5 = vmul.f32 %v1979_v40, %v616_v1  ;;  %v1660_v6 = vpop.f32.mrb[18].mxu0  ;;  %v1692_v7 = vpop.f32.mrb[18].mxu1 }
 0x162   :  { %v1427_v2 = vpack.c.bf16 %v834_v56, %v833_v54  ;;  %v1507_v3 = vpack.c.bf16 %v866_v57, %v865_v55  ;;  %1560 = vst [vmem:[#allocation10 + $0x38] sm:$0xff] %v1432_v60   ;;  %v775_v8 = vadd.f32 %v1981_v42, %v704_v62  ;;  %v705_v10 = vmul.f32 %v1660_v6, %v1979_v40  ;;  %v491_v12 = vpop.f32.mrb[19].mxu0  ;;  %v619_v13 = vpop.f32.mrb[19].mxu1 }
 0x163   :  { %1576 = vst [vmem:[#allocation10 + $0xb8] sm:$0xff] %v1512_v61   ;;  %v807_v9 = vadd.f32 %v1981_v42, %v736_v63  ;;  %v737_v11 = vmul.f32 %v1692_v7, %v1979_v40  ;;  %v773_v14 = vadd.f32 %v1981_v42, %v702_v4  ;;  %v805_v15 = vadd.f32 %v1981_v42, %v734_v5 }
 0x164   :  { %1559 = vst [vmem:[#allocation10 + $0x30] sm:$0xff] %v1427_v2   ;;  %1575 = vst [vmem:[#allocation10 + $0xb0] sm:$0xff] %v1507_v3   ;;  %v703_v16 = vmul.f32 %v1979_v40, %v491_v12  ;;  %v735_v17 = vmul.f32 %v1979_v40, %v619_v13  ;;  %v776_v18 = vadd.f32 %v1981_v42, %v705_v10  ;;  %v839_v22 = vmax.f32 %v775_v8, 0.0 }
 0x165   :  { %v808_v19 = vadd.f32 %v1981_v42, %v737_v11  ;;  %v871_v23 = vmax.f32 %v807_v9, 0.0  ;;  %v837_v26 = vmax.f32 %v773_v14, 0.0  ;;  %v869_v27 = vmax.f32 %v805_v15, 0.0 }
 0x166   :  { %v774_v20 = vadd.f32 %v1981_v42, %v703_v16  ;;  %v806_v21 = vadd.f32 %v1981_v42, %v735_v17  ;;  %v840_v24 = vmax.f32 %v776_v18, 0.0 }
 0x167   :  { %v872_v25 = vmax.f32 %v808_v19, 0.0  ;;  %v1663_v30 = vpop.f32.mrb[20].mxu0  ;;  %v1695_v31 = vpop.f32.mrb[20].mxu1 }
 0x168   :  { %v838_v28 = vmax.f32 %v774_v20, 0.0  ;;  %v870_v29 = vmax.f32 %v806_v21, 0.0  ;;  %v1442_v32 = vpack.c.bf16 %v840_v24, %v839_v22  ;;  %v708_v34 = vmul.f32 %v1663_v30, %v1979_v40  ;;  %v504_v36 = vpop.f32.mrb[21].mxu0  ;;  %v632_v37 = vpop.f32.mrb[21].mxu1 }
 0x169   :  { %v1522_v33 = vpack.c.bf16 %v872_v25, %v871_v23  ;;  %v740_v35 = vmul.f32 %v1695_v31, %v1979_v40  ;;  %v706_v41 = vmul.f32 %v1979_v40, %v504_v36  ;;  %v738_v43 = vmul.f32 %v1979_v40, %v632_v37  ;;  %v1664_v44 = vpop.f32.mrb[22].mxu0  ;;  %v1696_v45 = vpop.f32.mrb[22].mxu1 }
 0x16a   :  { %v1437_v38 = vpack.c.bf16 %v838_v28, %v837_v26  ;;  %v1517_v39 = vpack.c.bf16 %v870_v29, %v869_v27  ;;  %1562 = vst [vmem:[#allocation10 + $0x48] sm:$0xff] %v1442_v32   ;;  %v779_v46 = vadd.f32 %v1981_v42, %v708_v34  ;;  %v709_v48 = vmul.f32 %v1664_v44, %v1979_v40  ;;  %v507_v50 = vpop.f32.mrb[23].mxu0  ;;  %v635_v51 = vpop.f32.mrb[23].mxu1 }
 0x16b   :  { %1578 = vst [vmem:[#allocation10 + $0xc8] sm:$0xff] %v1522_v33   ;;  %v811_v47 = vadd.f32 %v1981_v42, %v740_v35  ;;  %v741_v49 = vmul.f32 %v1696_v45, %v1979_v40  ;;  %v777_v52 = vadd.f32 %v1981_v42, %v706_v41  ;;  %v809_v53 = vadd.f32 %v1981_v42, %v738_v43 }
 0x16c   :  { %1561 = vst [vmem:[#allocation10 + $0x40] sm:$0xff] %v1437_v38   ;;  %1577 = vst [vmem:[#allocation10 + $0xc0] sm:$0xff] %v1517_v39   ;;  %v707_v54 = vmul.f32 %v1979_v40, %v507_v50  ;;  %v739_v55 = vmul.f32 %v1979_v40, %v635_v51  ;;  %v780_v56 = vadd.f32 %v1981_v42, %v709_v48  ;;  %v843_v60 = vmax.f32 %v779_v46, 0.0 }
 0x16d   :  { %v812_v57 = vadd.f32 %v1981_v42, %v741_v49  ;;  %v875_v61 = vmax.f32 %v811_v47, 0.0  ;;  %v841_v0 = vmax.f32 %v777_v52, 0.0  ;;  %v873_v1 = vmax.f32 %v809_v53, 0.0 }
 0x16e   :  { %v778_v58 = vadd.f32 %v1981_v42, %v707_v54  ;;  %v810_v59 = vadd.f32 %v1981_v42, %v739_v55  ;;  %v844_v62 = vmax.f32 %v780_v56, 0.0 }
 0x16f   :  { %v876_v63 = vmax.f32 %v812_v57, 0.0  ;;  %v1667_v4 = vpop.f32.mrb[24].mxu0  ;;  %v1699_v5 = vpop.f32.mrb[24].mxu1 }
 0x170   :  { %v842_v2 = vmax.f32 %v778_v58, 0.0  ;;  %v874_v3 = vmax.f32 %v810_v59, 0.0  ;;  %v1452_v6 = vpack.c.bf16 %v844_v62, %v843_v60  ;;  %v712_v8 = vmul.f32 %v1667_v4, %v1979_v40  ;;  %v520_v10 = vpop.f32.mrb[25].mxu0  ;;  %v648_v11 = vpop.f32.mrb[25].mxu1 }
 0x171   :  { %v1532_v7 = vpack.c.bf16 %v876_v63, %v875_v61  ;;  %v744_v9 = vmul.f32 %v1699_v5, %v1979_v40  ;;  %v710_v14 = vmul.f32 %v1979_v40, %v520_v10  ;;  %v742_v15 = vmul.f32 %v1979_v40, %v648_v11  ;;  %v1668_v16 = vpop.f32.mrb[26].mxu0  ;;  %v1700_v17 = vpop.f32.mrb[26].mxu1 }
 0x172   :  { %v1447_v12 = vpack.c.bf16 %v842_v2, %v841_v0  ;;  %v1527_v13 = vpack.c.bf16 %v874_v3, %v873_v1  ;;  %1564 = vst [vmem:[#allocation10 + $0x58] sm:$0xff] %v1452_v6   ;;  %v783_v18 = vadd.f32 %v1981_v42, %v712_v8  ;;  %v713_v20 = vmul.f32 %v1668_v16, %v1979_v40  ;;  %v523_v22 = vpop.f32.mrb[27].mxu0  ;;  %v651_v23 = vpop.f32.mrb[27].mxu1 }
 0x173   :  { %1580 = vst [vmem:[#allocation10 + $0xd8] sm:$0xff] %v1532_v7   ;;  %v815_v19 = vadd.f32 %v1981_v42, %v744_v9  ;;  %v745_v21 = vmul.f32 %v1700_v17, %v1979_v40  ;;  %v781_v24 = vadd.f32 %v1981_v42, %v710_v14  ;;  %v813_v25 = vadd.f32 %v1981_v42, %v742_v15 }
 0x174   :  { %1563 = vst [vmem:[#allocation10 + $0x50] sm:$0xff] %v1447_v12   ;;  %1579 = vst [vmem:[#allocation10 + $0xd0] sm:$0xff] %v1527_v13   ;;  %v711_v26 = vmul.f32 %v1979_v40, %v523_v22  ;;  %v743_v27 = vmul.f32 %v1979_v40, %v651_v23  ;;  %v784_v28 = vadd.f32 %v1981_v42, %v713_v20  ;;  %v847_v32 = vmax.f32 %v783_v18, 0.0 }
 0x175   :  { %v816_v29 = vadd.f32 %v1981_v42, %v745_v21  ;;  %v879_v33 = vmax.f32 %v815_v19, 0.0  ;;  %v845_v36 = vmax.f32 %v781_v24, 0.0  ;;  %v877_v37 = vmax.f32 %v813_v25, 0.0 }
 0x176   :  { %v782_v30 = vadd.f32 %v1981_v42, %v711_v26  ;;  %v814_v31 = vadd.f32 %v1981_v42, %v743_v27  ;;  %v848_v34 = vmax.f32 %v784_v28, 0.0 }
 0x177   :  { %v880_v35 = vmax.f32 %v816_v29, 0.0  ;;  %v1671_v41 = vpop.f32.mrb[28].mxu0  ;;  %v1703_v43 = vpop.f32.mrb[28].mxu1 }
 0x178   :  { %v846_v38 = vmax.f32 %v782_v30, 0.0  ;;  %v878_v39 = vmax.f32 %v814_v31, 0.0  ;;  %v1462_v44 = vpack.c.bf16 %v848_v34, %v847_v32  ;;  %v716_v46 = vmul.f32 %v1671_v41, %v1979_v40  ;;  %v536_v48 = vpop.f32.mrb[29].mxu0  ;;  %v664_v49 = vpop.f32.mrb[29].mxu1 }
 0x179   :  { %v1542_v45 = vpack.c.bf16 %v880_v35, %v879_v33  ;;  %v748_v47 = vmul.f32 %v1703_v43, %v1979_v40  ;;  %v714_v52 = vmul.f32 %v1979_v40, %v536_v48  ;;  %v746_v53 = vmul.f32 %v1979_v40, %v664_v49  ;;  %v1672_v54 = vpop.f32.mrb[30].mxu0  ;;  %v1704_v55 = vpop.f32.mrb[30].mxu1 }
 0x17a   :  { %v1457_v50 = vpack.c.bf16 %v846_v38, %v845_v36  ;;  %v1537_v51 = vpack.c.bf16 %v878_v39, %v877_v37  ;;  %1566 = vst [vmem:[#allocation10 + $0x68] sm:$0xff] %v1462_v44   ;;  %v787_v56 = vadd.f32 %v1981_v42, %v716_v46  ;;  %v717_v58 = vmul.f32 %v1672_v54, %v1979_v40  ;;  %v539_v60 = vpop.f32.mrb[31].mxu0  ;;  %v667_v61 = vpop.f32.mrb[31].mxu1 }
 0x17b   :  { %1582 = vst [vmem:[#allocation10 + $0xe8] sm:$0xff] %v1542_v45   ;;  %v819_v57 = vadd.f32 %v1981_v42, %v748_v47  ;;  %v749_v59 = vmul.f32 %v1704_v55, %v1979_v40  ;;  %v785_v62 = vadd.f32 %v1981_v42, %v714_v52  ;;  %v817_v63 = vadd.f32 %v1981_v42, %v746_v53 }
 0x17c   :  { %1565 = vst [vmem:[#allocation10 + $0x60] sm:$0xff] %v1457_v50   ;;  %1581 = vst [vmem:[#allocation10 + $0xe0] sm:$0xff] %v1537_v51   ;;  %v715_v0 = vmul.f32 %v1979_v40, %v539_v60  ;;  %v747_v1 = vmul.f32 %v1979_v40, %v667_v61  ;;  %v788_v2 = vadd.f32 %v1981_v42, %v717_v58  ;;  %v851_v6 = vmax.f32 %v787_v56, 0.0 }
 0x17d   :  { %v820_v3 = vadd.f32 %v1981_v42, %v749_v59  ;;  %v883_v7 = vmax.f32 %v819_v57, 0.0  ;;  %v849_v10 = vmax.f32 %v785_v62, 0.0  ;;  %v881_v11 = vmax.f32 %v817_v63, 0.0 }
 0x17e   :  { %v786_v4 = vadd.f32 %v1981_v42, %v715_v0  ;;  %v818_v5 = vadd.f32 %v1981_v42, %v747_v1  ;;  %v852_v8 = vmax.f32 %v788_v2, 0.0 }
 0x17f   :  { %v884_v9 = vmax.f32 %v820_v3, 0.0 }
 0x180   :  { %v850_v12 = vmax.f32 %v786_v4, 0.0  ;;  %v882_v13 = vmax.f32 %v818_v5, 0.0  ;;  %v1472_v14 = vpack.c.bf16 %v852_v8, %v851_v6 }
 0x181   :  { %v1552_v40 = vpack.c.bf16 %v884_v9, %v883_v7 }
 0x182   :  { %v1467_v15 = vpack.c.bf16 %v850_v12, %v849_v10  ;;  %v1547_v16 = vpack.c.bf16 %v882_v13, %v881_v11  ;;  %1568 = vst [vmem:[#allocation10 + $0x78] sm:$0xff] %v1472_v14  }
 0x183   :  { %1584 = vst [vmem:[#allocation10 + $0xf8] sm:$0xff] %v1552_v40  }
 0x184   :  { %1567 = vst [vmem:[#allocation10 + $0x70] sm:$0xff] %v1467_v15   ;;  %1583 = vst [vmem:[#allocation10 + $0xf0] sm:$0xff] %v1547_v16  }
 0x185   :  { %1867 = shalt.err (!%p1864_p8)
}
 0x186   :  { %s1868_s17 = scalar_lea.hbm %s2130_s4, 4096 }
 0x187   :  { %p1869_p9 = scmp.ne.s32.totalorder %s2130_s4, %s1868_s17  ;;  %p1872_p10 = scmp.lt.u32.totalorder %s1868_s17, %s2130_s4 }
 0x189   :  { %p1874_p11 = pnand %p1872_p10, %p1869_p9 }
 0x18b   :  { %1877 = shalt.err (!%p1874_p11)
}
 0x18c   :  { %1216 = dma.vmem_to_hbm [thread:$0]  %s1211_s13, 4096, %s2130_s4, [#allocation4], %s1888_s27, %s1888_s27, %s1889_s28  }
 0x18d   :  { %1884 = dma.done.wait [#allocation4], 4096  }
 0x18e   :  { %1885 = vsyncadd [#allocation4], 4294963200 }
 0x18f   :  { %1220 = vsyncpa [#allocation3], 1 }
 0x190   :  { %1221 = vsyncpa [#allocation6], 1 }
 0x191   :  { %1222 = vsyncpa [#allocation9], 1 }
 0x192   :  { %1223 = vsyncpa [#allocation4], 1 }

// kernel: _lambda_.5
= control target key start
LH: loop header
LB: loop body
LE: loop exit
PB: predicated region body
PF: predicated region fallthrough
CT: control target
= control target key end

     0   :  { %13 = vsyncpa [#allocation3], 0  ;;  %s1544_s0 = inlined_call_operand.hbm [shape: bf16[128,128], index: 0, kind: input, shape index: {}]   ;;  %s1545_s1 = inlined_call_operand.hbm [shape: bf16[128,128], index: 1, kind: input, shape index: {}]   ;;  %s1546_s2 = inlined_call_operand.hbm [shape: f32[1,128], index: 2, kind: input, shape index: {}]   ;;  %s1547_s3 = inlined_call_operand.hbm [shape: f32[1,128], index: 3, kind: input, shape index: {}]   ;;  %s1548_s4 = inlined_call_operand.hbm [shape: bf16[128,128], index: 4, kind: input, shape index: {}]   ;;  %s1549_s5 = inlined_call_operand.hbm [shape: bf16[128,128], index: 5, kind: input, shape index: {}]   ;;  %s1550_s6 = inlined_call_operand.hbm [shape: f32[1,128], index: 6, kind: input, shape index: {}]   ;;  %s1551_s7 = inlined_call_operand.hbm [shape: f32[1,128], index: 7, kind: input, shape index: {}]   ;;  %s1552_s8 = inlined_call_operand.hbm [shape: bf16[128,128], index: 8, kind: output, shape index: {}]  }
   0x1   :  { %14 = vsyncpa [#allocation6], 0 }
   0x2   :  { %15 = vsyncpa [#allocation9], 0 }
   0x3   :  { %16 = vsyncpa [#allocation12], 0 }
   0x4   :  { %17 = vsyncpa [#allocation15], 0 }
   0x5   :  { %18 = vsyncpa [#allocation4], 0  ;;  %s1271_s27 = smov [#allocation5]   ;;  %s1272_s29 = smov [#allocation8]  }
   0x6   :  { %s36_s28 = sshll.u32 %s1271_s27, 4  ;;  %s59_s30 = sshll.u32 %s1272_s29, 4  ;;  %s37_s28 = int_to_ptr.vmem [resolvable:$true] %s36_s28  ;;  %s1327_s30 = int_to_ptr.vmem [resolvable:$true] %s59_s30 }
   0x7   :  { %s1061_s11 = scalar_lea.hbm %s1545_s1, 1024 }
   0x8   :  { %p1062_p0 = scmp.ne.s32.totalorder %s1545_s1, %s1061_s11  ;;  %p1065_p1 = scmp.lt.u32.totalorder %s1061_s11, %s1545_s1 }
   0xa   :  { %p1067_p2 = pnand %p1065_p1, %p1062_p0 }
   0xc   :  { %1070 = shalt.err (!%p1067_p2)
}
   0xd   :  { %s1071_s16 = scalar_lea.vmem %s37_s28, 1024  ;;  %p1076_p4 = scmp.lt.s32.totalorder %s37_s28, %s37_s28 }
   0xe   :  { %p1072_p3 = scmp.ne.s32.totalorder %s37_s28, %s1071_s16  ;;  %p1077_p5 = scmp.lt.s32.totalorder %s1071_s16, %s1071_s16 }
  0x10   :  { %p1078_p6 = por %p1077_p5, %p1076_p4 }
  0x12   :  { %p1079_p7 = pnand %p1078_p6, %p1072_p3 }
  0x14   :  { %1082 = shalt.err (!%p1079_p7)
}
  0x15   :  { %s1273_s17 = smov 64   ;;  %s1274_s18 = smov 4  }
  0x16   :  { %42 = dma.hbm_to_vmem [thread:$0]  %s1545_s1, 1024, %s37_s28, [#allocation6], %s1273_s17, %s1273_s17, %s1274_s18  }
  0x17   :  { %s1083_s23 = scalar_lea.hbm %s1547_s3, 16 }
  0x18   :  { %p1084_p8 = scmp.ne.s32.totalorder %s1547_s3, %s1083_s23  ;;  %p1087_p9 = scmp.lt.u32.totalorder %s1083_s23, %s1547_s3 }
  0x1a   :  { %p1089_p10 = pnand %p1087_p9, %p1084_p8 }
  0x1c   :  { %1092 = shalt.err (!%p1089_p10)
}
  0x1d   :  { %s1093_s29 = scalar_lea.vmem %s1327_s30, 16  ;;  %s1097_s1 = scalar_lea.vmem %s1327_s30, 32 }
  0x1e   :  { %p1094_p11 = scmp.ne.s32.totalorder %s1327_s30, %s1093_s29  ;;  %p1098_p12 = scmp.lt.s32.totalorder %s1327_s30, %s1327_s30 }
  0x1f   :  { %p1099_p13 = scmp.lt.s32.totalorder %s1097_s1, %s1093_s29 }
  0x21   :  { %p1100_p0 = por %p1099_p13, %p1098_p12 }
  0x23   :  { %p1101_p1 = pnand %p1100_p0, %p1094_p11 }
  0x25   :  { %1104 = shalt.err (!%p1101_p1)
}
  0x26   :  { %62 = dma.hbm_to_vmem [thread:$0]  %s1547_s3, 16, %s1327_s30, [#allocation9]  }
  0x27   :  { %s1275_s10 = smov [#allocation11]   ;;  %s1276_s12 = smov [#allocation2]  }
  0x28   :  { %s80_s11 = sshll.u32 %s1275_s10, 4  ;;  %s24_s13 = sshll.u32 %s1276_s12, 4  ;;  %s81_s11 = int_to_ptr.vmem [resolvable:$true] %s80_s11  ;;  %s1362_s13 = int_to_ptr.vmem [resolvable:$true] %s24_s13 }
  0x29   :  { %s1105_s16 = scalar_lea.hbm %s1549_s5, 1024 }
  0x2a   :  { %p1106_p2 = scmp.ne.s32.totalorder %s1549_s5, %s1105_s16  ;;  %p1109_p3 = scmp.lt.u32.totalorder %s1105_s16, %s1549_s5 }
  0x2c   :  { %p1111_p4 = pnand %p1109_p3, %p1106_p2 }
  0x2e   :  { %1114 = shalt.err (!%p1111_p4)
}
  0x2f   :  { %s1115_s3 = scalar_lea.vmem %s81_s11, 1024  ;;  %p1120_p6 = scmp.lt.s32.totalorder %s81_s11, %s81_s11 }
  0x30   :  { %p1116_p5 = scmp.ne.s32.totalorder %s81_s11, %s1115_s3  ;;  %p1121_p7 = scmp.lt.s32.totalorder %s1115_s3, %s1115_s3 }
  0x32   :  { %p1122_p8 = por %p1121_p7, %p1120_p6 }
  0x34   :  { %p1123_p9 = pnand %p1122_p8, %p1116_p5 }
  0x36   :  { %1126 = shalt.err (!%p1123_p9)
}
  0x37   :  { %86 = dma.hbm_to_vmem [thread:$0]  %s1549_s5, 1024, %s81_s11, [#allocation12], %s1273_s17, %s1273_s17, %s1274_s18  }
  0x38   :  { %s1127_s26 = scalar_lea.hbm %s1544_s0, 1024 }
  0x39   :  { %p1128_p10 = scmp.ne.s32.totalorder %s1544_s0, %s1127_s26  ;;  %p1131_p11 = scmp.lt.u32.totalorder %s1127_s26, %s1544_s0 }
  0x3b   :  { %p1133_p12 = pnand %p1131_p11, %p1128_p10 }
  0x3d   :  { %1136 = shalt.err (!%p1133_p12)
}
  0x3e   :  { %s1137_s9 = scalar_lea.vmem %s1362_s13, 1024  ;;  %p1142_p0 = scmp.lt.s32.totalorder %s1362_s13, %s1362_s13 }
  0x3f   :  { %p1138_p13 = scmp.ne.s32.totalorder %s1362_s13, %s1137_s9  ;;  %p1143_p1 = scmp.lt.s32.totalorder %s1137_s9, %s1137_s9 }
  0x41   :  { %p1144_p2 = por %p1143_p1, %p1142_p0 }
  0x43   :  { %p1145_p3 = pnand %p1144_p2, %p1138_p13 }
  0x45   :  { %1148 = shalt.err (!%p1145_p3)
}
  0x46   :  { %30 = dma.hbm_to_vmem [thread:$0]  %s1544_s0, 1024, %s1362_s13, [#allocation3], %s1273_s17, %s1273_s17, %s1274_s18  }
  0x47   :  { %s1277_s11 = smov [#allocation7]   ;;  %s1278_s14 = smov [#allocation10]  }
  0x48   :  { %s49_s12 = sshll.u32 %s1277_s11, 4  ;;  %s68_s15 = sshll.u32 %s1278_s14, 4  ;;  %s50_s12 = int_to_ptr.vmem [resolvable:$true] %s49_s12  ;;  %s1399_s15 = int_to_ptr.vmem [resolvable:$true] %s68_s15 }
  0x49   :  { %s1149_s20 = scalar_lea.hbm %s1546_s2, 16 }
  0x4a   :  { %p1150_p4 = scmp.ne.s32.totalorder %s1546_s2, %s1149_s20  ;;  %p1153_p5 = scmp.lt.u32.totalorder %s1149_s20, %s1546_s2 }
  0x4c   :  { %p1155_p6 = pnand %p1153_p5, %p1150_p4 }
  0x4e   :  { %1158 = shalt.err (!%p1155_p6)
}
  0x4f   :  { %s1159_s0 = scalar_lea.vmem %s50_s12, 16  ;;  %s1163_s13 = scalar_lea.vmem %s50_s12, 32 }
  0x50   :  { %p1160_p7 = scmp.ne.s32.totalorder %s50_s12, %s1159_s0  ;;  %p1164_p8 = scmp.lt.s32.totalorder %s50_s12, %s50_s12 }
  0x51   :  { %p1165_p9 = scmp.lt.s32.totalorder %s1163_s13, %s1159_s0 }
  0x53   :  { %p1166_p10 = por %p1165_p9, %p1164_p8 }
  0x55   :  { %p1167_p11 = pnand %p1166_p10, %p1160_p7 }
  0x57   :  { %1170 = shalt.err (!%p1167_p11)
}
  0x58   :  { %52 = dma.hbm_to_vmem [thread:$0]  %s1546_s2, 16, %s50_s12, [#allocation6]  }
  0x59   :  { %s1171_s27 = scalar_lea.hbm %s1548_s4, 1024 }
  0x5a   :  { %p1172_p12 = scmp.ne.s32.totalorder %s1548_s4, %s1171_s27  ;;  %p1175_p13 = scmp.lt.u32.totalorder %s1171_s27, %s1548_s4 }
  0x5c   :  { %p1177_p0 = pnand %p1175_p13, %p1172_p12 }
  0x5e   :  { %1180 = shalt.err (!%p1177_p0)
}
  0x5f   :  { %s1181_s5 = scalar_lea.vmem %s1399_s15, 1024  ;;  %p1186_p2 = scmp.lt.s32.totalorder %s1399_s15, %s1399_s15 }
  0x60   :  { %p1182_p1 = scmp.ne.s32.totalorder %s1399_s15, %s1181_s5  ;;  %p1187_p3 = scmp.lt.s32.totalorder %s1181_s5, %s1181_s5 }
  0x62   :  { %p1188_p4 = por %p1187_p3, %p1186_p2 }
  0x64   :  { %p1189_p5 = pnand %p1188_p4, %p1182_p1 }
  0x66   :  { %1192 = shalt.err (!%p1189_p5)
}
  0x67   :  { %74 = dma.hbm_to_vmem [thread:$0]  %s1548_s4, 1024, %s1399_s15, [#allocation9], %s1273_s17, %s1273_s17, %s1274_s18  }
  0x68   :  { %s1279_s11 = smov [#allocation13]   ;;  %s1280_s14 = smov [#allocation14]  }
  0x69   :  { %s93_s12 = sshll.u32 %s1279_s11, 4  ;;  %s103_s16 = sshll.u32 %s1280_s14, 4  ;;  %s94_s12 = int_to_ptr.vmem [resolvable:$true] %s93_s12  ;;  %s104_s16 = int_to_ptr.vmem [resolvable:$true] %s103_s16 }
  0x6a   :  { %s1193_s21 = scalar_lea.hbm %s1550_s6, 16 }
  0x6b   :  { %p1194_p6 = scmp.ne.s32.totalorder %s1550_s6, %s1193_s21  ;;  %p1197_p7 = scmp.lt.u32.totalorder %s1193_s21, %s1550_s6 }
  0x6d   :  { %p1199_p8 = pnand %p1197_p7, %p1194_p6 }
  0x6f   :  { %1202 = shalt.err (!%p1199_p8)
}
  0x70   :  { %s1203_s4 = scalar_lea.vmem %s94_s12, 16  ;;  %s1207_s15 = scalar_lea.vmem %s94_s12, 32 }
  0x71   :  { %p1204_p9 = scmp.ne.s32.totalorder %s94_s12, %s1203_s4  ;;  %p1208_p10 = scmp.lt.s32.totalorder %s94_s12, %s94_s12 }
  0x72   :  { %p1209_p11 = scmp.lt.s32.totalorder %s1207_s15, %s1203_s4 }
  0x74   :  { %p1210_p12 = por %p1209_p11, %p1208_p10 }
  0x76   :  { %p1211_p13 = pnand %p1210_p12, %p1204_p9 }
  0x78   :  { %1214 = shalt.err (!%p1211_p13)
}
  0x79   :  { %96 = dma.hbm_to_vmem [thread:$0]  %s1550_s6, 16, %s94_s12, [#allocation12]  }
  0x7a   :  { %s1215_s26 = scalar_lea.hbm %s1551_s7, 16 }
  0x7b   :  { %p1216_p0 = scmp.ne.s32.totalorder %s1551_s7, %s1215_s26  ;;  %p1219_p1 = scmp.lt.u32.totalorder %s1215_s26, %s1551_s7 }
  0x7d   :  { %p1221_p2 = pnand %p1219_p1, %p1216_p0 }
  0x7f   :  { %1224 = shalt.err (!%p1221_p2)
}
  0x80   :  { %s1225_s9 = scalar_lea.vmem %s104_s16, 16  ;;  %s1229_s5 = scalar_lea.vmem %s104_s16, 32 }
  0x81   :  { %p1226_p3 = scmp.ne.s32.totalorder %s104_s16, %s1225_s9  ;;  %p1230_p4 = scmp.lt.s32.totalorder %s104_s16, %s104_s16 }
  0x82   :  { %p1231_p5 = scmp.lt.s32.totalorder %s1229_s5, %s1225_s9 }
  0x84   :  { %p1232_p6 = por %p1231_p5, %p1230_p4 }
  0x86   :  { %p1233_p7 = pnand %p1232_p6, %p1226_p3 }
  0x88   :  { %1236 = shalt.err (!%p1233_p7)
}
  0x89   :  { %106 = dma.hbm_to_vmem [thread:$0]  %s1551_s7, 16, %s104_s16, [#allocation15]  }
  0x8a   :  { %1259 = dma.done.wait [#allocation3], 1024  }
  0x8b   :  { %1260 = vsyncadd [#allocation3], 4294966272 }
  0x8c   :  { %1261 = dma.done.wait [#allocation6], 1040  }
  0x8d   :  { %1262 = vsyncadd [#allocation6], 4294966256 }
  0x8e   :  { %1263 = dma.done.wait [#allocation9], 1040  }
  0x8f   :  { %1264 = vsyncadd [#allocation9], 4294966256 }
  0x90   :  { %1265 = dma.done.wait [#allocation12], 1040  }
  0x91   :  { %1266 = vsyncadd [#allocation12], 4294966256 }
  0x92   :  { %1267 = dma.done.wait [#allocation15], 16  }
  0x93   :  { %1268 = vsyncadd [#allocation15], 4294967280  ;;  %v1029_v0 = vld [vmem:[#allocation5] sm:$0xff]   ;;  %v1031_v2 = vld [vmem:[#allocation5 + $0x8] sm:$0xff]   ;;  %s1281_s7 = smov [#allocation16]  }
  0x94   :  { %v1030_v1 = vld [vmem:[#allocation11] sm:$0xff]   ;;  %954 = vmatprep.subr.bf16.mxu0 %v1029_v0  ;;  %v1032_v3 = vld [vmem:[#allocation11 + $0x8] sm:$0xff]   ;;  %v1034_v5 = vld [vmem:[#allocation11 + $0x10] sm:$0xff]   ;;  %s791_s10 = sshll.u32 %s1281_s7, 4  ;;  %s792_s10 = int_to_ptr.vmem [resolvable:$true] %s791_s10 }
  0x95   :  { %986 = vmatprep.subr.bf16.mxu1 %v1030_v1  ;;  %955 = vmatpush3.bf16.msra.mxu0 %v1029_v0  ;;  %v1033_v4 = vld [vmem:[#allocation5 + $0x10] sm:$0xff]   ;;  %v1035_v6 = vld [vmem:[#allocation5 + $0x18] sm:$0xff]   ;;  %v1037_v8 = vld [vmem:[#allocation5 + $0x20] sm:$0xff]   ;;  %s1237_s11 = scalar_lea.vmem %s792_s10, 1024  ;;  %p1242_p9 = scmp.lt.s32.totalorder %s792_s10, %s792_s10 }
  0x96   :  { %987 = vmatpush3.bf16.msra.mxu1 %v1030_v1  ;;  %956 = vmatprep.subr.bf16.mxu0 %v1031_v2  ;;  %v1036_v7 = vld [vmem:[#allocation11 + $0x18] sm:$0xff]   ;;  %v1038_v9 = vld [vmem:[#allocation11 + $0x20] sm:$0xff]   ;;  %v1040_v11 = vld [vmem:[#allocation11 + $0x28] sm:$0xff]   ;;  %p1238_p8 = scmp.ne.s32.totalorder %s792_s10, %s1237_s11  ;;  %p1243_p10 = scmp.lt.s32.totalorder %s1237_s11, %s1237_s11 }
  0x97   :  { %988 = vmatprep.subr.bf16.mxu1 %v1032_v3  ;;  %v1039_v10 = vld [vmem:[#allocation5 + $0x28] sm:$0xff]   ;;  %v1045_v12 = vld [vmem:[#allocation2] sm:$0xff]   ;;  %v1041_v14 = vld [vmem:[#allocation5 + $0x30] sm:$0xff]  }
  0x98   :  { %v1046_v13 = vld [vmem:[#allocation10] sm:$0xff]   ;;  %970 = vmatprep.mubr.bf16.mxu0 %v1045_v12  ;;  %v1042_v15 = vld [vmem:[#allocation11 + $0x30] sm:$0xff]   ;;  %v1044_v17 = vld [vmem:[#allocation11 + $0x38] sm:$0xff]   ;;  %p1244_p11 = por %p1243_p10, %p1242_p9 }
  0x99   :  { %957 = vmatpush3.bf16.msra.mxu0 %v1031_v2  ;;  %1002 = vmatprep.mubr.bf16.mxu1 %v1046_v13  ;;  %v1043_v16 = vld [vmem:[#allocation5 + $0x38] sm:$0xff]   ;;  %v1047_v18 = vld [vmem:[#allocation2 + $0x8] sm:$0xff]   ;;  %v1049_v20 = vld [vmem:[#allocation2 + $0x10] sm:$0xff]  }
  0x9a   :  { %989 = vmatpush3.bf16.msra.mxu1 %v1032_v3  ;;  %958 = vmatprep.subr.bf16.mxu0 %v1033_v4  ;;  %v1048_v19 = vld [vmem:[#allocation10 + $0x8] sm:$0xff]   ;;  %v1050_v21 = vld [vmem:[#allocation10 + $0x10] sm:$0xff]   ;;  %v1052_v23 = vld [vmem:[#allocation10 + $0x18] sm:$0xff]   ;;  %p1245_p12 = pnand %p1244_p11, %p1238_p8 }
  0x9b   :  { %990 = vmatprep.subr.bf16.mxu1 %v1034_v5  ;;  %v1051_v22 = vld [vmem:[#allocation2 + $0x18] sm:$0xff]   ;;  %v1053_v24 = vld [vmem:[#allocation2 + $0x20] sm:$0xff]   ;;  %v1055_v26 = vld [vmem:[#allocation2 + $0x28] sm:$0xff]  }
  0x9c   :  { %v1054_v25 = vld [vmem:[#allocation10 + $0x20] sm:$0xff]   ;;  %v1056_v27 = vld [vmem:[#allocation10 + $0x28] sm:$0xff]   ;;  %v1058_v29 = vld [vmem:[#allocation10 + $0x30] sm:$0xff]  }
  0x9d   :  { %959 = vmatpush3.bf16.msra.mxu0 %v1033_v4  ;;  %v1057_v28 = vld [vmem:[#allocation2 + $0x30] sm:$0xff]   ;;  %v1059_v30 = vld [vmem:[#allocation2 + $0x38] sm:$0xff]   ;;  %v1457_v32 = vld [vmem:[#allocation7] ss:$0 sm:$0xff] }
  0x9e   :  { %991 = vmatpush3.bf16.msra.mxu1 %v1034_v5  ;;  %960 = vmatprep.subr.bf16.mxu0 %v1035_v6  ;;  %v1060_v31 = vld [vmem:[#allocation10 + $0x38] sm:$0xff]   ;;  %v1459_v33 = vld [vmem:[#allocation13] ss:$0 sm:$0xff]  ;;  %v1464_v38 = vld [vmem:[#allocation14] ss:$0 sm:$0xff] }
  0x9f   :  { %992 = vmatprep.subr.bf16.mxu1 %v1036_v7  ;;  %v1461_v35 = vld [vmem:[#allocation8] ss:$0 sm:$0xff] }
  0xa1   :  { %961 = vmatpush3.bf16.msra.mxu0 %v1035_v6 }
  0xa2   :  { %993 = vmatpush3.bf16.msra.mxu1 %v1036_v7  ;;  %962 = vmatprep.subr.bf16.mxu0 %v1037_v8 }
  0xa3   :  { %994 = vmatprep.subr.bf16.mxu1 %v1038_v9 }
  0xa5   :  { %963 = vmatpush3.bf16.msra.mxu0 %v1037_v8 }
  0xa6   :  { %995 = vmatpush3.bf16.msra.mxu1 %v1038_v9  ;;  %964 = vmatprep.subr.bf16.mxu0 %v1039_v10 }
  0xa7   :  { %996 = vmatprep.subr.bf16.mxu1 %v1040_v11 }
  0xa9   :  { %965 = vmatpush3.bf16.msra.mxu0 %v1039_v10 }
  0xaa   :  { %997 = vmatpush3.bf16.msra.mxu1 %v1040_v11  ;;  %966 = vmatprep.subr.bf16.mxu0 %v1041_v14 }
  0xab   :  { %998 = vmatprep.subr.bf16.mxu1 %v1042_v15 }
  0xad   :  { %967 = vmatpush3.bf16.msra.mxu0 %v1041_v14 }
  0xae   :  { %999 = vmatpush3.bf16.msra.mxu1 %v1042_v15  ;;  %968 = vmatprep.subr.bf16.mxu0 %v1043_v16 }
  0xaf   :  { %1000 = vmatprep.subr.bf16.mxu1 %v1044_v17 }
  0xb1   :  { %969 = vmatpush3.bf16.msra.mxu0 %v1043_v16 }
  0xb2   :  { %1001 = vmatpush3.bf16.msra.mxu1 %v1044_v17 }
  0xb4   :  { %971 = vmatmul.mubr.bf16.vlgmr.msra.gmra.mrb[0].mxu0 %v1047_v18 }
  0xb5   :  { %1003 = vmatmul.mubr.bf16.vlgmr.msra.gmra.mrb[0].mxu1 %v1048_v19  ;;  %974 = vmatprep.mubr.bf16.mxu0 %v1049_v20 }
  0xb6   :  { %1006 = vmatprep.mubr.bf16.mxu1 %v1050_v21 }
  0xbc   :  { %975 = vmatmul.mubr.bf16.gmra.mrb[4].mxu0 %v1051_v22 }
  0xbd   :  { %1007 = vmatmul.mubr.bf16.gmra.mrb[4].mxu1 %v1052_v23  ;;  %978 = vmatprep.mubr.bf16.mxu0 %v1053_v24 }
  0xbe   :  { %1010 = vmatprep.mubr.bf16.mxu1 %v1054_v25 }
  0xc4   :  { %979 = vmatmul.mubr.bf16.gmra.mrb[8].mxu0 %v1055_v26 }
  0xc5   :  { %1011 = vmatmul.mubr.bf16.gmra.mrb[8].mxu1 %v1056_v27  ;;  %982 = vmatprep.mubr.bf16.mxu0 %v1057_v28 }
  0xc6   :  { %1014 = vmatprep.mubr.bf16.mxu1 %v1058_v29 }
  0xcc   :  { %983 = vmatmul.mubr.bf16.gmra.mrb[12].mxu0 %v1059_v30 }
  0xcd   :  { %1015 = vmatmul.mubr.bf16.gmra.mrb[12].mxu1 %v1060_v31 }
 0x187   :  { %v972_v34 = vpop.f32.mrb[0].mxu0 }
 0x188   :  { %v366_v36 = vmul.f32 %v972_v34, %v1457_v32  ;;  %v1004_v37 = vpop.f32.mrb[0].mxu1  ;;  %v294_v39 = vpop.f32.mrb[1].mxu0 }
 0x189   :  { %v637_v40 = vmul.f32 %v1004_v37, %v1459_v33  ;;  %v364_v41 = vmul.f32 %v1457_v32, %v294_v39  ;;  %v565_v42 = vpop.f32.mrb[1].mxu1  ;;  %v973_v43 = vpop.f32.mrb[2].mxu0 }
 0x18a   :  { %v389_v44 = vadd.f32 %v1461_v35, %v366_v36  ;;  %v635_v45 = vmul.f32 %v1459_v33, %v565_v42  ;;  %v367_v46 = vmul.f32 %v973_v43, %v1457_v32  ;;  %v1005_v47 = vpop.f32.mrb[2].mxu1  ;;  %v297_v48 = vpop.f32.mrb[3].mxu0 }
 0x18b   :  { %v660_v49 = vadd.f32 %v1464_v38, %v637_v40  ;;  %v387_v50 = vadd.f32 %v1461_v35, %v364_v41  ;;  %v638_v51 = vmul.f32 %v1005_v47, %v1459_v33  ;;  %v365_v52 = vmul.f32 %v1457_v32, %v297_v48  ;;  %v568_v53 = vpop.f32.mrb[3].mxu1 }
 0x18c   :  { %v658_v54 = vadd.f32 %v1464_v38, %v635_v45  ;;  %v390_v55 = vadd.f32 %v1461_v35, %v367_v46  ;;  %v636_v56 = vmul.f32 %v1459_v33, %v568_v53 }
 0x18d   :  { %v676_v57 = vadd.f32 %v660_v49, %v389_v44  ;;  %v661_v58 = vadd.f32 %v1464_v38, %v638_v51  ;;  %v388_v59 = vadd.f32 %v1461_v35, %v365_v52 }
 0x18e   :  { %v674_v60 = vadd.f32 %v658_v54, %v387_v50  ;;  %v659_v61 = vadd.f32 %v1464_v38, %v636_v56 }
 0x18f   :  { %v677_v62 = vadd.f32 %v661_v58, %v390_v55  ;;  %v976_v63 = vpop.f32.mrb[4].mxu0  ;;  %v692_v0 = vmax.f32 %v676_v57, 0.0 }
 0x190   :  { %v675_v1 = vadd.f32 %v659_v61, %v388_v59  ;;  %v370_v2 = vmul.f32 %v976_v63, %v1457_v32  ;;  %v1008_v3 = vpop.f32.mrb[4].mxu1  ;;  %v310_v4 = vpop.f32.mrb[5].mxu0  ;;  %v690_v5 = vmax.f32 %v674_v60, 0.0 }
 0x191   :  { %v693_v6 = vmax.f32 %v677_v62, 0.0  ;;  %v641_v7 = vmul.f32 %v1008_v3, %v1459_v33  ;;  %v368_v8 = vmul.f32 %v1457_v32, %v310_v4  ;;  %v581_v9 = vpop.f32.mrb[5].mxu1  ;;  %v977_v10 = vpop.f32.mrb[6].mxu0 }
 0x192   :  { %v691_v11 = vmax.f32 %v675_v1, 0.0  ;;  %v393_v12 = vadd.f32 %v1461_v35, %v370_v2  ;;  %v639_v13 = vmul.f32 %v1459_v33, %v581_v9  ;;  %v371_v14 = vmul.f32 %v977_v10, %v1457_v32  ;;  %v1009_v15 = vpop.f32.mrb[6].mxu1  ;;  %v313_v16 = vpop.f32.mrb[7].mxu0 }
 0x193   :  { %v883_v17 = vpack.c.bf16 %v693_v6, %v692_v0  ;;  %v664_v18 = vadd.f32 %v1464_v38, %v641_v7  ;;  %v391_v19 = vadd.f32 %v1461_v35, %v368_v8  ;;  %v642_v20 = vmul.f32 %v1009_v15, %v1459_v33  ;;  %v584_v21 = vpop.f32.mrb[7].mxu1 }
 0x194   :  { %v878_v22 = vpack.c.bf16 %v691_v11, %v690_v5  ;;  %v662_v23 = vadd.f32 %v1464_v38, %v639_v13  ;;  %v394_v24 = vadd.f32 %v1461_v35, %v371_v14  ;;  %v369_v25 = vmul.f32 %v1457_v32, %v313_v16 }
 0x195   :  { %915 = vst [vmem:[#allocation16 + $0x8] sm:$0xff] %v883_v17   ;;  %v680_v26 = vadd.f32 %v664_v18, %v393_v12  ;;  %v665_v27 = vadd.f32 %v1464_v38, %v642_v20  ;;  %v640_v28 = vmul.f32 %v1459_v33, %v584_v21 }
 0x196   :  { %879 = vst [vmem:[#allocation16] sm:$0xff] %v878_v22   ;;  %v678_v29 = vadd.f32 %v662_v23, %v391_v19  ;;  %v392_v30 = vadd.f32 %v1461_v35, %v369_v25 }
 0x197   :  { %v681_v31 = vadd.f32 %v665_v27, %v394_v24  ;;  %v663_v34 = vadd.f32 %v1464_v38, %v640_v28  ;;  %v980_v36 = vpop.f32.mrb[8].mxu0  ;;  %v696_v37 = vmax.f32 %v680_v26, 0.0 }
 0x198   :  { %v374_v39 = vmul.f32 %v980_v36, %v1457_v32  ;;  %v1012_v40 = vpop.f32.mrb[8].mxu1  ;;  %v326_v41 = vpop.f32.mrb[9].mxu0  ;;  %v694_v48 = vmax.f32 %v678_v29, 0.0 }
 0x199   :  { %v697_v42 = vmax.f32 %v681_v31, 0.0  ;;  %v679_v43 = vadd.f32 %v663_v34, %v392_v30  ;;  %v645_v44 = vmul.f32 %v1012_v40, %v1459_v33  ;;  %v372_v45 = vmul.f32 %v1457_v32, %v326_v41  ;;  %v597_v46 = vpop.f32.mrb[9].mxu1  ;;  %v981_v47 = vpop.f32.mrb[10].mxu0 }
 0x19a   :  { %v397_v49 = vadd.f32 %v1461_v35, %v374_v39  ;;  %v643_v50 = vmul.f32 %v1459_v33, %v597_v46  ;;  %v375_v51 = vmul.f32 %v981_v47, %v1457_v32  ;;  %v1013_v52 = vpop.f32.mrb[10].mxu1  ;;  %v329_v53 = vpop.f32.mrb[11].mxu0 }
 0x19b   :  { %v893_v54 = vpack.c.bf16 %v697_v42, %v696_v37  ;;  %v695_v55 = vmax.f32 %v679_v43, 0.0  ;;  %v668_v56 = vadd.f32 %v1464_v38, %v645_v44  ;;  %v395_v57 = vadd.f32 %v1461_v35, %v372_v45  ;;  %v600_v58 = vpop.f32.mrb[11].mxu1 }
 0x19c   :  { %v666_v59 = vadd.f32 %v1464_v38, %v643_v50  ;;  %v398_v60 = vadd.f32 %v1461_v35, %v375_v51  ;;  %v646_v61 = vmul.f32 %v1013_v52, %v1459_v33  ;;  %v373_v62 = vmul.f32 %v1457_v32, %v329_v53 }
 0x19d   :  { %917 = vst [vmem:[#allocation16 + $0x18] sm:$0xff] %v893_v54   ;;  %v888_v63 = vpack.c.bf16 %v695_v55, %v694_v48  ;;  %v684_v0 = vadd.f32 %v668_v56, %v397_v49  ;;  %v644_v1 = vmul.f32 %v1459_v33, %v600_v58 }
 0x19e   :  { %v682_v2 = vadd.f32 %v666_v59, %v395_v57  ;;  %v669_v3 = vadd.f32 %v1464_v38, %v646_v61  ;;  %v396_v4 = vadd.f32 %v1461_v35, %v373_v62 }
 0x19f   :  { %916 = vst [vmem:[#allocation16 + $0x10] sm:$0xff] %v888_v63   ;;  %v667_v5 = vadd.f32 %v1464_v38, %v644_v1  ;;  %v984_v6 = vpop.f32.mrb[12].mxu0  ;;  %v700_v7 = vmax.f32 %v684_v0, 0.0 }
 0x1a0   :  { %v685_v8 = vadd.f32 %v669_v3, %v398_v60  ;;  %v378_v9 = vmul.f32 %v984_v6, %v1457_v32  ;;  %v1016_v10 = vpop.f32.mrb[12].mxu1  ;;  %v342_v11 = vpop.f32.mrb[13].mxu0  ;;  %v698_v12 = vmax.f32 %v682_v2, 0.0 }
 0x1a1   :  { %v683_v13 = vadd.f32 %v667_v5, %v396_v4  ;;  %v649_v14 = vmul.f32 %v1016_v10, %v1459_v33  ;;  %v376_v15 = vmul.f32 %v1457_v32, %v342_v11  ;;  %v613_v16 = vpop.f32.mrb[13].mxu1  ;;  %v985_v17 = vpop.f32.mrb[14].mxu0 }
 0x1a2   :  { %v701_v18 = vmax.f32 %v685_v8, 0.0  ;;  %v401_v19 = vadd.f32 %v1461_v35, %v378_v9  ;;  %v647_v20 = vmul.f32 %v1459_v33, %v613_v16  ;;  %v379_v21 = vmul.f32 %v985_v17, %v1457_v32  ;;  %v1017_v22 = vpop.f32.mrb[14].mxu1  ;;  %v345_v23 = vpop.f32.mrb[15].mxu0 }
 0x1a3   :  { %v699_v24 = vmax.f32 %v683_v13, 0.0  ;;  %v672_v25 = vadd.f32 %v1464_v38, %v649_v14  ;;  %v399_v26 = vadd.f32 %v1461_v35, %v376_v15  ;;  %v650_v27 = vmul.f32 %v1017_v22, %v1459_v33  ;;  %v616_v28 = vpop.f32.mrb[15].mxu1 }
 0x1a4   :  { %v903_v29 = vpack.c.bf16 %v701_v18, %v700_v7  ;;  %v670_v30 = vadd.f32 %v1464_v38, %v647_v20  ;;  %v402_v31 = vadd.f32 %v1461_v35, %v379_v21  ;;  %v377_v34 = vmul.f32 %v1457_v32, %v345_v23 }
 0x1a5   :  { %v898_v36 = vpack.c.bf16 %v699_v24, %v698_v12  ;;  %v688_v37 = vadd.f32 %v672_v25, %v401_v19  ;;  %v673_v39 = vadd.f32 %v1464_v38, %v650_v27  ;;  %v648_v40 = vmul.f32 %v1459_v33, %v616_v28 }
 0x1a6   :  { %919 = vst [vmem:[#allocation16 + $0x28] sm:$0xff] %v903_v29   ;;  %v686_v41 = vadd.f32 %v670_v30, %v399_v26  ;;  %v400_v42 = vadd.f32 %v1461_v35, %v377_v34 }
 0x1a7   :  { %918 = vst [vmem:[#allocation16 + $0x20] sm:$0xff] %v898_v36   ;;  %v689_v43 = vadd.f32 %v673_v39, %v402_v31  ;;  %v671_v44 = vadd.f32 %v1464_v38, %v648_v40  ;;  %v704_v45 = vmax.f32 %v688_v37, 0.0 }
 0x1a8   :  { %v702_v32 = vmax.f32 %v686_v41, 0.0 }
 0x1a9   :  { %v705_v46 = vmax.f32 %v689_v43, 0.0  ;;  %v687_v47 = vadd.f32 %v671_v44, %v400_v42 }
 0x1ab   :  { %v913_v48 = vpack.c.bf16 %v705_v46, %v704_v45  ;;  %v703_v49 = vmax.f32 %v687_v47, 0.0 }
 0x1ad   :  { %921 = vst [vmem:[#allocation16 + $0x38] sm:$0xff] %v913_v48   ;;  %v908_v50 = vpack.c.bf16 %v703_v49, %v702_v32 }
 0x1af   :  { %920 = vst [vmem:[#allocation16 + $0x30] sm:$0xff] %v908_v50  }
 0x1b0   :  { %1248 = shalt.err (!%p1245_p12)
}
 0x1b1   :  { %s1249_s16 = scalar_lea.hbm %s1552_s8, 1024 }
 0x1b2   :  { %p1250_p13 = scmp.ne.s32.totalorder %s1552_s8, %s1249_s16  ;;  %p1253_p0 = scmp.lt.u32.totalorder %s1249_s16, %s1552_s8 }
 0x1b4   :  { %p1255_p1 = pnand %p1253_p0, %p1250_p13 }
 0x1b6   :  { %1258 = shalt.err (!%p1255_p1)
}
 0x1b7   :  { %797 = dma.vmem_to_hbm [thread:$0]  %s792_s10, 1024, %s1552_s8, [#allocation4], %s1273_s17, %s1273_s17, %s1274_s18  }
 0x1b8   :  { %1269 = dma.done.wait [#allocation4], 1024  }
 0x1b9   :  { %1270 = vsyncadd [#allocation4], 4294966272 }
 0x1ba   :  { %801 = vsyncpa [#allocation3], 1 }
 0x1bb   :  { %802 = vsyncpa [#allocation6], 1 }
 0x1bc   :  { %803 = vsyncpa [#allocation9], 1 }
 0x1bd   :  { %804 = vsyncpa [#allocation12], 1 }
 0x1be   :  { %805 = vsyncpa [#allocation15], 1 }
 0x1bf   :  { %806 = vsyncpa [#allocation4], 1 }

// kernel: _lambda_.4
= control target key start
LH: loop header
LB: loop body
LE: loop exit
PB: predicated region body
PF: predicated region fallthrough
CT: control target
= control target key end

     0   :  { %9 = vsyncpa [#allocation3], 0  ;;  %s4326_s0 = inlined_call_operand.hbm [shape: bf16[2,4,160,128], index: 0, kind: input, shape index: {}]   ;;  %s4327_s1 = inlined_call_operand.hbm [shape: bf16[9,128,128], index: 1, kind: input, shape index: {}]   ;;  %s4328_s2 = inlined_call_operand.hbm [shape: f32[1,128], index: 2, kind: input, shape index: {}]   ;;  %s4329_s3 = inlined_call_operand.hbm [shape: f32[1,128], index: 3, kind: input, shape index: {}]   ;;  %s4330_s4 = inlined_call_operand.hbm [shape: bf16[2,8,8,128], index: 4, kind: output, shape index: {}]  }
   0x1   :  { %11 = vsyncpa [#allocation3 + $0x1], 0 }
   0x2   :  { %12 = vsyncpa [#allocation6], 0 }
   0x3   :  { %13 = vsyncpa [#allocation9], 0 }
   0x4   :  { %14 = vsyncpa [#allocation4], 0 }
   0x5   :  { %16 = vsyncpa [#allocation4 + $0x1], 0  ;;  %s3954_s15 = smov 0   ;;  %s3956_s16 = smov 0  }
   0x6   :  { %s3958_s17 = smov 0   ;;  %s3960_s18 = smov 0  }
   0x7 LB: > { %s3975_s19 = sadd.s32 4294967295, %s3918_s18   ;;  %s2664_s20 = sadd.s32 4294967294, %s3918_s18   ;;  %s3918_s18 = sphi %s3960_s18, %s4353_s18   ;;  %s3914_s17 = sphi %s3958_s17, %s4352_s17   ;;  %s3910_s16 = sphi %s3956_s16, %s4351_s16   ;;  %s3906_s15 = sphi %s3954_s15, %s4350_s15  }
   0x8   : > { %p42_p0 = scmp.ne.s32.totalorder %s3910_s16, %s3906_s15  ;;  %p4331_p1 = scmp.eq.s32.totalorder %s3975_s19, 0 }
   0x9   : > { %p135_p3 = scmp.eq.s32.totalorder %s2664_s20, 1  ;;  %p2665_p5 = scmp.ge.s32.totalorder %s3918_s18, 1 }
   0xa   : > { %p3984_p4 = por %p4331_p1, %p42_p0  ;;  %p142_p7 = scmp.lt.s32.totalorder %s3918_s18, 3 }
   0xb   : > { %p3989_p6 = por %p135_p3, %p42_p0  ;;  %s3920_s24 = smov [#allocation5]  }
   0xc   : > { %s4334_s21 = scalar_select %p3984_p4, 1, 0 }
   0xd   : > { %s4335_s22 = scalar_select %p3989_p6, 1, 0 }
   0xe   : > { %p3994_p8 = pnand %p2665_p5, %p142_p7  ;;  %s154_s25 = sshll.u32 %s3920_s24, 4  ;;  %s3998_s25 = int_to_ptr.vmem [resolvable:$true] %s154_s25 }
   0xf   : > { %s3921_s27 = smov [#allocation7]   ;;  %s3922_s29 = smov [#allocation8]  }
  0x10   : > { %s4336_s23 = scalar_select %p3994_p8, 1, 0 }
  0x11   : > { %p3518_p9 = pneg %p3994_p8  ;;  %s168_s28 = sshll.u32 %s3921_s27, 4  ;;  %s4009_s28 = int_to_ptr.vmem [resolvable:$true] %s168_s28 }
  0x12   : > { %s4011_s30 = sshll.u32 %s3922_s29, 4  ;;  %s3730_s7 = scalar_lea.hbm %s4327_s1, 9216  ;;  %s180_s30 = int_to_ptr.vmem [resolvable:$true] %s4011_s30 }
  0x13   : > { %p4005_p11 = pnand %p3518_p9, %p4331_p1  ;;  %p3731_p12 = scmp.ne.s32.totalorder %s4327_s1, %s3730_s7 }
  0x14   : > { %p3737_p5 = scmp.lt.u32.totalorder %s3730_s7, %s4327_s1 }
  0x15   : > { %p4021_p13 = pneg %p4005_p11 }
  0x17   : > { %p3733_p0 = pnand %p4021_p13, %p3731_p12 }
  0x19   : > { %p3734_p3 = pneg %p3733_p0 }
  0x1b   : > { %p3739_p7 = pnand %p3737_p5, %p3734_p3 }
  0x1d   : > { %3742 = shalt.err (!%p3739_p7)
}
  0x1e   : > { %s3743_s13 = scalar_lea.vmem %s3998_s25, 9216  ;;  %p3751_p2 = scmp.lt.s32.totalorder %s3998_s25, %s3998_s25 }
  0x1f   : > { %p3744_p9 = scmp.ne.s32.totalorder %s3998_s25, %s3743_s13  ;;  %p3752_p6 = scmp.lt.s32.totalorder %s3743_s13, %s3743_s13 }
  0x21   : > { %p3746_p10 = pnand %p3744_p9, %p4021_p13  ;;  %p3753_p12 = por %p3752_p6, %p3751_p2 }
  0x23   : > { %p3747_p1 = pneg %p3746_p10 }
  0x25   : > { %p3754_p0 = pnand %p3753_p12, %p3747_p1 }
  0x27   : > { %3757 = shalt.err (!%p3754_p0)
}
  0x28   : > { %s3923_s14 = smov 64   ;;  %s3924_s20 = smov 4  }
  0x29   : > { %3521 = dma.hbm_to_vmem [thread:$0]  (!%p4005_p11), %s4327_s1, 9216, %s3998_s25, [#allocation6], %s3923_s14, %s3923_s14, %s3924_s20  }
  0x2a   : > { %s3758_s6 = scalar_lea.hbm %s4328_s2, 16 }
  0x2b   : > { %p3759_p1 = scmp.ne.s32.totalorder %s4328_s2, %s3758_s6  ;;  %p3765_p10 = scmp.lt.u32.totalorder %s3758_s6, %s4328_s2 }
  0x2d   : > { %p3761_p2 = pnand %p3759_p1, %p4021_p13 }
  0x2f   : > { %p3762_p6 = pneg %p3761_p2 }
  0x31   : > { %p3767_p3 = pnand %p3765_p10, %p3762_p6 }
  0x33   : > { %3770 = shalt.err (!%p3767_p3)
}
  0x34   : > { %s3771_s25 = scalar_lea.vmem %s4009_s28, 16  ;;  %s3778_s12 = scalar_lea.vmem %s4009_s28, 32 }
  0x35   : > { %p3772_p5 = scmp.ne.s32.totalorder %s4009_s28, %s3771_s25  ;;  %p3779_p12 = scmp.lt.s32.totalorder %s4009_s28, %s4009_s28 }
  0x36   : > { %p3780_p0 = scmp.lt.s32.totalorder %s3778_s12, %s3771_s25 }
  0x37   : > { %p3774_p7 = pnand %p3772_p5, %p4021_p13 }
  0x38   : > { %p3781_p1 = por %p3780_p0, %p3779_p12 }
  0x39   : > { %p3775_p9 = pneg %p3774_p7 }
  0x3b   : > { %p3782_p2 = pnand %p3781_p1, %p3775_p9 }
  0x3d   : > { %3785 = shalt.err (!%p3782_p2)
}
  0x3e   : > { %3524 = dma.hbm_to_vmem [thread:$0]  (!%p4005_p11), %s4328_s2, 16, %s4009_s28, [#allocation6]  }
  0x3f   : > { %s3786_s5 = scalar_lea.hbm %s4329_s3, 16 }
  0x40   : > { %p3787_p6 = scmp.ne.s32.totalorder %s4329_s3, %s3786_s5  ;;  %p3793_p5 = scmp.lt.u32.totalorder %s3786_s5, %s4329_s3 }
  0x42   : > { %p3789_p10 = pnand %p3787_p6, %p4021_p13 }
  0x44   : > { %p3790_p3 = pneg %p3789_p10 }
  0x46   : > { %p3795_p7 = pnand %p3793_p5, %p3790_p3 }
  0x48   : > { %3798 = shalt.err (!%p3795_p7)
}
  0x49   : > { %s3799_s11 = scalar_lea.vmem %s180_s30, 16  ;;  %s3806_s28 = scalar_lea.vmem %s180_s30, 32 }
  0x4a   : > { %p3800_p9 = scmp.ne.s32.totalorder %s180_s30, %s3799_s11  ;;  %p3807_p1 = scmp.lt.s32.totalorder %s180_s30, %s180_s30 }
  0x4b   : > { %p3808_p2 = scmp.lt.s32.totalorder %s3806_s28, %s3799_s11 }
  0x4c   : > { %p3802_p12 = pnand %p3800_p9, %p4021_p13 }
  0x4d   : > { %p3809_p4 = por %p3808_p2, %p3807_p1 }
  0x4e   : > { %p3803_p0 = pneg %p3802_p12 }
  0x50   : > { %p3810_p8 = pnand %p3809_p4, %p3803_p0 }
  0x52   : > { %3813 = shalt.err (!%p3810_p8)
}
  0x53   : > { %3527 = dma.hbm_to_vmem [thread:$0]  (!%p4005_p11), %s4329_s3, 16, %s180_s30, [#allocation9]  }
  0x54   : > { %s4089_s10 = sadd.s32 1, %s3918_s18   ;;  %s29_s26 = sadd.s32 1, %s3914_s17 }
  0x55   : > { %s26_s13 = ssub.s32 %s3918_s18, %s4089_s10  ;;  %p36_p8 = scmp.ne.s32.totalorder %s3914_s17, %s3910_s16 }
  0x56   : > { %p27_p4 = scmp.eq.s32.totalorder %s26_s13, 0  ;;  %p37_p13 = scmp.eq.s32.totalorder %s3918_s18, 0 }
  0x57   : > { %p3539_p6 = scmp.lt.s32.totalorder %s3918_s18, 2  ;;  %p4339_p3 = scmp.eq.s32.totalorder %s3975_s19, 1 }
  0x58   : > { %s4099_s24 = scalar_select %p27_p4, %s3914_s17, %s29_s26  }
  0x59   : > { %p38_p10 = por %p37_p13, %p36_p8  ;;  %p4103_p5 = por %p4339_p3, %p36_p8 }
  0x5a   : > { %s190_s29 = sand.u32 1, %s3914_s17   ;;  %s3500_s5 = smul.u32 5120, %s3918_s18 }
  0x5b   : > { %s3499_s30 = smul.u32 320, %s190_s29  ;;  %p4109_p11 = pnand %p3539_p6, %p38_p10 }
  0x5c   : > { %s4116_s9 = scalar_lea.hbm %s4326_s0, %s3500_s5  ;;  %s4120_s25 = scalar_lea.sflag [#allocation3], %s190_s29 }
  0x5d   : > { %s194_s11 = scalar_lea.vmem [#allocation2], %s3499_s30  ;;  %s3814_s12 = scalar_lea.hbm %s4116_s9, 5120 }
  0x5e   : > { %s201_s28 = sshll.u32 %s194_s11, 4  ;;  %p3815_p7 = scmp.ne.s32.totalorder %s4116_s9, %s3814_s12  ;;  %s4118_s28 = int_to_ptr.vmem [resolvable:$true] %s201_s28 }
  0x5f   : > { %p3816_p9 = pneg %p4109_p11  ;;  %s3819_s5 = scalar_lea.hbm %s4326_s0, 10240 }
  0x60   : > { %p3820_p1 = scmp.lt.u32.totalorder %s4116_s9, %s4326_s0  ;;  %p3821_p2 = scmp.lt.u32.totalorder %s3819_s5, %s3814_s12 }
  0x61   : > { %p3817_p12 = pnand %p3816_p9, %p3815_p7  ;;  %p3823_p8 = scmp.lt.u32.totalorder %s3814_s12, %s4116_s9 }
  0x62   : > { %p3822_p4 = por %p3821_p2, %p3820_p1 }
  0x63   : > { %p3818_p0 = pneg %p3817_p12 }
  0x64   : > { %p3824_p13 = por %p3823_p8, %p3822_p4 }
  0x66   : > { %p3825_p6 = pnand %p3824_p13, %p3818_p0 }
  0x68   : > { %3828 = shalt.err (!%p3825_p6)
}
  0x69   : > { %s3829_s29 = scalar_lea.vmem %s4118_s28, 5120  ;;  %s3925_s30 = smov [#allocation2]  }
  0x6a   : > { %p3830_p10 = scmp.ne.s32.totalorder %s4118_s28, %s3829_s29  ;;  %s3834_s11 = sshll.u32 %s3925_s30, 4  ;;  %s3835_s11 = int_to_ptr.vmem [resolvable:$false] %s3834_s11 }
  0x6b   : > { %s3836_s13 = scalar_lea.vmem %s3835_s11, 10240  ;;  %p3837_p12 = scmp.lt.s32.totalorder %s4118_s28, %s3835_s11 }
  0x6c   : > { %p3832_p3 = pnand %p3830_p10, %p3816_p9  ;;  %p3838_p1 = scmp.lt.s32.totalorder %s3836_s13, %s3829_s29 }
  0x6e   : > { %p3833_p7 = pneg %p3832_p3  ;;  %p3839_p2 = por %p3838_p1, %p3837_p12 }
  0x70   : > { %p3840_p4 = pnand %p3839_p2, %p3833_p7 }
  0x72   : > { %3843 = shalt.err (!%p3840_p4)
}
  0x73   : > { %3531 = dma.hbm_to_vmem [thread:$0]  (!%p4109_p11), %s4116_s9, 5120, %s4118_s28, %s4120_s25, %s3923_s14, %s3923_s14, %s3924_s20  }
  0x74   : > { %p4342_p9 = scmp.ne.s32.totalorder %s4336_s23, 0 }
  0x75   : > { %s4154_s12 = sand.u32 (!%p4342_p9), 1, %s3910_s16   ;;  %p4343_p0 = scmp.ne.s32.totalorder (!%p4342_p9), %s4334_s21, 0 }
  0x76   : > { %213 = sbr.rel (%p4342_p9) target bundleno = 541 (0x21d), region = 36  ;;  %s216_s5 = scalar_lea.sflag (!%p4342_p9), [#allocation3], %s4154_s12 }
  0x77   : > { %s3501_s26 = smul.u32 (!%p4342_p9), 320, %s4154_s12 }
  0x79   : > { %s4158_s7 = scalar_lea.vmem (!%p4342_p9), [#allocation2], %s3501_s26 }
  0x7d   : > { %3889 = dma.done.wait (%p4343_p0), %s216_s5, 5120  }
  0x7e   : > { %3891 = vsyncadd (%p4343_p0), %s216_s5, 4294962176  ;;  %p4344_p11 = scmp.eq.s32.totalorder %s3975_s19, 0 }
  0x80   : > { %3893 = dma.done.wait (%p4344_p11), [#allocation6], 9232   ;;  %p4345_p8 = pmov %p4344_p11 }
  0x82   : > { %3895 = vsyncadd (%p4345_p8), [#allocation6], 4294958064  ;;  %p4346_p13 = pmov %p4345_p8 }
  0x83   : > { %p4347_p6 = pmov %p4345_p8 }
  0x84   : > { %3897 = dma.done.wait (%p4346_p13), [#allocation9], 16  }
  0x85   : > { %3899 = vsyncadd (%p4347_p6), [#allocation9], 4294967280  ;;  %v3583_v0 = vld [vmem:[#allocation5 + $0x40] sm:$0xff]   ;;  %v3585_v2 = vld [vmem:[#allocation5 + $0x48] sm:$0xff]   ;;  %vm770_vm0 = vsmask.f32 7424 }
  0x86   : > { %v3584_v1 = vld [vmem:[#allocation5 + $0x100] sm:$0xff]   ;;  %3079 = vmatprep.subr.bf16.mxu1 %v3583_v0  ;;  %v3586_v3 = vld [vmem:[#allocation5 + $0x108] sm:$0xff]   ;;  %v3587_v4 = vld [vmem:[#allocation5 + $0x50] sm:$0xff]   ;;  %s2675_s21 = sshll.u32 %s4154_s12, 5  ;;  %s2911_s20 = sshll.u32 %s3975_s19, 9 }
  0x87   : > { %3207 = vmatprep.subr.bf16.mxu0 %v3584_v1  ;;  %3080 = vmatpush3.bf16.msra.mxu1 %v3583_v0  ;;  %v3588_v5 = vld [vmem:[#allocation5 + $0x110] sm:$0xff]   ;;  %v3589_v6 = vld [vmem:[#allocation5 + $0x58] sm:$0xff]   ;;  %v3591_v8 = vld [vmem:[#allocation5 + $0x60] sm:$0xff]   ;;  %s255_s23 = scalar_lea.vmem [#allocation10], %s2675_s21  ;;  %s4282_s28 = scalar_lea.hbm %s4330_s4, %s2911_s20 }
  0x88   : > { %3208 = vmatpush3.bf16.msra.mxu0 %v3584_v1  ;;  %3081 = vmatprep.subr.bf16.mxu1 %v3585_v2  ;;  %v3590_v7 = vld [vmem:[#allocation5 + $0x118] sm:$0xff]   ;;  %v3592_v9 = vld [vmem:[#allocation5 + $0x120] sm:$0xff]   ;;  %v3593_v10 = vld [vmem:[#allocation5 + $0x68] sm:$0xff]   ;;  %s2562_s14 = sshll.u32 %s255_s23, 4  ;;  %s2549_s25 = scalar_lea.sflag [#allocation4], %s4154_s12  ;;  %s4277_s14 = int_to_ptr.vmem [resolvable:$true] %s2562_s14 }
  0x89   : > { %3209 = vmatprep.subr.bf16.mxu0 %v3586_v3  ;;  %v3594_v11 = vld [vmem:[#allocation5 + $0x128] sm:$0xff]   ;;  %v3599_v12 = vld [vmem:[%s4158_s7 + $0x50] sm:$0xff]   ;;  %v3597_v16 = vld [vmem:[#allocation5 + $0x78] sm:$0xff]   ;;  %s3844_s8 = scalar_lea.vmem %s4277_s14, 512  ;;  %s3926_s19 = smov [#allocation10]  }
  0x8a   : > { %v3600_v13 = vld [vmem:[%s4158_s7 + $0xf0] sm:$0xff]   ;;  %3095 = vmatprep.mubr.bf16.mxu1 %v3599_v12  ;;  %v3598_v17 = vld [vmem:[#allocation5 + $0x138] sm:$0xff]   ;;  %v3602_v19 = vld [vmem:[#allocation5] sm:$0xff]   ;;  %p3845_p10 = scmp.ne.s32.totalorder %s4277_s14, %s3844_s8  ;;  %s3848_s29 = sshll.u32 %s3926_s19, 4  ;;  %s3849_s29 = int_to_ptr.vmem [resolvable:$false] %s3848_s29 }
  0x8b   : > { %3082 = vmatpush3.bf16.msra.mxu1 %v3585_v2  ;;  %3223 = vmatprep.mubr.bf16.mxu0 %v3600_v13  ;;  %v3595_v14 = vld [vmem:[#allocation5 + $0x70] sm:$0xff]   ;;  %v3601_v18 = vld [vmem:[%s4158_s7 + $0x58] sm:$0xff]   ;;  %v3604_v20 = vld [vmem:[#allocation5 + $0x140] sm:$0xff]   ;;  %s3850_s30 = scalar_lea.vmem %s3849_s29, 1024  ;;  %p3851_p12 = scmp.lt.s32.totalorder %s4277_s14, %s3849_s29 }
  0x8c   : > { %3210 = vmatpush3.bf16.msra.mxu0 %v3586_v3  ;;  %3083 = vmatprep.subr.bf16.mxu1 %v3587_v4  ;;  %v3596_v15 = vld [vmem:[#allocation5 + $0x130] sm:$0xff]   ;;  %v3603_v21 = vld [vmem:[%s4158_s7 + $0xf8] sm:$0xff]   ;;  %v3605_v22 = vld [vmem:[#allocation5 + $0x8] sm:$0xff]   ;;  %p3846_p3 = pnand %p3845_p10, %p4103_p5  ;;  %p3852_p1 = scmp.lt.s32.totalorder %s3850_s30, %s3844_s8 }
  0x8d   : > { %3211 = vmatprep.subr.bf16.mxu0 %v3588_v5  ;;  %v3606_v23 = vld [vmem:[#allocation5 + $0x148] sm:$0xff]   ;;  %v3607_v24 = vld [vmem:[%s4158_s7 + $0x60] sm:$0xff]   ;;  %v3610_v27 = vld [vmem:[#allocation5 + $0x10] sm:$0xff]  }
  0x8e   : > { %v3608_v25 = vld [vmem:[%s4158_s7 + $0x100] sm:$0xff]   ;;  %v3609_v26 = vld [vmem:[%s4158_s7 + $0x68] sm:$0xff]   ;;  %v3612_v28 = vld [vmem:[#allocation5 + $0x150] sm:$0xff]   ;;  %p3847_p7 = pneg %p3846_p3  ;;  %p3853_p2 = por %p3852_p1, %p3851_p12 }
  0x8f   : > { %3084 = vmatpush3.bf16.msra.mxu1 %v3587_v4  ;;  %v3611_v29 = vld [vmem:[%s4158_s7 + $0x108] sm:$0xff]   ;;  %v3613_v30 = vld [vmem:[#allocation5 + $0x18] sm:$0xff]   ;;  %v3615_v32 = vld [vmem:[%s4158_s7 + $0x70] sm:$0xff]  }
  0x90   : > { %3212 = vmatpush3.bf16.msra.mxu0 %v3588_v5  ;;  %3085 = vmatprep.subr.bf16.mxu1 %v3589_v6  ;;  %v3614_v31 = vld [vmem:[#allocation5 + $0x158] sm:$0xff]   ;;  %v3616_v33 = vld [vmem:[%s4158_s7 + $0x110] sm:$0xff]   ;;  %v3618_v35 = vld [vmem:[#allocation5 + $0x20] sm:$0xff]   ;;  %p3854_p4 = pnand %p3853_p2, %p3847_p7 }
  0x91   : > { %3213 = vmatprep.subr.bf16.mxu0 %v3590_v7  ;;  %v3617_v34 = vld [vmem:[%s4158_s7 + $0x78] sm:$0xff]   ;;  %v3620_v37 = vld [vmem:[#allocation5 + $0x160] sm:$0xff]   ;;  %v3621_v38 = vld [vmem:[#allocation5 + $0x28] sm:$0xff]  }
  0x92   : > { %v3619_v36 = vld [vmem:[%s4158_s7 + $0x118] sm:$0xff]   ;;  %v3622_v39 = vld [vmem:[#allocation5 + $0x168] sm:$0xff]   ;;  %v3623_v40 = vld [vmem:[%s4158_s7 + $0x80] sm:$0xff]  }
  0x93   : > { %3086 = vmatpush3.bf16.msra.mxu1 %v3589_v6  ;;  %v3624_v41 = vld [vmem:[%s4158_s7 + $0x120] sm:$0xff]   ;;  %v3633_v43 = vld [vmem:[%s4158_s7 + $0xa8] sm:$0xff]   ;;  %v3626_v45 = vld [vmem:[#allocation5 + $0x30] sm:$0xff]  }
  0x94   : > { %3214 = vmatpush3.bf16.msra.mxu0 %v3590_v7  ;;  %3087 = vmatprep.subr.bf16.mxu1 %v3591_v8  ;;  %v3632_v42 = vld [vmem:[%s4158_s7 + $0xa0] sm:$0xff]   ;;  %v3625_v44 = vld [vmem:[%s4158_s7 + $0x88] sm:$0xff]   ;;  %v1531_v48 = vshll.u32 %v3633_v43, 16  ;;  %v3628_v50 = vld [vmem:[#allocation5 + $0x170] sm:$0xff]   ;;  %v1535_v57 = vshrl.u32 %v3633_v43, 16 }
  0x95   : > { %3215 = vmatprep.subr.bf16.mxu0 %v3592_v9  ;;  %v1524_v46 = vshrl.u32 %v3632_v42, 16  ;;  %v1526_v47 = vshll.u32 %v3632_v42, 16  ;;  %v3627_v49 = vld [vmem:[%s4158_s7 + $0x128] sm:$0xff]   ;;  %v3629_v51 = vld [vmem:[#allocation5 + $0x38] sm:$0xff]   ;;  %v3636_v54 = vld [vmem:[%s4158_s7 + $0xb0] sm:$0xff]  }
  0x96   : > { %v1533_v53 = vrot.slane %v1531_v48, 1  ;;  %v3630_v55 = vld [vmem:[#allocation5 + $0x178] sm:$0xff]   ;;  %v1539_v58 = vshll.u32 %v3636_v54, 16  ;;  %v3631_v59 = vld [vmem:[%s4158_s7] sm:$0xff]   ;;  %v1543_v62 = vshrl.u32 %v3636_v54, 16  ;;  %v3634_v0 = vld [vmem:[%s4158_s7 + $0x8] sm:$0xff]  }
  0x97   : > { %3088 = vmatpush3.bf16.msra.mxu1 %v3591_v8  ;;  %v1528_v52 = vrot.slane %v1526_v47, 1  ;;  %v3641_v61 = vld [vmem:[%s4158_s7 + $0xb8] sm:$0xff]   ;;  %v3635_v1 = vld [vmem:[#allocation5 + $0x80] sm:$0xff]   ;;  %v3638_v5 = vld [vmem:[#allocation5 + $0x88] sm:$0xff]  }
  0x98   : > { %3216 = vmatpush3.bf16.msra.mxu0 %v3592_v9  ;;  %3089 = vmatprep.subr.bf16.mxu1 %v3593_v10  ;;  %v1537_v63 = vor.u32 %v1535_v57, %v1533_v53  ;;  %v1541_v2 = vrot.slane %v1539_v58, 1  ;;  %v3637_v3 = vld [vmem:[#allocation5 + $0x180] sm:$0xff]   ;;  %v1547_v4 = vshll.u32 %v3641_v61, 16  ;;  %v3639_v7 = vld [vmem:[#allocation5 + $0x188] sm:$0xff]   ;;  %v3640_v13 = vld [vmem:[%s4158_s7 + $0x10] sm:$0xff]  }
  0x99   : > { %3217 = vmatprep.subr.bf16.mxu0 %v3594_v11  ;;  %v1529_v56 = vor.u32 %v1528_v52, %v1524_v46  ;;  %v3644_v6 = vld [vmem:[%s4158_s7 + $0xc0] sm:$0xff]   ;;  %v3655_v43 = vld [vmem:[#allocation5 + $0x1a8] sm:$0xff]   ;;  %v3658_v54 = vld [vmem:[%s4158_s7 + $0x38] sm:$0xff]  }
  0x9a   : > { %v1545_v8 = vor.u32 %v1543_v62, %v1541_v2  ;;  %v1549_v9 = vrot.slane %v1547_v4, 1  ;;  %v1555_v12 = vshll.u32 %v3644_v6, 16  ;;  %v3660_v42 = vld [vmem:[%s4158_s7 + $0xe0] ss:$0 sps:$4 sm:$0x11]  }
  0x9b   : > { %3090 = vmatpush3.bf16.msra.mxu1 %v3593_v10  ;;  %v1534_v60 = vsel %vm770_vm0, %v1529_v56, %v1533_v53  ;;  %v1542_v10 = vsel %vm770_vm0, %v1537_v63, %v1541_v2  ;;  %v1587_v48 = vshll.u32 %v3660_v42, 16  ;;  %v3665_v53 = vld [vmem:[%s4158_s7 + $0x8] sm:$0xff]  }
  0x9c   : > { %3218 = vmatpush3.bf16.msra.mxu0 %v3594_v11  ;;  %3091 = vmatprep.subr.bf16.mxu1 %v3595_v14  ;;  %v1551_v11 = vshrl.u32 %v3641_v61, 16  ;;  %v779_v61 = vshll.u32 %v3665_v53, 16  ;;  %v783_v63 = vshrl.u32 %v3665_v53, 16 }
  0x9d   : > { %3219 = vmatprep.subr.bf16.mxu0 %v3596_v15  ;;  %v1589_v56 = vrot.slane %v1587_v48, 1  ;;  %v3689_v48 = vld [vmem:[%s4158_s7 + $0x38] sm:$0xff]  }
  0x9e   : > { %v827_v53 = vshll.u32 %v3689_v48, 16 }
  0x9f   : > { %3092 = vmatpush3.bf16.msra.mxu1 %v3595_v14  ;;  %v1550_v14 = vsel %vm770_vm0, %v1545_v8, %v1549_v9 }
  0xa0   : > { %3220 = vmatpush3.bf16.msra.mxu0 %v3596_v15  ;;  %3093 = vmatprep.subr.bf16.mxu1 %v3597_v16  ;;  %v3649_v15 = vld [vmem:[%s4158_s7 + $0xc8] sm:$0xff]  }
  0xa1   : > { %3221 = vmatprep.subr.bf16.mxu0 %v3598_v17 }
  0xa3   : > { %3094 = vmatpush3.bf16.msra.mxu1 %v3597_v16  ;;  %v1559_v16 = vshrl.u32 %v3644_v6, 16 }
  0xa4   : > { %3222 = vmatpush3.bf16.msra.mxu0 %v3598_v17  ;;  %3111 = vmatprep.subr.bf16.mxu1 %v3602_v19  ;;  %v3642_v17 = vld [vmem:[%s4158_s7 + $0x18] sm:$0xff]  }
  0xa5   : > { %3239 = vmatprep.subr.bf16.mxu0 %v3604_v20 }
  0xa6   : > { %3096 = vmatmul.mubr.bf16.vlgmr.msra.gmra.mrb[0].mxu1 %v3601_v18  ;;  %v3643_v18 = vld [vmem:[#allocation5 + $0x90] sm:$0xff]  }
  0xa7   : > { %3224 = vmatmul.mubr.bf16.vlgmr.msra.gmra.mrb[0].mxu0 %v3603_v21  ;;  %3112 = vmatpush3.bf16.msra.mxu1 %v3602_v19  ;;  %v1553_v19 = vor.u32 %v1551_v11, %v1549_v9  ;;  %v3645_v21 = vld [vmem:[#allocation5 + $0x190] sm:$0xff]   ;;  %v3668_v11 = vld [vmem:[#allocation5 + $0xc0] sm:$0xff]  }
  0xa8   : > { %3240 = vmatpush3.bf16.msra.mxu0 %v3604_v20  ;;  %3113 = vmatprep.subr.bf16.mxu1 %v3605_v22  ;;  %v1557_v20 = vrot.slane %v1555_v12, 1  ;;  %v3673_v12 = vld [vmem:[%s4158_s7 + $0x18] sm:$0xff]  }
  0xa9   : > { %3241 = vmatprep.subr.bf16.mxu0 %v3606_v23  ;;  %3099 = vmatprep.mubr.bf16.mxu1 %v3607_v24  ;;  %v3652_v24 = vld [vmem:[%s4158_s7 + $0xd0] sm:$0xff]  }
  0xaa   : > { %3227 = vmatprep.mubr.bf16.mxu0 %v3608_v25  ;;  %v3647_v25 = vld [vmem:[#allocation5 + $0x198] sm:$0xff]  }
  0xab   : > { %3114 = vmatpush3.bf16.msra.mxu1 %v3605_v22  ;;  %v1563_v22 = vshll.u32 %v3649_v15, 16 }
  0xac   : > { %3242 = vmatpush3.bf16.msra.mxu0 %v3606_v23  ;;  %3115 = vmatprep.subr.bf16.mxu1 %v3610_v27  ;;  %v3646_v23 = vld [vmem:[#allocation5 + $0x98] sm:$0xff]  }
  0xad   : > { %3243 = vmatprep.subr.bf16.mxu0 %v3612_v28 }
  0xae   : > { %3100 = vmatmul.mubr.bf16.gmra.mrb[4].mxu1 %v3609_v26  ;;  %v1561_v26 = vor.u32 %v1559_v16, %v1557_v20 }
  0xaf   : > { %3228 = vmatmul.mubr.bf16.gmra.mrb[4].mxu0 %v3611_v29  ;;  %3116 = vmatpush3.bf16.msra.mxu1 %v3610_v27  ;;  %v1565_v27 = vrot.slane %v1563_v22, 1  ;;  %v1567_v29 = vshrl.u32 %v3649_v15, 16  ;;  %v3671_v15 = vld [vmem:[#allocation5 + $0xc8] sm:$0xff]  }
  0xb0   : > { %3244 = vmatpush3.bf16.msra.mxu0 %v3612_v28  ;;  %3117 = vmatprep.subr.bf16.mxu1 %v3613_v30  ;;  %v1558_v28 = vsel %vm770_vm0, %v1553_v19, %v1557_v20  ;;  %v799_v19 = vshrl.u32 %v3673_v12, 16 }
  0xb1   : > { %3245 = vmatprep.subr.bf16.mxu0 %v3614_v31  ;;  %3103 = vmatprep.mubr.bf16.mxu1 %v3615_v32  ;;  %v1566_v32 = vsel %vm770_vm0, %v1561_v26, %v1565_v27  ;;  %v3676_v26 = vld [vmem:[#allocation5 + $0xd0] sm:$0xff]  }
  0xb2   : > { %3231 = vmatprep.mubr.bf16.mxu0 %v3616_v33  ;;  %v3657_v33 = vld [vmem:[%s4158_s7 + $0xd8] sm:$0xff]  }
  0xb3   : > { %3118 = vmatpush3.bf16.msra.mxu1 %v3613_v30  ;;  %v1571_v30 = vshll.u32 %v3652_v24, 16  ;;  %v1583_v47 = vshrl.u32 %v3657_v33, 16 }
  0xb4   : > { %3246 = vmatpush3.bf16.msra.mxu0 %v3614_v31  ;;  %3119 = vmatprep.subr.bf16.mxu1 %v3618_v35  ;;  %v3648_v31 = vld [vmem:[%s4158_s7 + $0x20] sm:$0xff]  }
  0xb5   : > { %3247 = vmatprep.subr.bf16.mxu0 %v3620_v37 }
  0xb6   : > { %3104 = vmatmul.mubr.bf16.gmra.mrb[8].mxu1 %v3617_v34  ;;  %v1575_v34 = vshrl.u32 %v3652_v24, 16 }
  0xb7   : > { %3232 = vmatmul.mubr.bf16.gmra.mrb[8].mxu0 %v3619_v36  ;;  %3120 = vmatpush3.bf16.msra.mxu1 %v3618_v35  ;;  %v3650_v35 = vld [vmem:[%s4158_s7 + $0x28] sm:$0xff]   ;;  %v3651_v36 = vld [vmem:[#allocation5 + $0xa0] sm:$0xff]  }
  0xb8   : > { %3248 = vmatpush3.bf16.msra.mxu0 %v3620_v37  ;;  %3121 = vmatprep.subr.bf16.mxu1 %v3621_v38  ;;  %v1569_v37 = vor.u32 %v1567_v29, %v1565_v27 }
  0xb9   : > { %3249 = vmatprep.subr.bf16.mxu0 %v3622_v39  ;;  %3107 = vmatprep.mubr.bf16.mxu1 %v3623_v40  ;;  %v1579_v40 = vshll.u32 %v3657_v33, 16  ;;  %v3679_v33 = vld [vmem:[#allocation5 + $0xd8] sm:$0xff]  }
  0xba   : > { %3235 = vmatprep.mubr.bf16.mxu0 %v3624_v41  ;;  %v3654_v41 = vld [vmem:[#allocation5 + $0xa8] sm:$0xff]  }
  0xbb   : > { %3122 = vmatpush3.bf16.msra.mxu1 %v3621_v38  ;;  %v1573_v38 = vrot.slane %v1571_v30, 1  ;;  %v3681_v30 = vld [vmem:[%s4158_s7 + $0x28] sm:$0xff]  }
  0xbc   : > { %3250 = vmatpush3.bf16.msra.mxu0 %v3622_v39  ;;  %3123 = vmatprep.subr.bf16.mxu1 %v3626_v45  ;;  %v3653_v39 = vld [vmem:[#allocation5 + $0x1a0] sm:$0xff]  }
  0xbd   : > { %3251 = vmatprep.subr.bf16.mxu0 %v3628_v50  ;;  %v1574_v46 = vsel %vm770_vm0, %v1569_v37, %v1573_v38  ;;  %v815_v37 = vshrl.u32 %v3681_v30, 16 }
  0xbe   : > { %3108 = vmatmul.mubr.bf16.gmra.mrb[12].mxu1 %v3625_v44  ;;  %v1577_v44 = vor.u32 %v1575_v34, %v1573_v38 }
  0xbf   : > { %3236 = vmatmul.mubr.bf16.gmra.mrb[12].mxu0 %v3627_v49  ;;  %3124 = vmatpush3.bf16.msra.mxu1 %v3626_v45  ;;  %v1581_v45 = vrot.slane %v1579_v40, 1  ;;  %v3656_v49 = vld [vmem:[%s4158_s7 + $0x30] sm:$0xff]  }
  0xc0   : > { %3252 = vmatpush3.bf16.msra.mxu0 %v3628_v50  ;;  %3125 = vmatprep.subr.bf16.mxu1 %v3629_v51  ;;  %v3659_v50 = vld [vmem:[#allocation5 + $0xb0] sm:$0xff]  }
  0xc1   : > { %3253 = vmatprep.subr.bf16.mxu0 %v3630_v55  ;;  %3127 = vmatprep.mubr.bf16.mxu1 %v3631_v59  ;;  %v1582_v52 = vsel %vm770_vm0, %v1577_v44, %v1581_v45  ;;  %v3667_v59 = vld [vmem:[%s4158_s7 + $0x10] sm:$0xff]   ;;  %v3684_v44 = vld [vmem:[#allocation5 + $0xe0] sm:$0xff]  }
  0xc2   : > { %3255 = vmatprep.mubr.bf16.mxu0 %v1534_v60  ;;  %v3661_v60 = vld [vmem:[#allocation5 + $0x1b0] sm:$0xff]   ;;  %v791_v8 = vshrl.u32 %v3667_v59, 16 }
  0xc3   : > { %3126 = vmatpush3.bf16.msra.mxu1 %v3629_v51  ;;  %v3664_v51 = vld [vmem:[%s4158_s7] sm:$0xff]  }
  0xc4   : > { %3254 = vmatpush3.bf16.msra.mxu0 %v3630_v55  ;;  %3143 = vmatprep.subr.bf16.mxu1 %v3635_v1  ;;  %v1585_v55 = vor.u32 %v1583_v47, %v1581_v45  ;;  %v772_v57 = vshrl.u32 %v3664_v51, 16  ;;  %v774_v58 = vshll.u32 %v3664_v51, 16  ;;  %v3685_v51 = vld [vmem:[%s4158_s7 + $0x30] sm:$0xff]  }
  0xc5   : > { %3271 = vmatprep.subr.bf16.mxu0 %v3637_v3 }
  0xc6   : > { %3128 = vmatmul.mubr.bf16.vlgmr.msra.gmra.mrb[0].mxu1 %v3634_v0  ;;  %v776_v62 = vrot.slane %v774_v58, 1  ;;  %v781_v0 = vrot.slane %v779_v61, 1  ;;  %v1590_v2 = vsel %vm770_vm0, %v1585_v55, %v1589_v56  ;;  %v831_v55 = vshrl.u32 %v3689_v48, 16  ;;  %v3690_v61 = vld [vmem:[%s4158_s7 + $0x38] sm:$0xff]  }
  0xc7   : > { %3256 = vmatmul.mubr.bf16.vlgmr.msra.gmra.mrb[0].mxu0 %v1542_v10  ;;  %3144 = vmatpush3.bf16.msra.mxu1 %v3635_v1  ;;  %v787_v1 = vshll.u32 %v3667_v59, 16  ;;  %v829_v58 = vrot.slane %v827_v53, 1  ;;  %v3688_v59 = vld [vmem:[#allocation5 + $0x1e8] sm:$0xff]  }
  0xc8   : > { %3272 = vmatpush3.bf16.msra.mxu0 %v3637_v3  ;;  %3145 = vmatprep.subr.bf16.mxu1 %v3638_v5  ;;  %v3662_v3 = vld [vmem:[#allocation5 + $0xb8] sm:$0xff]   ;;  %v777_v4 = vor.u32 %v776_v62, %v772_v57  ;;  %v785_v9 = vor.u32 %v783_v63, %v781_v0  ;;  %v3687_v57 = vld [vmem:[#allocation5 + $0xe8] sm:$0xff]  }
  0xc9   : > { %3273 = vmatprep.subr.bf16.mxu0 %v3639_v7  ;;  %3131 = vmatprep.mubr.bf16.mxu1 %v3640_v13  ;;  %v789_v10 = vrot.slane %v787_v1, 1  ;;  %v3669_v13 = vld [vmem:[%s4158_s7 + $0x10] sm:$0xff]   ;;  %v833_v62 = vor.u32 %v831_v55, %v829_v58 }
  0xca   : > { %3259 = vmatprep.mubr.bf16.mxu0 %v1550_v14  ;;  %v782_v6 = vsel %vm770_vm0, %v777_v4, %v781_v0  ;;  %v3670_v14 = vld [vmem:[#allocation5 + $0x1c0] sm:$0xff]   ;;  %v3692_v0 = vld [vmem:[#allocation5 + $0xf0] sm:$0xff]   ;;  %v3695_v4 = vld [vmem:[#allocation5 + $0xf8] sm:$0xff]  }
  0xcb   : > { %3146 = vmatpush3.bf16.msra.mxu1 %v3638_v5  ;;  %v3663_v5 = vld [vmem:[#allocation5 + $0x1b8] sm:$0xff]   ;;  %v793_v16 = vor.u32 %v791_v8, %v789_v10  ;;  %v790_v20 = vsel %vm770_vm0, %v785_v9, %v789_v10  ;;  %v3694_v1 = vld [vmem:[#allocation5 + $0x1f0] sm:$0xff]   ;;  %v3701_v8 = vld [vmem:[#allocation5 + $0x200] sm:$0xff]  }
  0xcc   : > { %3274 = vmatpush3.bf16.msra.mxu0 %v3639_v7  ;;  %3147 = vmatprep.subr.bf16.mxu1 %v3643_v18  ;;  %v3666_v7 = vld [vmem:[%s4158_s7 + $0x8] sm:$0xff]   ;;  %v3700_v10 = vld [vmem:[%s4158_s7 + $0x60] sm:$0xff]  }
  0xcd   : > { %3275 = vmatprep.subr.bf16.mxu0 %v3645_v21  ;;  %v3699_v9 = vld [vmem:[%s4158_s7 + $0xa8] sm:$0xff]  }
  0xce   : > { %3132 = vmatmul.mubr.bf16.gmra.mrb[4].mxu1 %v3642_v17  ;;  %v795_v17 = vshll.u32 %v3673_v12, 16  ;;  %v3703_v12 = vld [vmem:[%s4158_s7 + $0xb0] sm:$0xff]  }
  0xcf   : > { %3260 = vmatmul.mubr.bf16.gmra.mrb[4].mxu0 %v1558_v28  ;;  %3148 = vmatpush3.bf16.msra.mxu1 %v3643_v18  ;;  %v3675_v18 = vld [vmem:[%s4158_s7 + $0x20] sm:$0xff]  }
  0xd0   : > { %3276 = vmatpush3.bf16.msra.mxu0 %v3645_v21  ;;  %3149 = vmatprep.subr.bf16.mxu1 %v3646_v23  ;;  %v3672_v21 = vld [vmem:[#allocation5 + $0x1c8] sm:$0xff]   ;;  %v797_v22 = vrot.slane %v795_v17, 1  ;;  %v803_v24 = vshll.u32 %v3675_v18, 16  ;;  %v807_v29 = vshrl.u32 %v3675_v18, 16  ;;  %v3708_v17 = vld [vmem:[#allocation5 + $0x218] sm:$0xff]   ;;  %v3709_v18 = vld [vmem:[%s4158_s7 + $0xc0] sm:$0xff]  }
  0xd1   : > { %3277 = vmatprep.subr.bf16.mxu0 %v3647_v25  ;;  %3135 = vmatprep.mubr.bf16.mxu1 %v3648_v31  ;;  %v3677_v31 = vld [vmem:[%s4158_s7 + $0x20] sm:$0xff]  }
  0xd2   : > { %3263 = vmatprep.mubr.bf16.mxu0 %v1566_v32  ;;  %v801_v27 = vor.u32 %v799_v19, %v797_v22  ;;  %v805_v28 = vrot.slane %v803_v24, 1  ;;  %v3678_v32 = vld [vmem:[#allocation5 + $0x1d0] sm:$0xff]   ;;  %v3710_v19 = vld [vmem:[%s4158_s7 + $0x78] sm:$0xff]  }
  0xd3   : > { %3150 = vmatpush3.bf16.msra.mxu1 %v3646_v23  ;;  %v3674_v23 = vld [vmem:[%s4158_s7 + $0x18] sm:$0xff]   ;;  %v3722_v24 = vld [vmem:[%s4158_s7 + $0x10] sm:$0xff]  }
  0xd4   : > { %3278 = vmatpush3.bf16.msra.mxu0 %v3647_v25  ;;  %3151 = vmatprep.subr.bf16.mxu1 %v3651_v36  ;;  %v798_v25 = vsel %vm770_vm0, %v793_v16, %v797_v22  ;;  %v809_v34 = vor.u32 %v807_v29, %v805_v28  ;;  %v806_v38 = vsel %vm770_vm0, %v801_v27, %v805_v28  ;;  %v3706_v16 = vld [vmem:[%s4158_s7 + $0x70] sm:$0xff]   ;;  %v3721_v22 = vld [vmem:[%s4158_s7 + $0x8] sm:$0xff]   ;;  %v2285_v53 = vshrl.u32 %v3722_v24, 16 }
  0xd5   : > { %3279 = vmatprep.subr.bf16.mxu0 %v3653_v39  ;;  %v3724_v27 = vld [vmem:[%s4158_s7 + $0x30] sm:$0xff]   ;;  %v3714_v28 = vld [vmem:[#allocation5 + $0x228] sm:$0xff]  }
  0xd6   : > { %3136 = vmatmul.mubr.bf16.gmra.mrb[8].mxu1 %v3650_v35  ;;  %v811_v35 = vshll.u32 %v3681_v30, 16  ;;  %v3715_v29 = vld [vmem:[%s4158_s7 + $0xd0] sm:$0xff]   ;;  %v3716_v30 = vld [vmem:[%s4158_s7 + $0x88] sm:$0xff]  }
  0xd7   : > { %3264 = vmatmul.mubr.bf16.gmra.mrb[8].mxu0 %v1574_v46  ;;  %3152 = vmatpush3.bf16.msra.mxu1 %v3651_v36  ;;  %v3683_v36 = vld [vmem:[%s4158_s7 + $0x30] sm:$0xff]  }
  0xd8   : > { %3280 = vmatpush3.bf16.msra.mxu0 %v3653_v39  ;;  %3153 = vmatprep.subr.bf16.mxu1 %v3654_v41  ;;  %v3680_v39 = vld [vmem:[#allocation5 + $0x1d8] sm:$0xff]   ;;  %v813_v40 = vrot.slane %v811_v35, 1  ;;  %v819_v42 = vshll.u32 %v3683_v36, 16  ;;  %v823_v47 = vshrl.u32 %v3683_v36, 16 }
  0xd9   : > { %3281 = vmatprep.subr.bf16.mxu0 %v3655_v43  ;;  %3139 = vmatprep.mubr.bf16.mxu1 %v3656_v49  ;;  %v3686_v49 = vld [vmem:[#allocation5 + $0x1e0] sm:$0xff]   ;;  %v3726_v35 = vld [vmem:[%s4158_s7 + $0x38] sm:$0xff]  }
  0xda   : > { %3267 = vmatprep.mubr.bf16.mxu0 %v1582_v52  ;;  %v817_v45 = vor.u32 %v815_v37, %v813_v40  ;;  %v821_v46 = vrot.slane %v819_v42, 1  ;;  %v3727_v42 = vld [vmem:[%s4158_s7 + $0x20] sm:$0xff]  }
  0xdb   : > { %3154 = vmatpush3.bf16.msra.mxu1 %v3654_v41  ;;  %v3682_v41 = vld [vmem:[%s4158_s7 + $0x28] sm:$0xff]  }
  0xdc   : > { %3282 = vmatpush3.bf16.msra.mxu0 %v3655_v43  ;;  %3155 = vmatprep.subr.bf16.mxu1 %v3659_v50  ;;  %v814_v43 = vsel %vm770_vm0, %v809_v34, %v813_v40  ;;  %v825_v52 = vor.u32 %v823_v47, %v821_v46  ;;  %v2281_v34 = vshll.u32 %v3722_v24, 16  ;;  %v3719_v40 = vld [vmem:[#allocation5 + $0x230] sm:$0xff]  }
  0xdd   : > { %3283 = vmatprep.subr.bf16.mxu0 %v3661_v60  ;;  %v3718_v47 = vld [vmem:[%s4158_s7 + $0x90] sm:$0xff]  }
  0xde   : > { %3140 = vmatmul.mubr.bf16.gmra.mrb[12].mxu1 %v3658_v54  ;;  %v822_v54 = vsel %vm770_vm0, %v817_v45, %v821_v46  ;;  %v2283_v45 = vrot.slane %v2281_v34, 1  ;;  %v2321_v46 = vshll.u32 %v3726_v35, 16 }
  0xdf   : > { %3268 = vmatmul.mubr.bf16.gmra.mrb[12].mxu0 %v1590_v2  ;;  %3156 = vmatpush3.bf16.msra.mxu1 %v3659_v50  ;;  %v3691_v50 = vld [vmem:[%s4158_s7 + $0x40] ss:$0 sps:$4 sm:$0x11]  }
  0xe0   : > { %3284 = vmatpush3.bf16.msra.mxu0 %v3661_v60  ;;  %3157 = vmatprep.subr.bf16.mxu1 %v3662_v3  ;;  %v835_v56 = vshll.u32 %v3691_v50, 16  ;;  %v830_v60 = vsel %vm770_vm0, %v825_v52, %v829_v58  ;;  %v3693_v2 = vld [vmem:[%s4158_s7 + $0x40] sm:$0xff]   ;;  %v2317_v50 = vshrl.u32 %v3724_v27, 16  ;;  %v3720_v52 = vld [vmem:[#allocation5 + $0x238] sm:$0xff]  }
  0xe1   : > { %3285 = vmatprep.subr.bf16.mxu0 %v3663_v5  ;;  %3159 = vmatprep.mubr.bf16.mxu1 %v782_v6  ;;  %v3697_v6 = vld [vmem:[%s4158_s7 + $0xa0] sm:$0xff]  }
  0xe2   : > { %3287 = vmatprep.mubr.bf16.mxu0 %v3666_v7  ;;  %v837_v63 = vrot.slane %v835_v56, 1  ;;  %v3698_v7 = vld [vmem:[%s4158_s7 + $0x58] sm:$0xff]  }
  0xe3   : > { %3158 = vmatpush3.bf16.msra.mxu1 %v3662_v3 }
  0xe4   : > { %3286 = vmatpush3.bf16.msra.mxu0 %v3663_v5  ;;  %3175 = vmatprep.subr.bf16.mxu1 %v3668_v11  ;;  %v838_v3 = vsel %vm770_vm0, %v833_v62, %v837_v63  ;;  %v3696_v5 = vld [vmem:[#allocation5 + $0x1f8] sm:$0xff]   ;;  %v3729_v63 = vld [vmem:[%s4158_s7 + $0x48] ss:$0 sps:$4 sm:$0x11]  }
  0xe5   : > { %3303 = vmatprep.subr.bf16.mxu0 %v3670_v14 }
  0xe6   : > { %3160 = vmatmul.mubr.bf16.vlgmr.msra.gmra.mrb[0].mxu1 %v790_v20  ;;  %v3713_v20 = vld [vmem:[#allocation5 + $0x220] sm:$0xff]  }
  0xe7   : > { %3288 = vmatmul.mubr.bf16.vlgmr.msra.gmra.mrb[0].mxu0 %v3669_v13  ;;  %3176 = vmatpush3.bf16.msra.mxu1 %v3668_v11  ;;  %v3702_v11 = vld [vmem:[#allocation5 + $0x208] sm:$0xff]  }
  0xe8   : > { %3304 = vmatpush3.bf16.msra.mxu0 %v3670_v14  ;;  %3177 = vmatprep.subr.bf16.mxu1 %v3671_v15  ;;  %v3704_v13 = vld [vmem:[%s4158_s7 + $0x68] sm:$0xff]   ;;  %v3707_v14 = vld [vmem:[#allocation5 + $0x210] sm:$0xff]  }
  0xe9   : > { %3305 = vmatprep.subr.bf16.mxu0 %v3672_v21  ;;  %3163 = vmatprep.mubr.bf16.mxu1 %v798_v25  ;;  %v2276_v25 = vshll.u32 %v3721_v22, 16 }
  0xea   : > { %3291 = vmatprep.mubr.bf16.mxu0 %v3674_v23  ;;  %v3712_v23 = vld [vmem:[%s4158_s7 + $0x80] sm:$0xff]  }
  0xeb   : > { %3178 = vmatpush3.bf16.msra.mxu1 %v3671_v15  ;;  %v3705_v15 = vld [vmem:[%s4158_s7 + $0xb8] sm:$0xff]  }
  0xec   : > { %3306 = vmatpush3.bf16.msra.mxu0 %v3672_v21  ;;  %3179 = vmatprep.subr.bf16.mxu1 %v3676_v26  ;;  %v3711_v21 = vld [vmem:[%s4158_s7 + $0xc8] sm:$0xff]  }
  0xed   : > { %3307 = vmatprep.subr.bf16.mxu0 %v3678_v32 }
  0xee   : > { %3164 = vmatmul.mubr.bf16.gmra.mrb[4].mxu1 %v806_v38  ;;  %v2313_v38 = vshll.u32 %v3724_v27, 16 }
  0xef   : > { %3292 = vmatmul.mubr.bf16.gmra.mrb[4].mxu0 %v3677_v31  ;;  %3180 = vmatpush3.bf16.msra.mxu1 %v3676_v26  ;;  %v3723_v26 = vld [vmem:[%s4158_s7 + $0x28] sm:$0xff]  }
  0xf0   : > { %3308 = vmatpush3.bf16.msra.mxu0 %v3678_v32  ;;  %3181 = vmatprep.subr.bf16.mxu1 %v3679_v33  ;;  %v2305_v31 = vshll.u32 %v3723_v26, 16  ;;  %v2274_v32 = vshrl.u32 %v3721_v22, 16  ;;  %v2309_v37 = vshrl.u32 %v3723_v26, 16 }
  0xf1   : > { %3309 = vmatprep.subr.bf16.mxu0 %v3680_v39  ;;  %3167 = vmatprep.mubr.bf16.mxu1 %v814_v43  ;;  %v3717_v43 = vld [vmem:[%s4158_s7 + $0xd8] sm:$0xff]  }
  0xf2   : > { %3295 = vmatprep.mubr.bf16.mxu0 %v3682_v41  ;;  %v4257_v36 = vrot.slane %v2305_v31, 1  ;;  %v3728_v41 = vld [vmem:[%s4158_s7 + $0x40] sm:$0xff]  }
  0xf3   : > { %3182 = vmatpush3.bf16.msra.mxu1 %v3679_v33  ;;  %v2278_v33 = vrot.slane %v2276_v25, 1  ;;  %v2329_v55 = vshll.u32 %v3728_v41, 16 }
  0xf4   : > { %3310 = vmatpush3.bf16.msra.mxu0 %v3680_v39  ;;  %3183 = vmatprep.subr.bf16.mxu1 %v3684_v44  ;;  %v3725_v39 = vld [vmem:[%s4158_s7 + $0x18] sm:$0xff]   ;;  %v2311_v48 = vor.u32 %v2309_v37, %v4257_v36 }
  0xf5   : > { %3311 = vmatprep.subr.bf16.mxu0 %v3686_v49  ;;  %v2293_v56 = vshrl.u32 %v3725_v39, 16 }
  0xf6   : > { %3168 = vmatmul.mubr.bf16.gmra.mrb[8].mxu1 %v822_v54  ;;  %v2325_v54 = vshrl.u32 %v3726_v35, 16 }
  0xf7   : > { %3296 = vmatmul.mubr.bf16.gmra.mrb[8].mxu0 %v3685_v51  ;;  %3184 = vmatpush3.bf16.msra.mxu1 %v3684_v44  ;;  %v2279_v44 = vor.u32 %v2278_v33, %v2274_v32  ;;  %v2289_v51 = vshll.u32 %v3725_v39, 16 }
  0xf8   : > { %3312 = vmatpush3.bf16.msra.mxu0 %v3686_v49  ;;  %3185 = vmatprep.subr.bf16.mxu1 %v3687_v57  ;;  %v2315_v49 = vrot.slane %v2313_v38, 1 }
  0xf9   : > { %3313 = vmatprep.subr.bf16.mxu0 %v3688_v59  ;;  %3171 = vmatprep.mubr.bf16.mxu1 %v830_v60  ;;  %v2284_v58 = vsel %vm770_vm0, %v2279_v44, %v2283_v45  ;;  %v2291_v62 = vrot.slane %v2289_v51, 1  ;;  %v2905_v51 = vld [vmem:[#allocation8] ss:$0 sm:$0xff] }
  0xfa   : > { %3299 = vmatprep.mubr.bf16.mxu0 %v3690_v61  ;;  %v2316_v60 = vsel %vm770_vm0, %v2311_v48, %v2315_v49  ;;  %v2319_v61 = vor.u32 %v2317_v50, %v2315_v49 }
  0xfb   : > { %3186 = vmatpush3.bf16.msra.mxu1 %v3687_v57  ;;  %v2297_v57 = vshll.u32 %v3727_v42, 16 }
  0xfc   : > { %3314 = vmatpush3.bf16.msra.mxu0 %v3688_v59  ;;  %3187 = vmatprep.subr.bf16.mxu1 %v3692_v0  ;;  %v2323_v59 = vrot.slane %v2321_v46, 1 }
  0xfd   : > { %3315 = vmatprep.subr.bf16.mxu0 %v3694_v1 }
  0xfe   : > { %3172 = vmatmul.mubr.bf16.gmra.mrb[12].mxu1 %v838_v3  ;;  %v2295_v3 = vor.u32 %v2293_v56, %v2291_v62 }
  0xff   : > { %3300 = vmatmul.mubr.bf16.gmra.mrb[12].mxu0 %v3693_v2  ;;  %3188 = vmatpush3.bf16.msra.mxu1 %v3692_v0  ;;  %v2287_v0 = vor.u32 %v2285_v53, %v2283_v45  ;;  %v2331_v2 = vrot.slane %v2329_v55, 1  ;;  %v2904_v45 = vld [vmem:[#allocation7] ss:$0 sm:$0xff] }
 0x100   : > { %3316 = vmatpush3.bf16.msra.mxu0 %v3694_v1  ;;  %3189 = vmatprep.subr.bf16.mxu1 %v3695_v4  ;;  %v2327_v1 = vor.u32 %v2325_v54, %v2323_v59 }
 0x101   : > { %3317 = vmatprep.subr.bf16.mxu0 %v3696_v5  ;;  %3191 = vmatprep.mubr.bf16.mxu1 %v3697_v6  ;;  %v2333_v6 = vshrl.u32 %v3728_v41, 16 }
 0x102   : > { %3319 = vmatprep.mubr.bf16.mxu0 %v3698_v7  ;;  %v2337_v7 = vshll.u32 %v3729_v63, 16 }
 0x103   : > { %3190 = vmatpush3.bf16.msra.mxu1 %v3695_v4  ;;  %v2299_v4 = vrot.slane %v2297_v57, 1 }
 0x104   : > { %3318 = vmatpush3.bf16.msra.mxu0 %v3696_v5  ;;  %3367 = vmatprep.subr.bf16.mxu1 %v3701_v8  ;;  %v2324_v5 = vsel %vm770_vm0, %v2319_v61, %v2323_v59 }
 0x105   : > { %3335 = vmatprep.subr.bf16.mxu0 %v3701_v8 }
 0x106   : > { %3192 = vmatmul.mubr.bf16.vlgmr.msra.gmra.mrb[0].mxu1 %v3699_v9  ;;  %v2332_v9 = vsel %vm770_vm0, %v2327_v1, %v2331_v2 }
 0x107   : > { %3320 = vmatmul.mubr.bf16.vlgmr.msra.gmra.mrb[0].mxu0 %v3700_v10  ;;  %3375 = vmatpush3.bf16.msra.mxu1 %v3701_v8  ;;  %v2301_v10 = vshrl.u32 %v3727_v42, 16 }
 0x108   : > { %3336 = vmatpush3.bf16.msra.mxu0 %v3701_v8  ;;  %3368 = vmatprep.subr.bf16.mxu1 %v3702_v11  ;;  %v2292_v8 = vsel %vm770_vm0, %v2287_v0, %v2291_v62 }
 0x109   : > { %3337 = vmatprep.subr.bf16.mxu0 %v3702_v11  ;;  %3195 = vmatprep.mubr.bf16.mxu1 %v3703_v12  ;;  %v2335_v12 = vor.u32 %v2333_v6, %v2331_v2 }
 0x10a   : > { %3323 = vmatprep.mubr.bf16.mxu0 %v3704_v13  ;;  %v2339_v13 = vrot.slane %v2337_v7, 1 }
 0x10b   : > { %3376 = vmatpush3.bf16.msra.mxu1 %v3702_v11 }
 0x10c   : > { %3338 = vmatpush3.bf16.msra.mxu0 %v3702_v11  ;;  %3369 = vmatprep.subr.bf16.mxu1 %v3707_v14  ;;  %v2300_v11 = vsel %vm770_vm0, %v2295_v3, %v2299_v4 }
 0x10d   : > { %3339 = vmatprep.subr.bf16.mxu0 %v3707_v14 }
 0x10e   : > { %3196 = vmatmul.mubr.bf16.gmra.mrb[4].mxu1 %v3705_v15  ;;  %v2340_v15 = vsel %vm770_vm0, %v2335_v12, %v2339_v13 }
 0x10f   : > { %3324 = vmatmul.mubr.bf16.gmra.mrb[4].mxu0 %v3706_v16  ;;  %3377 = vmatpush3.bf16.msra.mxu1 %v3707_v14 }
 0x110   : > { %3340 = vmatpush3.bf16.msra.mxu0 %v3707_v14  ;;  %3370 = vmatprep.subr.bf16.mxu1 %v3708_v17  ;;  %v2303_v14 = vor.u32 %v2301_v10, %v2299_v4 }
 0x111   : > { %3341 = vmatprep.subr.bf16.mxu0 %v3708_v17  ;;  %3199 = vmatprep.mubr.bf16.mxu1 %v3709_v18 }
 0x112   : > { %3327 = vmatprep.mubr.bf16.mxu0 %v3710_v19  ;;  %v2308_v16 = vsel %vm770_vm0, %v2303_v14, %v4257_v36 }
 0x113   : > { %3378 = vmatpush3.bf16.msra.mxu1 %v3708_v17 }
 0x114   : > { %3342 = vmatpush3.bf16.msra.mxu0 %v3708_v17  ;;  %3371 = vmatprep.subr.bf16.mxu1 %v3713_v20 }
 0x115   : > { %3343 = vmatprep.subr.bf16.mxu0 %v3713_v20 }
 0x116   : > { %3200 = vmatmul.mubr.bf16.gmra.mrb[8].mxu1 %v3711_v21 }
 0x117   : > { %3328 = vmatmul.mubr.bf16.gmra.mrb[8].mxu0 %v3712_v23  ;;  %3379 = vmatpush3.bf16.msra.mxu1 %v3713_v20 }
 0x118   : > { %3344 = vmatpush3.bf16.msra.mxu0 %v3713_v20  ;;  %3372 = vmatprep.subr.bf16.mxu1 %v3714_v28 }
 0x119   : > { %3345 = vmatprep.subr.bf16.mxu0 %v3714_v28  ;;  %3203 = vmatprep.mubr.bf16.mxu1 %v3715_v29 }
 0x11a   : > { %3331 = vmatprep.mubr.bf16.mxu0 %v3716_v30 }
 0x11b   : > { %3380 = vmatpush3.bf16.msra.mxu1 %v3714_v28 }
 0x11c   : > { %3346 = vmatpush3.bf16.msra.mxu0 %v3714_v28  ;;  %3373 = vmatprep.subr.bf16.mxu1 %v3719_v40 }
 0x11d   : > { %3347 = vmatprep.subr.bf16.mxu0 %v3719_v40 }
 0x11e   : > { %3204 = vmatmul.mubr.bf16.gmra.mrb[12].mxu1 %v3717_v43 }
 0x11f   : > { %3332 = vmatmul.mubr.bf16.gmra.mrb[12].mxu0 %v3718_v47  ;;  %3381 = vmatpush3.bf16.msra.mxu1 %v3719_v40 }
 0x120   : > { %3348 = vmatpush3.bf16.msra.mxu0 %v3719_v40  ;;  %3374 = vmatprep.subr.bf16.mxu1 %v3720_v52 }
 0x121   : > { %3349 = vmatprep.subr.bf16.mxu0 %v3720_v52  ;;  %3351 = vmatprep.mubr.bf16.mxu0 %v2284_v58 }
 0x122   : > { %3359 = vmatprep.mubr.bf16.mxu1 %v2316_v60 }
 0x123   : > { %3382 = vmatpush3.bf16.msra.mxu1 %v3720_v52 }
 0x124   : > { %3350 = vmatpush3.bf16.msra.mxu0 %v3720_v52 }
 0x126   : > { %3360 = vmatmul.mubr.bf16.vlgmr.msra.gmra.mrb[16].mxu1 %v2324_v5 }
 0x127   : > { %3352 = vmatmul.mubr.bf16.vlgmr.msra.gmra.mrb[0].mxu0 %v2292_v8  ;;  %3363 = vmatprep.mubr.bf16.mxu1 %v2332_v9 }
 0x128   : > { %3355 = vmatprep.mubr.bf16.mxu0 %v2300_v11 }
 0x12e   : > { %3364 = vmatmul.mubr.bf16.gmra.mrb[20].mxu1 %v2340_v15 }
 0x12f   : > { %3356 = vmatmul.mubr.bf16.gmra.mrb[4].mxu0 %v2308_v16 }
 0x1d9   : > { %v3193_v17 = vpop.f32.mrb[0].mxu1 }
 0x1da   : > { %v1156_v18 = vpop.f32.mrb[1].mxu1 }
 0x1db   : > { %v3194_v19 = vpop.f32.mrb[2].mxu1 }
 0x1dc   : > { %v1159_v20 = vpop.f32.mrb[3].mxu1 }
 0x1e1   : > { %v3197_v21 = vpop.f32.mrb[4].mxu1 }
 0x1e2   : > { %v1170_v22 = vpop.f32.mrb[5].mxu1 }
 0x1e3   : > { %v3198_v23 = vpop.f32.mrb[6].mxu1 }
 0x1e4   : > { %v1173_v24 = vpop.f32.mrb[7].mxu1 }
 0x1e9   : > { %v3201_v25 = vpop.f32.mrb[8].mxu1 }
 0x1ea   : > { %v3329_v26 = vpop.f32.mrb[8].mxu0  ;;  %v1184_v27 = vpop.f32.mrb[9].mxu1 }
 0x1eb   : > { %v3387_v28 = vadd.f32 %v3329_v26, %v3201_v25  ;;  %v2161_v29 = vpop.f32.mrb[9].mxu0  ;;  %v3202_v30 = vpop.f32.mrb[10].mxu1 }
 0x1ec   : > { %v3389_v31 = vadd.f32 %v2161_v29, %v1184_v27  ;;  %v3330_v32 = vpop.f32.mrb[10].mxu0  ;;  %v1187_v33 = vpop.f32.mrb[11].mxu1 }
 0x1ed   : > { %v2164_v34 = vpop.f32.mrb[11].mxu0 }
 0x1f1   : > { %v3205_v35 = vpop.f32.mrb[12].mxu1 }
 0x1f2   : > { %v3333_v36 = vpop.f32.mrb[12].mxu0  ;;  %v1198_v37 = vpop.f32.mrb[13].mxu1 }
 0x1f3   : > { %v3391_v38 = vadd.f32 %v3333_v36, %v3205_v35  ;;  %v2175_v39 = vpop.f32.mrb[13].mxu0  ;;  %v3206_v40 = vpop.f32.mrb[14].mxu1 }
 0x1f4   : > { %v3393_v41 = vadd.f32 %v2175_v39, %v1198_v37  ;;  %v3334_v42 = vpop.f32.mrb[14].mxu0  ;;  %v1201_v43 = vpop.f32.mrb[15].mxu1 }
 0x1f5   : > { %v2178_v44 = vpop.f32.mrb[15].mxu0 }
 0x1f9   : > { %v3361_v46 = vpop.f32.mrb[16].mxu1 }
 0x1fa   : > { %v3353_v47 = vpop.f32.mrb[0].mxu0  ;;  %v3388_v48 = vadd.f32 %v3387_v28, %v3361_v46  ;;  %v2459_v49 = vpop.f32.mrb[17].mxu1 }
 0x1fb   : > { %v3383_v50 = vadd.f32 %v3353_v47, %v3193_v17  ;;  %v2431_v52 = vpop.f32.mrb[1].mxu0  ;;  %v3390_v53 = vadd.f32 %v3389_v31, %v2459_v49  ;;  %v3362_v54 = vpop.f32.mrb[18].mxu1 }
 0x1fc   : > { %v2506_v55 = vmul.f32 %v3388_v48, %v2904_v45  ;;  %v3384_v56 = vadd.f32 %v2431_v52, %v1156_v18  ;;  %v3354_v57 = vpop.f32.mrb[2].mxu0  ;;  %v2462_v58 = vpop.f32.mrb[19].mxu1 }
 0x1fd   : > { %v2502_v59 = vmul.f32 %v3383_v50, %v2904_v45  ;;  %v2505_v60 = vmul.f32 %v3390_v53, %v2904_v45  ;;  %v2434_v61 = vpop.f32.mrb[3].mxu0 }
 0x1fe   : > { %v2521_v62 = vadd.f32 %v2905_v51, %v2506_v55  ;;  %v2501_v63 = vmul.f32 %v3384_v56, %v2904_v45 }
 0x1ff   : > { %v2517_v0 = vadd.f32 %v2905_v51, %v2502_v59  ;;  %v2520_v1 = vadd.f32 %v2905_v51, %v2505_v60 }
 0x200   : > { %v2529_v2 = vmax.f32 %v2521_v62, 0.0  ;;  %v2516_v3 = vadd.f32 %v2905_v51, %v2501_v63 }
 0x201   : > { %v2525_v4 = vmax.f32 %v2517_v0, 0.0  ;;  %v2528_v5 = vmax.f32 %v2520_v1, 0.0  ;;  %v3365_v6 = vpop.f32.mrb[20].mxu1 }
 0x202   : > { %v2524_v7 = vmax.f32 %v2516_v3, 0.0  ;;  %v3357_v8 = vpop.f32.mrb[4].mxu0  ;;  %v3392_v9 = vadd.f32 %v3391_v38, %v3365_v6  ;;  %v2473_v10 = vpop.f32.mrb[21].mxu1 }
 0x203   : > { %v2925_v11 = vpack.c.bf16 %v2529_v2, %v2528_v5  ;;  %v3385_v12 = vadd.f32 %v3357_v8, %v3197_v21  ;;  %v2445_v13 = vpop.f32.mrb[5].mxu0  ;;  %v3394_v14 = vadd.f32 %v3393_v41, %v2473_v10  ;;  %v3366_v15 = vpop.f32.mrb[22].mxu1 }
 0x204   : > { %v2915_v16 = vpack.c.bf16 %v2525_v4, %v2524_v7  ;;  %v2508_v17 = vmul.f32 %v3392_v9, %v2904_v45  ;;  %v3386_v18 = vadd.f32 %v2445_v13, %v1170_v22  ;;  %v3358_v19 = vpop.f32.mrb[6].mxu0  ;;  %v2476_v20 = vpop.f32.mrb[23].mxu1 }
 0x205   : > { %2933 = vst [vmem:[%s255_s23 + $0x10] sm:$0xff] %v2925_v11   ;;  %v2504_v23 = vmul.f32 %v3385_v12, %v2904_v45  ;;  %v2507_v24 = vmul.f32 %v3394_v14, %v2904_v45  ;;  %v2448_v25 = vpop.f32.mrb[7].mxu0 }
 0x206   : > { %2916 = vst [vmem:[%s255_s23] sm:$0xff] %v2915_v16   ;;  %v2523_v26 = vadd.f32 %v2905_v51, %v2508_v17  ;;  %v2503_v27 = vmul.f32 %v3386_v18, %v2904_v45 }
 0x207   : > { %v2519_v21 = vadd.f32 %v2905_v51, %v2504_v23  ;;  %v2522_v28 = vadd.f32 %v2905_v51, %v2507_v24 }
 0x208   : > { %v2531_v29 = vmax.f32 %v2523_v26, 0.0  ;;  %v2518_v30 = vadd.f32 %v2905_v51, %v2503_v27 }
 0x209   : > { %v2527_v22 = vmax.f32 %v2519_v21, 0.0  ;;  %v2530_v31 = vmax.f32 %v2522_v28, 0.0 }
 0x20a   : > { %v2526_v32 = vmax.f32 %v2518_v30, 0.0 }
 0x20b   : > { %v2930_v33 = vpack.c.bf16 %v2531_v29, %v2530_v31 }
 0x20c   : > { %v2920_v34 = vpack.c.bf16 %v2527_v22, %v2526_v32 }
 0x20d   : > { %2934 = vst [vmem:[%s255_s23 + $0x18] sm:$0xff] %v2930_v33  }
 0x20e   : > { %2932 = vst [vmem:[%s255_s23 + $0x8] sm:$0xff] %v2920_v34  }
 0x20f   : > { %3857 = shalt.err (!%p3854_p4)
}
 0x210   : > { %s3858_s11 = scalar_lea.hbm %s4282_s28, 512  ;;  %s3862_s5 = scalar_lea.hbm %s4330_s4, 1024 }
 0x211   : > { %p3859_p9 = scmp.ne.s32.totalorder %s4282_s28, %s3858_s11  ;;  %p3863_p8 = scmp.lt.u32.totalorder %s4282_s28, %s4330_s4 }
 0x212   : > { %p3864_p13 = scmp.lt.u32.totalorder %s3862_s5, %s3858_s11  ;;  %p3866_p10 = scmp.lt.u32.totalorder %s3858_s11, %s4282_s28 }
 0x213   : > { %p3860_p0 = pnand %p3859_p9, %p4103_p5 }
 0x214   : > { %p3865_p6 = por %p3864_p13, %p3863_p8 }
 0x215   : > { %p3861_p11 = pneg %p3860_p0 }
 0x216   : > { %p3867_p3 = por %p3866_p10, %p3865_p6 }
 0x218   : > { %p3868_p7 = pnand %p3867_p3, %p3861_p11 }
 0x21a   : > { %3871 = shalt.err (!%p3868_p7)
}
 0x21b   : > { %s3927_s23 = smov 64   ;;  %s3928_s20 = smov 4  }
 0x21c   : > { %3516 = dma.vmem_to_hbm [thread:$0]  (%p4103_p5), %s4277_s14, 512, %s4282_s28, %s2549_s25, %s3927_s23, %s3927_s23, %s3928_s20  }
 0x21d PF: > { %s2577_s6 = sand.u32 1, %s3906_s15   ;;  %p4348_p12 = scmp.ne.s32.totalorder %s4335_s22, 0 }
 0x21e   : > { %p4349_p1 = scmp.ge.s32.totalorder %s3918_s18, 2  ;;  %s2578_s9 = scalar_lea.sflag [#allocation4], %s2577_s6 }
 0x220   : > { %p3533_p2 = pnand %p4349_p1, %p4348_p12 }
 0x222   : > { %3901 = dma.done.wait (!%p3533_p2), %s2578_s9, 512  }
 0x223   : > { %3903 = vsyncadd (!%p3533_p2), %s2578_s9, 4294966784  ;;  %p19_p4 = scmp.ge.s32.totalorder %s4089_s10, 4   ;;  %s4350_s15 = smov %s3910_s16 }
 0x224   : > { %s4351_s16 = smov %s3914_s17  ;;  %s4352_s17 = smov %s4099_s24 }
 0x225   : > { %s4353_s18 = smov %s4089_s10  ;;  %21 = sbr.rel (!%p19_p4) target bundleno = 7 (0x7), region = 104 }
 0x22c   :  { %2583 = vsyncpa [#allocation3], 1 }
 0x22d   :  { %2585 = vsyncpa [#allocation3 + $0x1], 1 }
 0x22e   :  { %2586 = vsyncpa [#allocation6], 1 }
 0x22f   :  { %2587 = vsyncpa [#allocation9], 1 }
 0x230   :  { %2588 = vsyncpa [#allocation4], 1 }
 0x231   :  { %2590 = vsyncpa [#allocation4 + $0x1], 1 }

</bundles_post_ra>
